<compile_context>
chip_gen: v7x
topology: tpu7x:2x2x1
jax: 0.10.0
libtpu: 0.0.40
codegen_flags: <defaults>
</compile_context>

<pallas_src>
import numpy as np
import jax
import jax.numpy as jnp
from jax import lax
from jax.experimental import pallas as pl
from jax.experimental.pallas import tpu as pltpu

_EPS = 1e-5


# ----------------------------------------------------------------------------
# static operators (built from shapes / weights only, outside the kernel)
# ----------------------------------------------------------------------------

def _adaptive_pool_matrix(in_size, out_size):
    """AdaptiveAvgPool1d as a matrix: row i averages [floor(i*in/out), ceil((i+1)*in/out))."""
    P = np.zeros((out_size, in_size), np.float32)
    for i in range(out_size):
        s = (i * in_size) // out_size
        e = ((i + 1) * in_size + out_size - 1) // out_size
        P[i, s:e] = 1.0 / (e - s)
    return P


def _nearest_matrix(out_size, in_size):
    """PyTorch F.interpolate(mode='nearest') as a one-hot selection matrix."""
    S = np.zeros((out_size, in_size), np.float32)
    for i in range(out_size):
        S[i, (i * in_size) // out_size] = 1.0
    return S


def _pool_kron(in_size, out_size):
    P = _adaptive_pool_matrix(in_size, out_size)
    return jnp.asarray(np.kron(P, P))          # (out*out, in*in)


def _upsample_kron(in_size, out_size):
    S = _nearest_matrix(out_size, in_size)
    return jnp.asarray(np.kron(S, S))          # (out*out, in*in)


def _im2col(x_nhwc, ksize, stride, pad, dilation):
    """im2col for the two stride-3 input stream convolutions (host-side prep)."""
    n, h, w, c = x_nhwc.shape
    xp = jnp.pad(x_nhwc, ((0, 0), (pad, pad), (pad, pad), (0, 0)))
    ho = (h + 2 * pad - dilation * (ksize - 1) - 1) // stride + 1
    wo = (w + 2 * pad - dilation * (ksize - 1) - 1) // stride + 1
    cols = []
    for kh in range(ksize):
        for kw in range(ksize):
            start = (0, kh * dilation, kw * dilation, 0)
            limit = (n, kh * dilation + (ho - 1) * stride + 1,
                     kw * dilation + (wo - 1) * stride + 1, c)
            cols.append(lax.slice(xp, start, limit, (1, stride, stride, 1)))
    col = jnp.concatenate(cols, axis=-1)                     # (n, ho, wo, k*k*c)
    return col.reshape(n, ho * wo, ksize * ksize * c), ho, wo


# ----------------------------------------------------------------------------
# Pallas kernels
# ----------------------------------------------------------------------------

def _menet_feature_kernel(x_ref, col1_ref, col2_ref,
                          ws1_ref, ps1_ref, ws2_ref, ps2_ref,
                          wc1_ref, pc1_ref, wc2_ref, pc2_ref,
                          wmean_ref, k16_ref, k6_ref, k3_ref,
                          u6a_ref, u6b_ref,
                          feat_ref, pad_ref, col_ref):
    """Whole MeNet_CS feature path for one image (all intermediates in VMEM)."""
    F = feat_ref.shape[-1]
    classes = wmean_ref.shape[-1]

    def attenmap(l):                                         # l: (25, C)
        lmean = jnp.mean(l, axis=-1, keepdims=True)          # (25, 1)
        wm = wmean_ref[...]                                  # (25, classes)
        acc = jnp.zeros_like(lmean)
        for idx in range(classes):                           # static, small
            cam = wm[:, idx:idx + 1] * lmean
            cam = cam - jnp.min(cam)
            cam = cam / jnp.max(cam)
            acc = acc + cam
        return acc * (1.0 / classes)                         # (25, 1)

    def stream(col_in, w_ref, p_ref):
        # Conv(k3,s3) -> +bias -> ReLU -> BN (folded), im2col prepared outside.
        s = jnp.dot(col_in, w_ref[...], preferred_element_type=jnp.float32)
        return jnp.maximum(s + p_ref[0:1, :], 0.0) * p_ref[1:2, :] + p_ref[2:3, :]

    def conv2_bn_relu(v):                                    # (36, F) -> (36, F)
        # pad=1 handled by the zero halo of pad_ref; im2col packed into col_ref
        # so the conv is a single (36, 9F) x (9F, F) MXU matmul.
        pad_ref[1:7, 1:7, :] = v.reshape(6, 6, F)
        xp = pad_ref[...]                                    # (8, 8, F)
        t = 0
        for kh in range(3):
            for kw in range(3):
                col_ref[:, t * F:(t + 1) * F] = (
                    xp[kh:kh + 6, kw:kw + 6, :].reshape(36, F))
                t += 1
        o = jnp.dot(col_ref[...], wc2_ref[...], preferred_element_type=jnp.float32)
        return jnp.maximum(o * pc2_ref[0:1, :] + pc2_ref[1:2, :], 0.0)

    x_in = x_ref[0]                                          # (H*W, Cin)

    # M1 = attenmap(AdaptiveAvgPool2d(x, 5))  -- pooling as one matmul
    m1 = attenmap(jnp.dot(k16_ref[...], x_in, preferred_element_type=jnp.float32))

    # two input streams; channel concat realized via pre-padded weights
    xc = (stream(col1_ref[0], ws1_ref, ps1_ref) +
          stream(col2_ref[0], ws2_ref, ps2_ref))             # (36, F)

    # x = x + W[0,1] * (nearest_up(M1) * x)   (W[0,1] folded into u6a)
    xa = xc * (1.0 + jnp.dot(u6a_ref[...], m1, preferred_element_type=jnp.float32))

    # M2 = attenmap(AdaptiveAvgPool2d(x, 5))
    m2 = attenmap(jnp.dot(k6_ref[...], xa, preferred_element_type=jnp.float32))

    # conv1 (1x1) -> BN -> ReLU  (BN + bias folded into scale/shift)
    y = jnp.dot(xa, wc1_ref[...], preferred_element_type=jnp.float32)
    y = jnp.maximum(y * pc1_ref[0:1, :] + pc1_ref[1:2, :], 0.0)

    # y = y + W[1,1] * (nearest_up(M2) * y)   (W[1,1] folded into u6b)
    ya = y * (1.0 + jnp.dot(u6b_ref[...], m2, preferred_element_type=jnp.float32))

    # three shared conv2 applications with residual sums (z1/e1/out1 are dead)
    pad_ref[...] = jnp.zeros_like(pad_ref)                   # zero halo once
    z = conv2_bn_relu(xa + ya)
    e = conv2_bn_relu(xa + ya + z)
    o = conv2_bn_relu(xa + ya + z + e)                       # (36, F)

    # MaxPool2d(kernel=2, stride=2): (6,6,F) -> (3,3,F), vectorized row maxima
    pieces = []
    for oh in range(3):
        r = jnp.maximum(o[12 * oh:12 * oh + 6, :], o[12 * oh + 6:12 * oh + 12, :])
        for ow in range(3):
            pieces.append(jnp.maximum(r[2 * ow:2 * ow + 1, :],
                                      r[2 * ow + 1:2 * ow + 2, :]))
    pooled = jnp.concatenate(pieces, axis=0)                 # (9, F), rows h*3+w

    # AdaptiveAvgPool2d((5,5)) on the 3x3 map: one matmul
    feat_ref[0, :, :] = jnp.dot(k3_ref[...], pooled,
                                preferred_element_type=jnp.float32)   # (25, F)


def _classifier_kernel(x_ref, w_ref, b_ref, o_ref):
    o_ref[...] = jnp.dot(x_ref[...], w_ref[...],
                         preferred_element_type=jnp.float32) + b_ref[...]


# ----------------------------------------------------------------------------
# wrappers
# ----------------------------------------------------------------------------

def menet_feature_pallas(x_flat, col1, col2, ws1, ps1, ws2, ps2,
                         wc1, pc1, wc2, pc2, wmean, k16, k6, k3, u6a, u6b):
    n, hw_in, cin = x_flat.shape
    f = wc1.shape[1]

    def shared(shape):
        return pl.BlockSpec(shape, lambda i, _r=len(shape): (0,) * _r)

    return pl.pallas_call(
        _menet_feature_kernel,
        out_shape=jax.ShapeDtypeStruct((n, 25, f), jnp.float32),
        grid=(n,),
        in_specs=[
            pl.BlockSpec((1, hw_in, cin), lambda i: (i, 0, 0)),
            pl.BlockSpec((1,) + col1.shape[1:], lambda i: (i, 0, 0)),
            pl.BlockSpec((1,) + col2.shape[1:], lambda i: (i, 0, 0)),
            shared(ws1.shape), shared(ps1.shape),
            shared(ws2.shape), shared(ps2.shape),
            shared(wc1.shape), shared(pc1.shape),
            shared(wc2.shape), shared(pc2.shape),
            shared(wmean.shape),
            shared(k16.shape), shared(k6.shape), shared(k3.shape),
            shared(u6a.shape), shared(u6b.shape),
        ],
        out_specs=pl.BlockSpec((1, 25, f), lambda i: (i, 0, 0)),
        scratch_shapes=[pltpu.VMEM((8, 8, f), jnp.float32),        # padded conv2 input
                        pltpu.VMEM((36, 9 * f), jnp.float32)],     # im2col buffer
        compiler_params=pltpu.CompilerParams(
            dimension_semantics=("parallel",)),
    )(x_flat, col1, col2, ws1, ps1, ws2, ps2, wc1, pc1, wc2, pc2,
      wmean, k16, k6, k3, u6a, u6b)


def classifier_pallas(feat_flat, w_hwc, bias):
    n, k = feat_flat.shape
    classes = w_hwc.shape[1]
    return pl.pallas_call(
        _classifier_kernel,
        out_shape=jax.ShapeDtypeStruct((n, classes), jnp.float32),
        grid=(1,),
        in_specs=[pl.BlockSpec((n, k), lambda i: (0, 0)),
                  pl.BlockSpec((k, classes), lambda i: (0, 0)),
                  pl.BlockSpec((1, classes), lambda i: (0, 0))],
        out_specs=pl.BlockSpec((n, classes), lambda i: (0, 0)),
    )(feat_flat, w_hwc, bias.reshape(1, classes))


# ----------------------------------------------------------------------------
# params & forward
# ----------------------------------------------------------------------------

def init_params(key, num_input, featuremaps, num_classes, pool_size=5):
    nc = featuremaps // 2
    ks = jax.random.split(key, 26)

    def bn(k0, k1, k2, k3, c):
        gamma = 1.0 + 0.1 * jax.random.normal(k0, (c,), jnp.float32)
        beta = 0.1 * jax.random.normal(k1, (c,), jnp.float32)
        mean = 0.1 * jax.random.normal(k2, (c,), jnp.float32)
        var = jax.random.uniform(k3, (c,), jnp.float32, 0.5, 1.5)
        return gamma, beta, mean, var

    p = {}
    p['archi'] = jnp.full((2, 2), 0.5, jnp.float32)          # nn.init.constant(archi, 0.5)
    p['w_s1'] = 0.25 * jax.random.normal(ks[0], (3, 3, num_input, nc), jnp.float32)
    p['b_s1'] = 0.1 * jax.random.normal(ks[1], (nc,), jnp.float32)
    p['bn_s1'] = bn(ks[2], ks[3], ks[4], ks[5], nc)
    p['w_s2'] = 0.25 * jax.random.normal(ks[6], (3, 3, num_input, nc), jnp.float32)
    p['b_s2'] = 0.1 * jax.random.normal(ks[7], (nc,), jnp.float32)
    p['bn_s2'] = bn(ks[8], ks[9], ks[10], ks[11], nc)
    p['w_c1'] = 0.2 * jax.random.normal(ks[12], (featuremaps, featuremaps), jnp.float32)
    p['b_c1'] = 0.1 * jax.random.normal(ks[13], (featuremaps,), jnp.float32)
    p['bn_c1'] = bn(ks[14], ks[15], ks[16], ks[17], featuremaps)
    p['w_c2'] = 0.1 * jax.random.normal(ks[18], (3, 3, featuremaps, featuremaps), jnp.float32)
    p['b_c2'] = 0.1 * jax.random.normal(ks[19], (featuremaps,), jnp.float32)
    p['bn_c2'] = bn(ks[20], ks[21], ks[22], ks[23], featuremaps)
    p['w_cls'] = 0.05 * jax.random.normal(
        ks[24], (num_classes, pool_size * pool_size * featuremaps), jnp.float32)
    p['b_cls'] = 0.1 * jax.random.normal(ks[25], (num_classes,), jnp.float32)
    return p


def menet_cs_forward(params, x_nchw, pool_size=5):
    """Pallas forward of MeNet_CS (eval mode)."""
    classes = params['w_cls'].shape[0]
    F = params['w_c1'].shape[0]
    nc = params['w_s1'].shape[-1]
    N, cin, H, Wd = x_nchw.shape
    assert pool_size == 5

    x = jnp.transpose(x_nchw, (0, 2, 3, 1)).astype(jnp.float32)      # NHWC

    # ---- BN (eval) folded into scale/shift -------------------------------
    def bn_fold(stats):
        g, b, m, v = stats
        s = g / jnp.sqrt(v + _EPS)
        return s, b - m * s

    s_s1, sh_s1 = bn_fold(params['bn_s1'])      # streams: Conv -> ReLU -> BN
    s_s2, sh_s2 = bn_fold(params['bn_s2'])
    s_c1, sh_c1 = bn_fold(params['bn_c1'])      # conv1/2: Conv -> BN -> ReLU
    s_c2, sh_c2 = bn_fold(params['bn_c2'])
    sh_c1 = sh_c1 + s_c1 * params['b_c1']       # fold conv bias (pre-ReLU BN)
    sh_c2 = sh_c2 + s_c2 * params['b_c2']

    # ---- stream weights: im2col layout + zero-pad to the concat channels --
    ws1 = params['w_s1'].reshape(9 * cin, nc)
    ws2 = params['w_s2'].reshape(9 * cin, nc)
    ws1f = jnp.pad(ws1, ((0, 0), (0, F - nc)))
    ws2f = jnp.pad(ws2, ((0, 0), (F - nc, 0)))
    ps1f = jnp.pad(jnp.stack([params['b_s1'], s_s1, sh_s1]), ((0, 0), (0, F - nc)))
    ps2f = jnp.pad(jnp.stack([params['b_s2'], s_s2, sh_s2]), ((0, 0), (F - nc, 0)))

    wc1 = params['w_c1']                                     # (Cin, Cout)
    pc1 = jnp.stack([s_c1, sh_c1])
    wc2 = params['w_c2'].reshape(9 * F, F)                   # im2col layout
    pc2 = jnp.stack([s_c2, sh_c2])

    # ---- classifier-weight derived operators ------------------------------
    w_cls = params['w_cls']                                  # (classes, F*25), (c,h,w) order
    wmean = (w_cls.reshape(classes, F, pool_size, pool_size).mean(axis=1)
             .reshape(classes, pool_size * pool_size).T)     # (25, classes)
    w_cls_hwc = (w_cls.reshape(classes, F, pool_size, pool_size)
                 .transpose(2, 3, 1, 0).reshape(pool_size * pool_size * F, classes))

    # attention mixing scalars folded into the nearest-upsample operators
    Wmix = jax.nn.softmax(params['archi'], axis=0)
    U6 = _upsample_kron(pool_size, 6)
    u6a = Wmix[0, 1] * U6
    u6b = Wmix[1, 1] * U6

    K16 = _pool_kron(H, pool_size)                           # (25, H*W)
    K6 = _pool_kron(6, pool_size)
    K3 = _pool_kron(3, pool_size)

    # ---- stride-3 stream convs: im2col prepared on the host side ----------
    col1, ho, wo = _im2col(x, 3, 3, 1, 1)                    # (N, 36, 9*cin)
    col2, _, _ = _im2col(x, 3, 3, 3, 3)                      # (N, 36, 9*cin)
    assert ho == 6 and wo == 6

    x_flat = x.reshape(N, H * Wd, cin)

    feats = menet_feature_pallas(x_flat, col1, col2, ws1f, ps1f, ws2f, ps2f,
                                 wc1, pc1, wc2, pc2, wmean, K16, K6, K3,
                                 u6a, u6b)                   # (N, 25, F)

    logits = classifier_pallas(feats.reshape(N, pool_size * pool_size * F),
                               w_cls_hwc, params['b_cls'])
    return logits


# ----------------------------------------------------------------------------
# pure-JAX reference (mirrors PyTorch MeNet_CS.forward, eval mode)
# ----------------------------------------------------------------------------

def reference_forward(params, x_nchw, pool_size=5):
    hp = lax.Precision.HIGHEST
    classes = params['w_cls'].shape[0]
    x = jnp.transpose(x_nchw, (0, 2, 3, 1)).astype(jnp.float32)
    N = x.shape[0]

    def bn(v, stats):
        g, b, m, var = stats
        return (v - m) / jnp.sqrt(var + _EPS) * g + b

    def adaptive_pool(v, out):
        Ph = jnp.asarray(_adaptive_pool_matrix(v.shape[1], out))
        Pw = jnp.asarray(_adaptive_pool_matrix(v.shape[2], out))
        t = jnp.einsum('oh,nhwc->nowc', Ph, v, precision=hp)
        return jnp.einsum('pw,nowc->nopc', Pw, t, precision=hp)

    def attenmap(l):                                         # l: (N,5,5,C)
        lmean = l.mean(axis=-1)
        wmean = params['w_cls'].reshape(classes, -1, pool_size, pool_size).mean(axis=1)
        cams = []
        for idx in range(classes):
            cam = wmean[idx][None] * lmean
            cam = cam - cam.min(axis=(1, 2), keepdims=True)
            cam = cam / cam.max(axis=(1, 2), keepdims=True)
            cams.append(cam)
        return jnp.stack(cams, axis=1).mean(axis=1)          # (N,5,5)

    def nearest_up(m, out):
        idx = np.array([(i * pool_size) // out for i in range(out)])
        return m[:, idx][:, :, idx]

    Wmix = jax.nn.softmax(params['archi'], axis=0)

    M1 = attenmap(adaptive_pool(x, pool_size))
    s1 = lax.conv_general_dilated(x, params['w_s1'], (3, 3), ((1, 1), (1, 1)),
                                  dimension_numbers=('NHWC', 'HWIO', 'NHWC'),
                                  precision=hp) + params['b_s1']
    s1 = bn(jnp.maximum(s1, 0.0), params['bn_s1'])
    s2 = lax.conv_general_dilated(x, params['w_s2'], (3, 3), ((3, 3), (3, 3)),
                                  rhs_dilation=(3, 3),
                                  dimension_numbers=('NHWC', 'HWIO', 'NHWC'),
                                  precision=hp) + params['b_s2']
    s2 = bn(jnp.maximum(s2, 0.0), params['bn_s2'])
    xc = jnp.concatenate([s1, s2], axis=-1)                  # (N,6,6,F)

    xa = xc + Wmix[0, 1] * (nearest_up(M1, xc.shape[1])[..., None] * xc)
    M2 = attenmap(adaptive_pool(xa, pool_size))
    y = jnp.einsum('nhwc,cd->nhwd', xa, params['w_c1'], precision=hp) + params['b_c1']
    y = jnp.maximum(bn(y, params['bn_c1']), 0.0)
    ya = y + Wmix[1, 1] * (nearest_up(M2, y.shape[1])[..., None] * y)

    def conv2(v):
        o = lax.conv_general_dilated(v, params['w_c2'], (1, 1), ((1, 1), (1, 1)),
                                     dimension_numbers=('NHWC', 'HWIO', 'NHWC'),
                                     precision=hp) + params['b_c2']
        return jnp.maximum(bn(o, params['bn_c2']), 0.0)

    z = conv2(xa + ya)
    e = conv2(xa + ya + z)
    out = conv2(xa + ya + z + e)
    out = lax.reduce_window(out, -jnp.inf, lax.max, (1, 2, 2, 1), (1, 2, 2, 1), 'VALID')
    feat = adaptive_pool(out, pool_size)                     # (N,5,5,F)
    flat = jnp.transpose(feat, (0, 3, 1, 2)).reshape(N, -1)  # PyTorch (c,h,w) flatten
    return jnp.dot(flat, params['w_cls'].T, precision=hp) + params['b_cls']


# ----------------------------------------------------------------------------
# main
# ----------------------------------------------------------------------------

if __name__ == "__main__":
    N, num_input, featuremaps, num_classes, H, W = 2, 4, 16, 3, 16, 16
    key = jax.random.PRNGKey(0)
    kx, kp = jax.random.split(key)

    x = jax.random.normal(kx, (N, num_input, H, W), jnp.float32)     # NCHW like PyTorch
    params = init_params(kp, num_input, featuremaps, num_classes)

    fwd = jax.jit(menet_cs_forward)
    logits = jax.block_until_ready(fwd(params, x))

    ref = reference_forward(params, x)
    assert logits.shape == ref.shape == (N, num_classes), (logits.shape, ref.shape)
    err = float(jnp.max(jnp.abs(logits - ref)))
    tol = 1e-2 * max(1.0, float(jnp.max(jnp.abs(ref))))
    if not err <= tol:
        raise AssertionError(f"mismatch vs pure-JAX reference: {err} > {tol}")
    print("KERNEL_OK")
</pallas_src>

<mosaic_0001>
module attributes {stable_mosaic.version = 11 : i64} {
  func.func @_menet_feature_kernel(%arg0: i32, %arg1: memref<1x256x4xf32, #tpu.memory_space<vmem>>, %arg2: memref<1x36x36xf32, #tpu.memory_space<vmem>>, %arg3: memref<1x36x36xf32, #tpu.memory_space<vmem>>, %arg4: memref<36x16xf32, #tpu.memory_space<vmem>>, %arg5: memref<3x16xf32, #tpu.memory_space<vmem>>, %arg6: memref<36x16xf32, #tpu.memory_space<vmem>>, %arg7: memref<3x16xf32, #tpu.memory_space<vmem>>, %arg8: memref<16x16xf32, #tpu.memory_space<vmem>>, %arg9: memref<2x16xf32, #tpu.memory_space<vmem>>, %arg10: memref<144x16xf32, #tpu.memory_space<vmem>>, %arg11: memref<2x16xf32, #tpu.memory_space<vmem>>, %arg12: memref<25x3xf32, #tpu.memory_space<vmem>>, %arg13: memref<25x256xf32, #tpu.memory_space<vmem>>, %arg14: memref<25x36xf32, #tpu.memory_space<vmem>>, %arg15: memref<25x9xf32, #tpu.memory_space<vmem>>, %arg16: memref<36x25xf32, #tpu.memory_space<vmem>>, %arg17: memref<36x25xf32, #tpu.memory_space<vmem>>, %arg18: memref<1x25x16xf32, #tpu.memory_space<vmem>>, %arg19: memref<8x8x16xf32, #tpu.memory_space<vmem>>, %arg20: memref<36x144xf32, #tpu.memory_space<vmem>>) attributes {dimension_semantics = [#tpu.dimension_semantics<parallel>], iteration_bounds = array<i64: 2>, scalar_prefetch = 0 : i64, scratch_operands = 2 : i64, tpu.core_type = #tpu.core_type<tc>, window_params = [{transform_indices = @transform_0, window_bounds = array<i64: 1, 256, 4>}, {transform_indices = @transform_1, window_bounds = array<i64: 1, 36, 36>}, {transform_indices = @transform_2, window_bounds = array<i64: 1, 36, 36>}, {pipeline_mode = #tpu.pipeline_mode<synchronous>, transform_indices = @transform_3, window_bounds = array<i64: 36, 16>}, {pipeline_mode = #tpu.pipeline_mode<synchronous>, transform_indices = @transform_4, window_bounds = array<i64: 3, 16>}, {pipeline_mode = #tpu.pipeline_mode<synchronous>, transform_indices = @transform_5, window_bounds = array<i64: 36, 16>}, {pipeline_mode = #tpu.pipeline_mode<synchronous>, transform_indices = @transform_6, window_bounds = array<i64: 3, 16>}, {pipeline_mode = #tpu.pipeline_mode<synchronous>, transform_indices = @transform_7, window_bounds = array<i64: 16, 16>}, {pipeline_mode = #tpu.pipeline_mode<synchronous>, transform_indices = @transform_8, window_bounds = array<i64: 2, 16>}, {pipeline_mode = #tpu.pipeline_mode<synchronous>, transform_indices = @transform_9, window_bounds = array<i64: 144, 16>}, {pipeline_mode = #tpu.pipeline_mode<synchronous>, transform_indices = @transform_10, window_bounds = array<i64: 2, 16>}, {pipeline_mode = #tpu.pipeline_mode<synchronous>, transform_indices = @transform_11, window_bounds = array<i64: 25, 3>}, {pipeline_mode = #tpu.pipeline_mode<synchronous>, transform_indices = @transform_12, window_bounds = array<i64: 25, 256>}, {pipeline_mode = #tpu.pipeline_mode<synchronous>, transform_indices = @transform_13, window_bounds = array<i64: 25, 36>}, {pipeline_mode = #tpu.pipeline_mode<synchronous>, transform_indices = @transform_14, window_bounds = array<i64: 25, 9>}, {pipeline_mode = #tpu.pipeline_mode<synchronous>, transform_indices = @transform_15, window_bounds = array<i64: 36, 25>}, {pipeline_mode = #tpu.pipeline_mode<synchronous>, transform_indices = @transform_16, window_bounds = array<i64: 36, 25>}, {transform_indices = @transform_17, window_bounds = array<i64: 1, 25, 16>}]} {
    %c0 = arith.constant 0 : index
    %c0_0 = arith.constant 0 : index
    %c0_1 = arith.constant 0 : index
    %0 = vector.load %arg1[%c0, %c0_0, %c0_1] : memref<1x256x4xf32, #tpu.memory_space<vmem>>, vector<1x256x4xf32>
    %1 = vector.shape_cast %0 : vector<1x256x4xf32> to vector<256x4xf32>
    %c0_2 = arith.constant 0 : index
    %c0_3 = arith.constant 0 : index
    %2 = vector.load %arg13[%c0_2, %c0_3] : memref<25x256xf32, #tpu.memory_space<vmem>>, vector<25x256xf32>
    %cst = arith.constant dense<0.000000e+00> : vector<25x4xf32>
    %3 = tpu.matmul %2, %1, %cst {dimension_numbers = #tpu.dot_dimension_numbers<[1], [0], [0], [1], [0, 0, 1, 1], [], []>} : vector<25x256xf32>, vector<256x4xf32>, vector<25x4xf32> -> vector<25x4xf32>
    %cst_4 = arith.constant dense<0.000000e+00> : vector<25xf32>
    %4 = vector.multi_reduction <add>, %3, %cst_4 [1] : vector<25x4xf32> to vector<25xf32>
    %5 = vector.shape_cast %4 : vector<25xf32> to vector<25x1xf32>
    %cst_5 = arith.constant 4.000000e+00 : f32
    %6 = vector.broadcast %cst_5 : f32 to vector<25x1xf32>
    %7 = arith.divf %5, %6 : vector<25x1xf32>
    %c0_6 = arith.constant 0 : index
    %c0_7 = arith.constant 0 : index
    %8 = vector.load %arg12[%c0_6, %c0_7] : memref<25x3xf32, #tpu.memory_space<vmem>>, vector<25x3xf32>
    %cst_8 = arith.constant 0.000000e+00 : f32
    %9 = vector.broadcast %cst_8 : f32 to vector<25x1xf32>
    %10 = vector.extract_strided_slice %8 {offsets = [0, 0], sizes = [25, 1], strides = [1, 1]} : vector<25x3xf32> to vector<25x1xf32>
    %11 = arith.mulf %10, %7 : vector<25x1xf32>
    %12 = vector.shape_cast %11 : vector<25x1xf32> to vector<1x25x1xf32>
    %cst_9 = arith.constant dense<0x7F800000> : vector<1xf32>
    %13 = vector.multi_reduction <minimumf>, %12, %cst_9 [1, 2] : vector<1x25x1xf32> to vector<1xf32>
    %14 = vector.shape_cast %13 : vector<1xf32> to vector<1x1x1xf32>
    %15 = vector.extract %14[0, 0, 0] : f32 from vector<1x1x1xf32>
    %16 = vector.broadcast %15 : f32 to vector<25x1xf32>
    %17 = arith.subf %11, %16 : vector<25x1xf32>
    %18 = vector.shape_cast %17 : vector<25x1xf32> to vector<1x25x1xf32>
    %cst_10 = arith.constant dense<0xFF800000> : vector<1xf32>
    %19 = vector.multi_reduction <maximumf>, %18, %cst_10 [1, 2] : vector<1x25x1xf32> to vector<1xf32>
    %20 = vector.shape_cast %19 : vector<1xf32> to vector<1x1x1xf32>
    %21 = vector.extract %20[0, 0, 0] : f32 from vector<1x1x1xf32>
    %22 = vector.broadcast %21 : f32 to vector<25x1xf32>
    %23 = arith.divf %17, %22 : vector<25x1xf32>
    %24 = arith.addf %9, %23 : vector<25x1xf32>
    %25 = vector.extract_strided_slice %8 {offsets = [0, 1], sizes = [25, 1], strides = [1, 1]} : vector<25x3xf32> to vector<25x1xf32>
    %26 = arith.mulf %25, %7 : vector<25x1xf32>
    %27 = vector.shape_cast %26 : vector<25x1xf32> to vector<1x25x1xf32>
    %cst_11 = arith.constant dense<0x7F800000> : vector<1xf32>
    %28 = vector.multi_reduction <minimumf>, %27, %cst_11 [1, 2] : vector<1x25x1xf32> to vector<1xf32>
    %29 = vector.shape_cast %28 : vector<1xf32> to vector<1x1x1xf32>
    %30 = vector.extract %29[0, 0, 0] : f32 from vector<1x1x1xf32>
    %31 = vector.broadcast %30 : f32 to vector<25x1xf32>
    %32 = arith.subf %26, %31 : vector<25x1xf32>
    %33 = vector.shape_cast %32 : vector<25x1xf32> to vector<1x25x1xf32>
    %cst_12 = arith.constant dense<0xFF800000> : vector<1xf32>
    %34 = vector.multi_reduction <maximumf>, %33, %cst_12 [1, 2] : vector<1x25x1xf32> to vector<1xf32>
    %35 = vector.shape_cast %34 : vector<1xf32> to vector<1x1x1xf32>
    %36 = vector.extract %35[0, 0, 0] : f32 from vector<1x1x1xf32>
    %37 = vector.broadcast %36 : f32 to vector<25x1xf32>
    %38 = arith.divf %32, %37 : vector<25x1xf32>
    %39 = arith.addf %24, %38 : vector<25x1xf32>
    %40 = vector.extract_strided_slice %8 {offsets = [0, 2], sizes = [25, 1], strides = [1, 1]} : vector<25x3xf32> to vector<25x1xf32>
    %41 = arith.mulf %40, %7 : vector<25x1xf32>
    %42 = vector.shape_cast %41 : vector<25x1xf32> to vector<1x25x1xf32>
    %cst_13 = arith.constant dense<0x7F800000> : vector<1xf32>
    %43 = vector.multi_reduction <minimumf>, %42, %cst_13 [1, 2] : vector<1x25x1xf32> to vector<1xf32>
    %44 = vector.shape_cast %43 : vector<1xf32> to vector<1x1x1xf32>
    %45 = vector.extract %44[0, 0, 0] : f32 from vector<1x1x1xf32>
    %46 = vector.broadcast %45 : f32 to vector<25x1xf32>
    %47 = arith.subf %41, %46 : vector<25x1xf32>
    %48 = vector.shape_cast %47 : vector<25x1xf32> to vector<1x25x1xf32>
    %cst_14 = arith.constant dense<0xFF800000> : vector<1xf32>
    %49 = vector.multi_reduction <maximumf>, %48, %cst_14 [1, 2] : vector<1x25x1xf32> to vector<1xf32>
    %50 = vector.shape_cast %49 : vector<1xf32> to vector<1x1x1xf32>
    %51 = vector.extract %50[0, 0, 0] : f32 from vector<1x1x1xf32>
    %52 = vector.broadcast %51 : f32 to vector<25x1xf32>
    %53 = arith.divf %47, %52 : vector<25x1xf32>
    %54 = arith.addf %39, %53 : vector<25x1xf32>
    %cst_15 = arith.constant 0.333333343 : f32
    %55 = vector.broadcast %cst_15 : f32 to vector<25x1xf32>
    %56 = arith.mulf %54, %55 : vector<25x1xf32>
    %c0_16 = arith.constant 0 : index
    %c0_17 = arith.constant 0 : index
    %c0_18 = arith.constant 0 : index
    %57 = vector.load %arg2[%c0_16, %c0_17, %c0_18] : memref<1x36x36xf32, #tpu.memory_space<vmem>>, vector<1x36x36xf32>
    %58 = vector.shape_cast %57 : vector<1x36x36xf32> to vector<36x36xf32>
    %c0_19 = arith.constant 0 : index
    %c0_20 = arith.constant 0 : index
    %59 = vector.load %arg4[%c0_19, %c0_20] : memref<36x16xf32, #tpu.memory_space<vmem>>, vector<36x16xf32>
    %cst_21 = arith.constant dense<0.000000e+00> : vector<36x16xf32>
    %60 = tpu.matmul %58, %59, %cst_21 {dimension_numbers = #tpu.dot_dimension_numbers<[1], [0], [0], [1], [0, 0, 1, 1], [], []>} : vector<36x36xf32>, vector<36x16xf32>, vector<36x16xf32> -> vector<36x16xf32>
    %c0_22 = arith.constant 0 : index
    %c0_23 = arith.constant 0 : index
    %61 = vector.load %arg5[%c0_22, %c0_23] : memref<3x16xf32, #tpu.memory_space<vmem>>, vector<1x16xf32>
    %62 = vector.broadcast %61 : vector<1x16xf32> to vector<36x16xf32>
    %63 = arith.addf %60, %62 : vector<36x16xf32>
    %cst_24 = arith.constant 0.000000e+00 : f32
    %64 = vector.broadcast %cst_24 : f32 to vector<36x16xf32>
    %65 = arith.maximumf %63, %64 : vector<36x16xf32>
    %c1 = arith.constant 1 : index
    %c0_25 = arith.constant 0 : index
    %66 = vector.load %arg5[%c1, %c0_25] : memref<3x16xf32, #tpu.memory_space<vmem>>, vector<1x16xf32>
    %67 = vector.broadcast %66 : vector<1x16xf32> to vector<36x16xf32>
    %68 = arith.mulf %65, %67 : vector<36x16xf32>
    %c2 = arith.constant 2 : index
    %c0_26 = arith.constant 0 : index
    %69 = vector.load %arg5[%c2, %c0_26] : memref<3x16xf32, #tpu.memory_space<vmem>>, vector<1x16xf32>
    %70 = vector.broadcast %69 : vector<1x16xf32> to vector<36x16xf32>
    %71 = arith.addf %68, %70 : vector<36x16xf32>
    %c0_27 = arith.constant 0 : index
    %c0_28 = arith.constant 0 : index
    %c0_29 = arith.constant 0 : index
    %72 = vector.load %arg3[%c0_27, %c0_28, %c0_29] : memref<1x36x36xf32, #tpu.memory_space<vmem>>, vector<1x36x36xf32>
    %73 = vector.shape_cast %72 : vector<1x36x36xf32> to vector<36x36xf32>
    %c0_30 = arith.constant 0 : index
    %c0_31 = arith.constant 0 : index
    %74 = vector.load %arg6[%c0_30, %c0_31] : memref<36x16xf32, #tpu.memory_space<vmem>>, vector<36x16xf32>
    %cst_32 = arith.constant dense<0.000000e+00> : vector<36x16xf32>
    %75 = tpu.matmul %73, %74, %cst_32 {dimension_numbers = #tpu.dot_dimension_numbers<[1], [0], [0], [1], [0, 0, 1, 1], [], []>} : vector<36x36xf32>, vector<36x16xf32>, vector<36x16xf32> -> vector<36x16xf32>
    %c0_33 = arith.constant 0 : index
    %c0_34 = arith.constant 0 : index
    %76 = vector.load %arg7[%c0_33, %c0_34] : memref<3x16xf32, #tpu.memory_space<vmem>>, vector<1x16xf32>
    %77 = vector.broadcast %76 : vector<1x16xf32> to vector<36x16xf32>
    %78 = arith.addf %75, %77 : vector<36x16xf32>
    %cst_35 = arith.constant 0.000000e+00 : f32
    %79 = vector.broadcast %cst_35 : f32 to vector<36x16xf32>
    %80 = arith.maximumf %78, %79 : vector<36x16xf32>
    %c1_36 = arith.constant 1 : index
    %c0_37 = arith.constant 0 : index
    %81 = vector.load %arg7[%c1_36, %c0_37] : memref<3x16xf32, #tpu.memory_space<vmem>>, vector<1x16xf32>
    %82 = vector.broadcast %81 : vector<1x16xf32> to vector<36x16xf32>
    %83 = arith.mulf %80, %82 : vector<36x16xf32>
    %c2_38 = arith.constant 2 : index
    %c0_39 = arith.constant 0 : index
    %84 = vector.load %arg7[%c2_38, %c0_39] : memref<3x16xf32, #tpu.memory_space<vmem>>, vector<1x16xf32>
    %85 = vector.broadcast %84 : vector<1x16xf32> to vector<36x16xf32>
    %86 = arith.addf %83, %85 : vector<36x16xf32>
    %87 = arith.addf %71, %86 : vector<36x16xf32>
    %c0_40 = arith.constant 0 : index
    %c0_41 = arith.constant 0 : index
    %88 = vector.load %arg16[%c0_40, %c0_41] : memref<36x25xf32, #tpu.memory_space<vmem>>, vector<36x25xf32>
    %cst_42 = arith.constant dense<0.000000e+00> : vector<36x1xf32>
    %89 = tpu.matmul %88, %56, %cst_42 {dimension_numbers = #tpu.dot_dimension_numbers<[1], [0], [0], [1], [0, 0, 1, 1], [], []>} : vector<36x25xf32>, vector<25x1xf32>, vector<36x1xf32> -> vector<36x1xf32>
    %cst_43 = arith.constant 1.000000e+00 : f32
    %90 = vector.broadcast %cst_43 : f32 to vector<36x1xf32>
    %91 = arith.addf %90, %89 : vector<36x1xf32>
    %92 = vector.broadcast %91 : vector<36x1xf32> to vector<36x16xf32>
    %93 = arith.mulf %87, %92 : vector<36x16xf32>
    %c0_44 = arith.constant 0 : index
    %c0_45 = arith.constant 0 : index
    %94 = vector.load %arg14[%c0_44, %c0_45] : memref<25x36xf32, #tpu.memory_space<vmem>>, vector<25x36xf32>
    %cst_46 = arith.constant dense<0.000000e+00> : vector<25x16xf32>
    %95 = tpu.matmul %94, %93, %cst_46 {dimension_numbers = #tpu.dot_dimension_numbers<[1], [0], [0], [1], [0, 0, 1, 1], [], []>} : vector<25x36xf32>, vector<36x16xf32>, vector<25x16xf32> -> vector<25x16xf32>
    %cst_47 = arith.constant dense<0.000000e+00> : vector<25xf32>
    %96 = vector.multi_reduction <add>, %95, %cst_47 [1] : vector<25x16xf32> to vector<25xf32>
    %97 = vector.shape_cast %96 : vector<25xf32> to vector<25x1xf32>
    %cst_48 = arith.constant 1.600000e+01 : f32
    %98 = vector.broadcast %cst_48 : f32 to vector<25x1xf32>
    %99 = arith.divf %97, %98 : vector<25x1xf32>
    %c0_49 = arith.constant 0 : index
    %c0_50 = arith.constant 0 : index
    %100 = vector.load %arg12[%c0_49, %c0_50] : memref<25x3xf32, #tpu.memory_space<vmem>>, vector<25x3xf32>
    %cst_51 = arith.constant 0.000000e+00 : f32
    %101 = vector.broadcast %cst_51 : f32 to vector<25x1xf32>
    %102 = vector.extract_strided_slice %100 {offsets = [0, 0], sizes = [25, 1], strides = [1, 1]} : vector<25x3xf32> to vector<25x1xf32>
    %103 = arith.mulf %102, %99 : vector<25x1xf32>
    %104 = vector.shape_cast %103 : vector<25x1xf32> to vector<1x25x1xf32>
    %cst_52 = arith.constant dense<0x7F800000> : vector<1xf32>
    %105 = vector.multi_reduction <minimumf>, %104, %cst_52 [1, 2] : vector<1x25x1xf32> to vector<1xf32>
    %106 = vector.shape_cast %105 : vector<1xf32> to vector<1x1x1xf32>
    %107 = vector.extract %106[0, 0, 0] : f32 from vector<1x1x1xf32>
    %108 = vector.broadcast %107 : f32 to vector<25x1xf32>
    %109 = arith.subf %103, %108 : vector<25x1xf32>
    %110 = vector.shape_cast %109 : vector<25x1xf32> to vector<1x25x1xf32>
    %cst_53 = arith.constant dense<0xFF800000> : vector<1xf32>
    %111 = vector.multi_reduction <maximumf>, %110, %cst_53 [1, 2] : vector<1x25x1xf32> to vector<1xf32>
    %112 = vector.shape_cast %111 : vector<1xf32> to vector<1x1x1xf32>
    %113 = vector.extract %112[0, 0, 0] : f32 from vector<1x1x1xf32>
    %114 = vector.broadcast %113 : f32 to vector<25x1xf32>
    %115 = arith.divf %109, %114 : vector<25x1xf32>
    %116 = arith.addf %101, %115 : vector<25x1xf32>
    %117 = vector.extract_strided_slice %100 {offsets = [0, 1], sizes = [25, 1], strides = [1, 1]} : vector<25x3xf32> to vector<25x1xf32>
    %118 = arith.mulf %117, %99 : vector<25x1xf32>
    %119 = vector.shape_cast %118 : vector<25x1xf32> to vector<1x25x1xf32>
    %cst_54 = arith.constant dense<0x7F800000> : vector<1xf32>
    %120 = vector.multi_reduction <minimumf>, %119, %cst_54 [1, 2] : vector<1x25x1xf32> to vector<1xf32>
    %121 = vector.shape_cast %120 : vector<1xf32> to vector<1x1x1xf32>
    %122 = vector.extract %121[0, 0, 0] : f32 from vector<1x1x1xf32>
    %123 = vector.broadcast %122 : f32 to vector<25x1xf32>
    %124 = arith.subf %118, %123 : vector<25x1xf32>
    %125 = vector.shape_cast %124 : vector<25x1xf32> to vector<1x25x1xf32>
    %cst_55 = arith.constant dense<0xFF800000> : vector<1xf32>
    %126 = vector.multi_reduction <maximumf>, %125, %cst_55 [1, 2] : vector<1x25x1xf32> to vector<1xf32>
    %127 = vector.shape_cast %126 : vector<1xf32> to vector<1x1x1xf32>
    %128 = vector.extract %127[0, 0, 0] : f32 from vector<1x1x1xf32>
    %129 = vector.broadcast %128 : f32 to vector<25x1xf32>
    %130 = arith.divf %124, %129 : vector<25x1xf32>
    %131 = arith.addf %116, %130 : vector<25x1xf32>
    %132 = vector.extract_strided_slice %100 {offsets = [0, 2], sizes = [25, 1], strides = [1, 1]} : vector<25x3xf32> to vector<25x1xf32>
    %133 = arith.mulf %132, %99 : vector<25x1xf32>
    %134 = vector.shape_cast %133 : vector<25x1xf32> to vector<1x25x1xf32>
    %cst_56 = arith.constant dense<0x7F800000> : vector<1xf32>
    %135 = vector.multi_reduction <minimumf>, %134, %cst_56 [1, 2] : vector<1x25x1xf32> to vector<1xf32>
    %136 = vector.shape_cast %135 : vector<1xf32> to vector<1x1x1xf32>
    %137 = vector.extract %136[0, 0, 0] : f32 from vector<1x1x1xf32>
    %138 = vector.broadcast %137 : f32 to vector<25x1xf32>
    %139 = arith.subf %133, %138 : vector<25x1xf32>
    %140 = vector.shape_cast %139 : vector<25x1xf32> to vector<1x25x1xf32>
    %cst_57 = arith.constant dense<0xFF800000> : vector<1xf32>
    %141 = vector.multi_reduction <maximumf>, %140, %cst_57 [1, 2] : vector<1x25x1xf32> to vector<1xf32>
    %142 = vector.shape_cast %141 : vector<1xf32> to vector<1x1x1xf32>
    %143 = vector.extract %142[0, 0, 0] : f32 from vector<1x1x1xf32>
    %144 = vector.broadcast %143 : f32 to vector<25x1xf32>
    %145 = arith.divf %139, %144 : vector<25x1xf32>
    %146 = arith.addf %131, %145 : vector<25x1xf32>
    %cst_58 = arith.constant 0.333333343 : f32
    %147 = vector.broadcast %cst_58 : f32 to vector<25x1xf32>
    %148 = arith.mulf %146, %147 : vector<25x1xf32>
    %c0_59 = arith.constant 0 : index
    %c0_60 = arith.constant 0 : index
    %149 = vector.load %arg8[%c0_59, %c0_60] : memref<16x16xf32, #tpu.memory_space<vmem>>, vector<16x16xf32>
    %cst_61 = arith.constant dense<0.000000e+00> : vector<36x16xf32>
    %150 = tpu.matmul %93, %149, %cst_61 {dimension_numbers = #tpu.dot_dimension_numbers<[1], [0], [0], [1], [0, 0, 1, 1], [], []>} : vector<36x16xf32>, vector<16x16xf32>, vector<36x16xf32> -> vector<36x16xf32>
    %c0_62 = arith.constant 0 : index
    %c0_63 = arith.constant 0 : index
    %151 = vector.load %arg9[%c0_62, %c0_63] : memref<2x16xf32, #tpu.memory_space<vmem>>, vector<1x16xf32>
    %152 = vector.broadcast %151 : vector<1x16xf32> to vector<36x16xf32>
    %153 = arith.mulf %150, %152 : vector<36x16xf32>
    %c1_64 = arith.constant 1 : index
    %c0_65 = arith.constant 0 : index
    %154 = vector.load %arg9[%c1_64, %c0_65] : memref<2x16xf32, #tpu.memory_space<vmem>>, vector<1x16xf32>
    %155 = vector.broadcast %154 : vector<1x16xf32> to vector<36x16xf32>
    %156 = arith.addf %153, %155 : vector<36x16xf32>
    %cst_66 = arith.constant 0.000000e+00 : f32
    %157 = vector.broadcast %cst_66 : f32 to vector<36x16xf32>
    %158 = arith.maximumf %156, %157 : vector<36x16xf32>
    %c0_67 = arith.constant 0 : index
    %c0_68 = arith.constant 0 : index
    %159 = vector.load %arg17[%c0_67, %c0_68] : memref<36x25xf32, #tpu.memory_space<vmem>>, vector<36x25xf32>
    %cst_69 = arith.constant dense<0.000000e+00> : vector<36x1xf32>
    %160 = tpu.matmul %159, %148, %cst_69 {dimension_numbers = #tpu.dot_dimension_numbers<[1], [0], [0], [1], [0, 0, 1, 1], [], []>} : vector<36x25xf32>, vector<25x1xf32>, vector<36x1xf32> -> vector<36x1xf32>
    %cst_70 = arith.constant 1.000000e+00 : f32
    %161 = vector.broadcast %cst_70 : f32 to vector<36x1xf32>
    %162 = arith.addf %161, %160 : vector<36x1xf32>
    %163 = vector.broadcast %162 : vector<36x1xf32> to vector<36x16xf32>
    %164 = arith.mulf %158, %163 : vector<36x16xf32>
    %cst_71 = arith.constant 0.000000e+00 : f32
    %165 = vector.broadcast %cst_71 : f32 to vector<8x8x16xf32>
    %c0_72 = arith.constant 0 : index
    %c0_73 = arith.constant 0 : index
    %c0_74 = arith.constant 0 : index
    %166 = vector.load %arg19[%c0_72, %c0_73, %c0_74] : memref<8x8x16xf32, #tpu.memory_space<vmem>>, vector<8x8x16xf32>
    tpu.vector_store %arg19[%c0_72, %c0_73, %c0_74], %165 {strides = array<i32>} : memref<8x8x16xf32, #tpu.memory_space<vmem>>, vector<8x8x16xf32>,
    %167 = arith.addf %93, %164 : vector<36x16xf32>
    %168 = vector.shape_cast %167 : vector<36x16xf32> to vector<6x6x16xf32>
    %c1_75 = arith.constant 1 : index
    %c1_76 = arith.constant 1 : index
    %c0_77 = arith.constant 0 : index
    %169 = vector.load %arg19[%c1_75, %c1_76, %c0_77] : memref<8x8x16xf32, #tpu.memory_space<vmem>>, vector<6x6x16xf32>
    tpu.vector_store %arg19[%c1_75, %c1_76, %c0_77], %168 {strides = array<i32>} : memref<8x8x16xf32, #tpu.memory_space<vmem>>, vector<6x6x16xf32>,
    %c0_78 = arith.constant 0 : index
    %c0_79 = arith.constant 0 : index
    %c0_80 = arith.constant 0 : index
    %170 = vector.load %arg19[%c0_78, %c0_79, %c0_80] : memref<8x8x16xf32, #tpu.memory_space<vmem>>, vector<8x8x16xf32>
    %171 = vector.extract_strided_slice %170 {offsets = [0, 0, 0], sizes = [6, 6, 16], strides = [1, 1, 1]} : vector<8x8x16xf32> to vector<6x6x16xf32>
    %172 = vector.shape_cast %171 : vector<6x6x16xf32> to vector<36x16xf32>
    %c0_81 = arith.constant 0 : index
    %c0_82 = arith.constant 0 : index
    %173 = vector.load %arg20[%c0_81, %c0_82] : memref<36x144xf32, #tpu.memory_space<vmem>>, vector<36x16xf32>
    tpu.vector_store %arg20[%c0_81, %c0_82], %172 {strides = array<i32>} : memref<36x144xf32, #tpu.memory_space<vmem>>, vector<36x16xf32>,
    %174 = vector.extract_strided_slice %170 {offsets = [0, 1, 0], sizes = [6, 6, 16], strides = [1, 1, 1]} : vector<8x8x16xf32> to vector<6x6x16xf32>
    %175 = vector.shape_cast %174 : vector<6x6x16xf32> to vector<36x16xf32>
    %c0_83 = arith.constant 0 : index
    %c16 = arith.constant 16 : index
    %176 = vector.load %arg20[%c0_83, %c16] : memref<36x144xf32, #tpu.memory_space<vmem>>, vector<36x16xf32>
    tpu.vector_store %arg20[%c0_83, %c16], %175 {strides = array<i32>} : memref<36x144xf32, #tpu.memory_space<vmem>>, vector<36x16xf32>,
    %177 = vector.extract_strided_slice %170 {offsets = [0, 2, 0], sizes = [6, 6, 16], strides = [1, 1, 1]} : vector<8x8x16xf32> to vector<6x6x16xf32>
    %178 = vector.shape_cast %177 : vector<6x6x16xf32> to vector<36x16xf32>
    %c0_84 = arith.constant 0 : index
    %c32 = arith.constant 32 : index
    %179 = vector.load %arg20[%c0_84, %c32] : memref<36x144xf32, #tpu.memory_space<vmem>>, vector<36x16xf32>
    tpu.vector_store %arg20[%c0_84, %c32], %178 {strides = array<i32>} : memref<36x144xf32, #tpu.memory_space<vmem>>, vector<36x16xf32>,
    %180 = vector.extract_strided_slice %170 {offsets = [1, 0, 0], sizes = [6, 6, 16], strides = [1, 1, 1]} : vector<8x8x16xf32> to vector<6x6x16xf32>
    %181 = vector.shape_cast %180 : vector<6x6x16xf32> to vector<36x16xf32>
    %c0_85 = arith.constant 0 : index
    %c48 = arith.constant 48 : index
    %182 = vector.load %arg20[%c0_85, %c48] : memref<36x144xf32, #tpu.memory_space<vmem>>, vector<36x16xf32>
    tpu.vector_store %arg20[%c0_85, %c48], %181 {strides = array<i32>} : memref<36x144xf32, #tpu.memory_space<vmem>>, vector<36x16xf32>,
    %183 = vector.extract_strided_slice %170 {offsets = [1, 1, 0], sizes = [6, 6, 16], strides = [1, 1, 1]} : vector<8x8x16xf32> to vector<6x6x16xf32>
    %184 = vector.shape_cast %183 : vector<6x6x16xf32> to vector<36x16xf32>
    %c0_86 = arith.constant 0 : index
    %c64 = arith.constant 64 : index
    %185 = vector.load %arg20[%c0_86, %c64] : memref<36x144xf32, #tpu.memory_space<vmem>>, vector<36x16xf32>
    tpu.vector_store %arg20[%c0_86, %c64], %184 {strides = array<i32>} : memref<36x144xf32, #tpu.memory_space<vmem>>, vector<36x16xf32>,
    %186 = vector.extract_strided_slice %170 {offsets = [1, 2, 0], sizes = [6, 6, 16], strides = [1, 1, 1]} : vector<8x8x16xf32> to vector<6x6x16xf32>
    %187 = vector.shape_cast %186 : vector<6x6x16xf32> to vector<36x16xf32>
    %c0_87 = arith.constant 0 : index
    %c80 = arith.constant 80 : index
    %188 = vector.load %arg20[%c0_87, %c80] : memref<36x144xf32, #tpu.memory_space<vmem>>, vector<36x16xf32>
    tpu.vector_store %arg20[%c0_87, %c80], %187 {strides = array<i32>} : memref<36x144xf32, #tpu.memory_space<vmem>>, vector<36x16xf32>,
    %189 = vector.extract_strided_slice %170 {offsets = [2, 0, 0], sizes = [6, 6, 16], strides = [1, 1, 1]} : vector<8x8x16xf32> to vector<6x6x16xf32>
    %190 = vector.shape_cast %189 : vector<6x6x16xf32> to vector<36x16xf32>
    %c0_88 = arith.constant 0 : index
    %c96 = arith.constant 96 : index
    %191 = vector.load %arg20[%c0_88, %c96] : memref<36x144xf32, #tpu.memory_space<vmem>>, vector<36x16xf32>
    tpu.vector_store %arg20[%c0_88, %c96], %190 {strides = array<i32>} : memref<36x144xf32, #tpu.memory_space<vmem>>, vector<36x16xf32>,
    %192 = vector.extract_strided_slice %170 {offsets = [2, 1, 0], sizes = [6, 6, 16], strides = [1, 1, 1]} : vector<8x8x16xf32> to vector<6x6x16xf32>
    %193 = vector.shape_cast %192 : vector<6x6x16xf32> to vector<36x16xf32>
    %c0_89 = arith.constant 0 : index
    %c112 = arith.constant 112 : index
    %194 = vector.load %arg20[%c0_89, %c112] : memref<36x144xf32, #tpu.memory_space<vmem>>, vector<36x16xf32>
    tpu.vector_store %arg20[%c0_89, %c112], %193 {strides = array<i32>} : memref<36x144xf32, #tpu.memory_space<vmem>>, vector<36x16xf32>,
    %195 = vector.extract_strided_slice %170 {offsets = [2, 2, 0], sizes = [6, 6, 16], strides = [1, 1, 1]} : vector<8x8x16xf32> to vector<6x6x16xf32>
    %196 = vector.shape_cast %195 : vector<6x6x16xf32> to vector<36x16xf32>
    %c0_90 = arith.constant 0 : index
    %c128 = arith.constant 128 : index
    %197 = vector.load %arg20[%c0_90, %c128] : memref<36x144xf32, #tpu.memory_space<vmem>>, vector<36x16xf32>
    tpu.vector_store %arg20[%c0_90, %c128], %196 {strides = array<i32>} : memref<36x144xf32, #tpu.memory_space<vmem>>, vector<36x16xf32>,
    %c0_91 = arith.constant 0 : index
    %c0_92 = arith.constant 0 : index
    %198 = vector.load %arg20[%c0_91, %c0_92] : memref<36x144xf32, #tpu.memory_space<vmem>>, vector<36x144xf32>
    %c0_93 = arith.constant 0 : index
    %c0_94 = arith.constant 0 : index
    %199 = vector.load %arg10[%c0_93, %c0_94] : memref<144x16xf32, #tpu.memory_space<vmem>>, vector<144x16xf32>
    %cst_95 = arith.constant dense<0.000000e+00> : vector<36x16xf32>
    %200 = tpu.matmul %198, %199, %cst_95 {dimension_numbers = #tpu.dot_dimension_numbers<[1], [0], [0], [1], [0, 0, 1, 1], [], []>} : vector<36x144xf32>, vector<144x16xf32>, vector<36x16xf32> -> vector<36x16xf32>
    %c0_96 = arith.constant 0 : index
    %c0_97 = arith.constant 0 : index
    %201 = vector.load %arg11[%c0_96, %c0_97] : memref<2x16xf32, #tpu.memory_space<vmem>>, vector<1x16xf32>
    %202 = vector.broadcast %201 : vector<1x16xf32> to vector<36x16xf32>
    %203 = arith.mulf %200, %202 : vector<36x16xf32>
    %c1_98 = arith.constant 1 : index
    %c0_99 = arith.constant 0 : index
    %204 = vector.load %arg11[%c1_98, %c0_99] : memref<2x16xf32, #tpu.memory_space<vmem>>, vector<1x16xf32>
    %205 = vector.broadcast %204 : vector<1x16xf32> to vector<36x16xf32>
    %206 = arith.addf %203, %205 : vector<36x16xf32>
    %cst_100 = arith.constant 0.000000e+00 : f32
    %207 = vector.broadcast %cst_100 : f32 to vector<36x16xf32>
    %208 = arith.maximumf %206, %207 : vector<36x16xf32>
    %209 = arith.addf %93, %164 : vector<36x16xf32>
    %210 = arith.addf %209, %208 : vector<36x16xf32>
    %211 = vector.shape_cast %210 : vector<36x16xf32> to vector<6x6x16xf32>
    %c1_101 = arith.constant 1 : index
    %c1_102 = arith.constant 1 : index
    %c0_103 = arith.constant 0 : index
    %212 = vector.load %arg19[%c1_101, %c1_102, %c0_103] : memref<8x8x16xf32, #tpu.memory_space<vmem>>, vector<6x6x16xf32>
    tpu.vector_store %arg19[%c1_101, %c1_102, %c0_103], %211 {strides = array<i32>} : memref<8x8x16xf32, #tpu.memory_space<vmem>>, vector<6x6x16xf32>,
    %c0_104 = arith.constant 0 : index
    %c0_105 = arith.constant 0 : index
    %c0_106 = arith.constant 0 : index
    %213 = vector.load %arg19[%c0_104, %c0_105, %c0_106] : memref<8x8x16xf32, #tpu.memory_space<vmem>>, vector<8x8x16xf32>
    %214 = vector.extract_strided_slice %213 {offsets = [0, 0, 0], sizes = [6, 6, 16], strides = [1, 1, 1]} : vector<8x8x16xf32> to vector<6x6x16xf32>
    %215 = vector.shape_cast %214 : vector<6x6x16xf32> to vector<36x16xf32>
    %c0_107 = arith.constant 0 : index
    %c0_108 = arith.constant 0 : index
    %216 = vector.load %arg20[%c0_107, %c0_108] : memref<36x144xf32, #tpu.memory_space<vmem>>, vector<36x16xf32>
    tpu.vector_store %arg20[%c0_107, %c0_108], %215 {strides = array<i32>} : memref<36x144xf32, #tpu.memory_space<vmem>>, vector<36x16xf32>,
    %217 = vector.extract_strided_slice %213 {offsets = [0, 1, 0], sizes = [6, 6, 16], strides = [1, 1, 1]} : vector<8x8x16xf32> to vector<6x6x16xf32>
    %218 = vector.shape_cast %217 : vector<6x6x16xf32> to vector<36x16xf32>
    %c0_109 = arith.constant 0 : index
    %c16_110 = arith.constant 16 : index
    %219 = vector.load %arg20[%c0_109, %c16_110] : memref<36x144xf32, #tpu.memory_space<vmem>>, vector<36x16xf32>
    tpu.vector_store %arg20[%c0_109, %c16_110], %218 {strides = array<i32>} : memref<36x144xf32, #tpu.memory_space<vmem>>, vector<36x16xf32>,
    %220 = vector.extract_strided_slice %213 {offsets = [0, 2, 0], sizes = [6, 6, 16], strides = [1, 1, 1]} : vector<8x8x16xf32> to vector<6x6x16xf32>
    %221 = vector.shape_cast %220 : vector<6x6x16xf32> to vector<36x16xf32>
    %c0_111 = arith.constant 0 : index
    %c32_112 = arith.constant 32 : index
    %222 = vector.load %arg20[%c0_111, %c32_112] : memref<36x144xf32, #tpu.memory_space<vmem>>, vector<36x16xf32>
    tpu.vector_store %arg20[%c0_111, %c32_112], %221 {strides = array<i32>} : memref<36x144xf32, #tpu.memory_space<vmem>>, vector<36x16xf32>,
    %223 = vector.extract_strided_slice %213 {offsets = [1, 0, 0], sizes = [6, 6, 16], strides = [1, 1, 1]} : vector<8x8x16xf32> to vector<6x6x16xf32>
    %224 = vector.shape_cast %223 : vector<6x6x16xf32> to vector<36x16xf32>
    %c0_113 = arith.constant 0 : index
    %c48_114 = arith.constant 48 : index
    %225 = vector.load %arg20[%c0_113, %c48_114] : memref<36x144xf32, #tpu.memory_space<vmem>>, vector<36x16xf32>
    tpu.vector_store %arg20[%c0_113, %c48_114], %224 {strides = array<i32>} : memref<36x144xf32, #tpu.memory_space<vmem>>, vector<36x16xf32>,
    %226 = vector.extract_strided_slice %213 {offsets = [1, 1, 0], sizes = [6, 6, 16], strides = [1, 1, 1]} : vector<8x8x16xf32> to vector<6x6x16xf32>
    %227 = vector.shape_cast %226 : vector<6x6x16xf32> to vector<36x16xf32>
    %c0_115 = arith.constant 0 : index
    %c64_116 = arith.constant 64 : index
    %228 = vector.load %arg20[%c0_115, %c64_116] : memref<36x144xf32, #tpu.memory_space<vmem>>, vector<36x16xf32>
    tpu.vector_store %arg20[%c0_115, %c64_116], %227 {strides = array<i32>} : memref<36x144xf32, #tpu.memory_space<vmem>>, vector<36x16xf32>,
    %229 = vector.extract_strided_slice %213 {offsets = [1, 2, 0], sizes = [6, 6, 16], strides = [1, 1, 1]} : vector<8x8x16xf32> to vector<6x6x16xf32>
    %230 = vector.shape_cast %229 : vector<6x6x16xf32> to vector<36x16xf32>
    %c0_117 = arith.constant 0 : index
    %c80_118 = arith.constant 80 : index
    %231 = vector.load %arg20[%c0_117, %c80_118] : memref<36x144xf32, #tpu.memory_space<vmem>>, vector<36x16xf32>
    tpu.vector_store %arg20[%c0_117, %c80_118], %230 {strides = array<i32>} : memref<36x144xf32, #tpu.memory_space<vmem>>, vector<36x16xf32>,
    %232 = vector.extract_strided_slice %213 {offsets = [2, 0, 0], sizes = [6, 6, 16], strides = [1, 1, 1]} : vector<8x8x16xf32> to vector<6x6x16xf32>
    %233 = vector.shape_cast %232 : vector<6x6x16xf32> to vector<36x16xf32>
    %c0_119 = arith.constant 0 : index
    %c96_120 = arith.constant 96 : index
    %234 = vector.load %arg20[%c0_119, %c96_120] : memref<36x144xf32, #tpu.memory_space<vmem>>, vector<36x16xf32>
    tpu.vector_store %arg20[%c0_119, %c96_120], %233 {strides = array<i32>} : memref<36x144xf32, #tpu.memory_space<vmem>>, vector<36x16xf32>,
    %235 = vector.extract_strided_slice %213 {offsets = [2, 1, 0], sizes = [6, 6, 16], strides = [1, 1, 1]} : vector<8x8x16xf32> to vector<6x6x16xf32>
    %236 = vector.shape_cast %235 : vector<6x6x16xf32> to vector<36x16xf32>
    %c0_121 = arith.constant 0 : index
    %c112_122 = arith.constant 112 : index
    %237 = vector.load %arg20[%c0_121, %c112_122] : memref<36x144xf32, #tpu.memory_space<vmem>>, vector<36x16xf32>
    tpu.vector_store %arg20[%c0_121, %c112_122], %236 {strides = array<i32>} : memref<36x144xf32, #tpu.memory_space<vmem>>, vector<36x16xf32>,
    %238 = vector.extract_strided_slice %213 {offsets = [2, 2, 0], sizes = [6, 6, 16], strides = [1, 1, 1]} : vector<8x8x16xf32> to vector<6x6x16xf32>
    %239 = vector.shape_cast %238 : vector<6x6x16xf32> to vector<36x16xf32>
    %c0_123 = arith.constant 0 : index
    %c128_124 = arith.constant 128 : index
    %240 = vector.load %arg20[%c0_123, %c128_124] : memref<36x144xf32, #tpu.memory_space<vmem>>, vector<36x16xf32>
    tpu.vector_store %arg20[%c0_123, %c128_124], %239 {strides = array<i32>} : memref<36x144xf32, #tpu.memory_space<vmem>>, vector<36x16xf32>,
    %c0_125 = arith.constant 0 : index
    %c0_126 = arith.constant 0 : index
    %241 = vector.load %arg20[%c0_125, %c0_126] : memref<36x144xf32, #tpu.memory_space<vmem>>, vector<36x144xf32>
    %c0_127 = arith.constant 0 : index
    %c0_128 = arith.constant 0 : index
    %242 = vector.load %arg10[%c0_127, %c0_128] : memref<144x16xf32, #tpu.memory_space<vmem>>, vector<144x16xf32>
    %cst_129 = arith.constant dense<0.000000e+00> : vector<36x16xf32>
    %243 = tpu.matmul %241, %242, %cst_129 {dimension_numbers = #tpu.dot_dimension_numbers<[1], [0], [0], [1], [0, 0, 1, 1], [], []>} : vector<36x144xf32>, vector<144x16xf32>, vector<36x16xf32> -> vector<36x16xf32>
    %c0_130 = arith.constant 0 : index
    %c0_131 = arith.constant 0 : index
    %244 = vector.load %arg11[%c0_130, %c0_131] : memref<2x16xf32, #tpu.memory_space<vmem>>, vector<1x16xf32>
    %245 = vector.broadcast %244 : vector<1x16xf32> to vector<36x16xf32>
    %246 = arith.mulf %243, %245 : vector<36x16xf32>
    %c1_132 = arith.constant 1 : index
    %c0_133 = arith.constant 0 : index
    %247 = vector.load %arg11[%c1_132, %c0_133] : memref<2x16xf32, #tpu.memory_space<vmem>>, vector<1x16xf32>
    %248 = vector.broadcast %247 : vector<1x16xf32> to vector<36x16xf32>
    %249 = arith.addf %246, %248 : vector<36x16xf32>
    %cst_134 = arith.constant 0.000000e+00 : f32
    %250 = vector.broadcast %cst_134 : f32 to vector<36x16xf32>
    %251 = arith.maximumf %249, %250 : vector<36x16xf32>
    %252 = arith.addf %93, %164 : vector<36x16xf32>
    %253 = arith.addf %252, %208 : vector<36x16xf32>
    %254 = arith.addf %253, %251 : vector<36x16xf32>
    %255 = vector.shape_cast %254 : vector<36x16xf32> to vector<6x6x16xf32>
    %c1_135 = arith.constant 1 : index
    %c1_136 = arith.constant 1 : index
    %c0_137 = arith.constant 0 : index
    %256 = vector.load %arg19[%c1_135, %c1_136, %c0_137] : memref<8x8x16xf32, #tpu.memory_space<vmem>>, vector<6x6x16xf32>
    tpu.vector_store %arg19[%c1_135, %c1_136, %c0_137], %255 {strides = array<i32>} : memref<8x8x16xf32, #tpu.memory_space<vmem>>, vector<6x6x16xf32>,
    %c0_138 = arith.constant 0 : index
    %c0_139 = arith.constant 0 : index
    %c0_140 = arith.constant 0 : index
    %257 = vector.load %arg19[%c0_138, %c0_139, %c0_140] : memref<8x8x16xf32, #tpu.memory_space<vmem>>, vector<8x8x16xf32>
    %258 = vector.extract_strided_slice %257 {offsets = [0, 0, 0], sizes = [6, 6, 16], strides = [1, 1, 1]} : vector<8x8x16xf32> to vector<6x6x16xf32>
    %259 = vector.shape_cast %258 : vector<6x6x16xf32> to vector<36x16xf32>
    %c0_141 = arith.constant 0 : index
    %c0_142 = arith.constant 0 : index
    %260 = vector.load %arg20[%c0_141, %c0_142] : memref<36x144xf32, #tpu.memory_space<vmem>>, vector<36x16xf32>
    tpu.vector_store %arg20[%c0_141, %c0_142], %259 {strides = array<i32>} : memref<36x144xf32, #tpu.memory_space<vmem>>, vector<36x16xf32>,
    %261 = vector.extract_strided_slice %257 {offsets = [0, 1, 0], sizes = [6, 6, 16], strides = [1, 1, 1]} : vector<8x8x16xf32> to vector<6x6x16xf32>
    %262 = vector.shape_cast %261 : vector<6x6x16xf32> to vector<36x16xf32>
    %c0_143 = arith.constant 0 : index
    %c16_144 = arith.constant 16 : index
    %263 = vector.load %arg20[%c0_143, %c16_144] : memref<36x144xf32, #tpu.memory_space<vmem>>, vector<36x16xf32>
    tpu.vector_store %arg20[%c0_143, %c16_144], %262 {strides = array<i32>} : memref<36x144xf32, #tpu.memory_space<vmem>>, vector<36x16xf32>,
    %264 = vector.extract_strided_slice %257 {offsets = [0, 2, 0], sizes = [6, 6, 16], strides = [1, 1, 1]} : vector<8x8x16xf32> to vector<6x6x16xf32>
    %265 = vector.shape_cast %264 : vector<6x6x16xf32> to vector<36x16xf32>
    %c0_145 = arith.constant 0 : index
    %c32_146 = arith.constant 32 : index
    %266 = vector.load %arg20[%c0_145, %c32_146] : memref<36x144xf32, #tpu.memory_space<vmem>>, vector<36x16xf32>
    tpu.vector_store %arg20[%c0_145, %c32_146], %265 {strides = array<i32>} : memref<36x144xf32, #tpu.memory_space<vmem>>, vector<36x16xf32>,
    %267 = vector.extract_strided_slice %257 {offsets = [1, 0, 0], sizes = [6, 6, 16], strides = [1, 1, 1]} : vector<8x8x16xf32> to vector<6x6x16xf32>
    %268 = vector.shape_cast %267 : vector<6x6x16xf32> to vector<36x16xf32>
    %c0_147 = arith.constant 0 : index
    %c48_148 = arith.constant 48 : index
    %269 = vector.load %arg20[%c0_147, %c48_148] : memref<36x144xf32, #tpu.memory_space<vmem>>, vector<36x16xf32>
    tpu.vector_store %arg20[%c0_147, %c48_148], %268 {strides = array<i32>} : memref<36x144xf32, #tpu.memory_space<vmem>>, vector<36x16xf32>,
    %270 = vector.extract_strided_slice %257 {offsets = [1, 1, 0], sizes = [6, 6, 16], strides = [1, 1, 1]} : vector<8x8x16xf32> to vector<6x6x16xf32>
    %271 = vector.shape_cast %270 : vector<6x6x16xf32> to vector<36x16xf32>
    %c0_149 = arith.constant 0 : index
    %c64_150 = arith.constant 64 : index
    %272 = vector.load %arg20[%c0_149, %c64_150] : memref<36x144xf32, #tpu.memory_space<vmem>>, vector<36x16xf32>
    tpu.vector_store %arg20[%c0_149, %c64_150], %271 {strides = array<i32>} : memref<36x144xf32, #tpu.memory_space<vmem>>, vector<36x16xf32>,
    %273 = vector.extract_strided_slice %257 {offsets = [1, 2, 0], sizes = [6, 6, 16], strides = [1, 1, 1]} : vector<8x8x16xf32> to vector<6x6x16xf32>
    %274 = vector.shape_cast %273 : vector<6x6x16xf32> to vector<36x16xf32>
    %c0_151 = arith.constant 0 : index
    %c80_152 = arith.constant 80 : index
    %275 = vector.load %arg20[%c0_151, %c80_152] : memref<36x144xf32, #tpu.memory_space<vmem>>, vector<36x16xf32>
    tpu.vector_store %arg20[%c0_151, %c80_152], %274 {strides = array<i32>} : memref<36x144xf32, #tpu.memory_space<vmem>>, vector<36x16xf32>,
    %276 = vector.extract_strided_slice %257 {offsets = [2, 0, 0], sizes = [6, 6, 16], strides = [1, 1, 1]} : vector<8x8x16xf32> to vector<6x6x16xf32>
    %277 = vector.shape_cast %276 : vector<6x6x16xf32> to vector<36x16xf32>
    %c0_153 = arith.constant 0 : index
    %c96_154 = arith.constant 96 : index
    %278 = vector.load %arg20[%c0_153, %c96_154] : memref<36x144xf32, #tpu.memory_space<vmem>>, vector<36x16xf32>
    tpu.vector_store %arg20[%c0_153, %c96_154], %277 {strides = array<i32>} : memref<36x144xf32, #tpu.memory_space<vmem>>, vector<36x16xf32>,
    %279 = vector.extract_strided_slice %257 {offsets = [2, 1, 0], sizes = [6, 6, 16], strides = [1, 1, 1]} : vector<8x8x16xf32> to vector<6x6x16xf32>
    %280 = vector.shape_cast %279 : vector<6x6x16xf32> to vector<36x16xf32>
    %c0_155 = arith.constant 0 : index
    %c112_156 = arith.constant 112 : index
    %281 = vector.load %arg20[%c0_155, %c112_156] : memref<36x144xf32, #tpu.memory_space<vmem>>, vector<36x16xf32>
    tpu.vector_store %arg20[%c0_155, %c112_156], %280 {strides = array<i32>} : memref<36x144xf32, #tpu.memory_space<vmem>>, vector<36x16xf32>,
    %282 = vector.extract_strided_slice %257 {offsets = [2, 2, 0], sizes = [6, 6, 16], strides = [1, 1, 1]} : vector<8x8x16xf32> to vector<6x6x16xf32>
    %283 = vector.shape_cast %282 : vector<6x6x16xf32> to vector<36x16xf32>
    %c0_157 = arith.constant 0 : index
    %c128_158 = arith.constant 128 : index
    %284 = vector.load %arg20[%c0_157, %c128_158] : memref<36x144xf32, #tpu.memory_space<vmem>>, vector<36x16xf32>
    tpu.vector_store %arg20[%c0_157, %c128_158], %283 {strides = array<i32>} : memref<36x144xf32, #tpu.memory_space<vmem>>, vector<36x16xf32>,
    %c0_159 = arith.constant 0 : index
    %c0_160 = arith.constant 0 : index
    %285 = vector.load %arg20[%c0_159, %c0_160] : memref<36x144xf32, #tpu.memory_space<vmem>>, vector<36x144xf32>
    %c0_161 = arith.constant 0 : index
    %c0_162 = arith.constant 0 : index
    %286 = vector.load %arg10[%c0_161, %c0_162] : memref<144x16xf32, #tpu.memory_space<vmem>>, vector<144x16xf32>
    %cst_163 = arith.constant dense<0.000000e+00> : vector<36x16xf32>
    %287 = tpu.matmul %285, %286, %cst_163 {dimension_numbers = #tpu.dot_dimension_numbers<[1], [0], [0], [1], [0, 0, 1, 1], [], []>} : vector<36x144xf32>, vector<144x16xf32>, vector<36x16xf32> -> vector<36x16xf32>
    %c0_164 = arith.constant 0 : index
    %c0_165 = arith.constant 0 : index
    %288 = vector.load %arg11[%c0_164, %c0_165] : memref<2x16xf32, #tpu.memory_space<vmem>>, vector<1x16xf32>
    %289 = vector.broadcast %288 : vector<1x16xf32> to vector<36x16xf32>
    %290 = arith.mulf %287, %289 : vector<36x16xf32>
    %c1_166 = arith.constant 1 : index
    %c0_167 = arith.constant 0 : index
    %291 = vector.load %arg11[%c1_166, %c0_167] : memref<2x16xf32, #tpu.memory_space<vmem>>, vector<1x16xf32>
    %292 = vector.broadcast %291 : vector<1x16xf32> to vector<36x16xf32>
    %293 = arith.addf %290, %292 : vector<36x16xf32>
    %cst_168 = arith.constant 0.000000e+00 : f32
    %294 = vector.broadcast %cst_168 : f32 to vector<36x16xf32>
    %295 = arith.maximumf %293, %294 : vector<36x16xf32>
    %296 = vector.extract_strided_slice %295 {offsets = [0, 0], sizes = [6, 16], strides = [1, 1]} : vector<36x16xf32> to vector<6x16xf32>
    %297 = vector.extract_strided_slice %295 {offsets = [6, 0], sizes = [6, 16], strides = [1, 1]} : vector<36x16xf32> to vector<6x16xf32>
    %298 = arith.maximumf %296, %297 : vector<6x16xf32>
    %299 = vector.extract_strided_slice %298 {offsets = [0, 0], sizes = [1, 16], strides = [1, 1]} : vector<6x16xf32> to vector<1x16xf32>
    %300 = vector.extract_strided_slice %298 {offsets = [1, 0], sizes = [1, 16], strides = [1, 1]} : vector<6x16xf32> to vector<1x16xf32>
    %301 = arith.maximumf %299, %300 : vector<1x16xf32>
    %302 = vector.extract_strided_slice %298 {offsets = [2, 0], sizes = [1, 16], strides = [1, 1]} : vector<6x16xf32> to vector<1x16xf32>
    %303 = vector.extract_strided_slice %298 {offsets = [3, 0], sizes = [1, 16], strides = [1, 1]} : vector<6x16xf32> to vector<1x16xf32>
    %304 = arith.maximumf %302, %303 : vector<1x16xf32>
    %305 = vector.extract_strided_slice %298 {offsets = [4, 0], sizes = [1, 16], strides = [1, 1]} : vector<6x16xf32> to vector<1x16xf32>
    %306 = vector.extract_strided_slice %298 {offsets = [5, 0], sizes = [1, 16], strides = [1, 1]} : vector<6x16xf32> to vector<1x16xf32>
    %307 = arith.maximumf %305, %306 : vector<1x16xf32>
    %308 = vector.extract_strided_slice %295 {offsets = [12, 0], sizes = [6, 16], strides = [1, 1]} : vector<36x16xf32> to vector<6x16xf32>
    %309 = vector.extract_strided_slice %295 {offsets = [18, 0], sizes = [6, 16], strides = [1, 1]} : vector<36x16xf32> to vector<6x16xf32>
    %310 = arith.maximumf %308, %309 : vector<6x16xf32>
    %311 = vector.extract_strided_slice %310 {offsets = [0, 0], sizes = [1, 16], strides = [1, 1]} : vector<6x16xf32> to vector<1x16xf32>
    %312 = vector.extract_strided_slice %310 {offsets = [1, 0], sizes = [1, 16], strides = [1, 1]} : vector<6x16xf32> to vector<1x16xf32>
    %313 = arith.maximumf %311, %312 : vector<1x16xf32>
    %314 = vector.extract_strided_slice %310 {offsets = [2, 0], sizes = [1, 16], strides = [1, 1]} : vector<6x16xf32> to vector<1x16xf32>
    %315 = vector.extract_strided_slice %310 {offsets = [3, 0], sizes = [1, 16], strides = [1, 1]} : vector<6x16xf32> to vector<1x16xf32>
    %316 = arith.maximumf %314, %315 : vector<1x16xf32>
    %317 = vector.extract_strided_slice %310 {offsets = [4, 0], sizes = [1, 16], strides = [1, 1]} : vector<6x16xf32> to vector<1x16xf32>
    %318 = vector.extract_strided_slice %310 {offsets = [5, 0], sizes = [1, 16], strides = [1, 1]} : vector<6x16xf32> to vector<1x16xf32>
    %319 = arith.maximumf %317, %318 : vector<1x16xf32>
    %320 = vector.extract_strided_slice %295 {offsets = [24, 0], sizes = [6, 16], strides = [1, 1]} : vector<36x16xf32> to vector<6x16xf32>
    %321 = vector.extract_strided_slice %295 {offsets = [30, 0], sizes = [6, 16], strides = [1, 1]} : vector<36x16xf32> to vector<6x16xf32>
    %322 = arith.maximumf %320, %321 : vector<6x16xf32>
    %323 = vector.extract_strided_slice %322 {offsets = [0, 0], sizes = [1, 16], strides = [1, 1]} : vector<6x16xf32> to vector<1x16xf32>
    %324 = vector.extract_strided_slice %322 {offsets = [1, 0], sizes = [1, 16], strides = [1, 1]} : vector<6x16xf32> to vector<1x16xf32>
    %325 = arith.maximumf %323, %324 : vector<1x16xf32>
    %326 = vector.extract_strided_slice %322 {offsets = [2, 0], sizes = [1, 16], strides = [1, 1]} : vector<6x16xf32> to vector<1x16xf32>
    %327 = vector.extract_strided_slice %322 {offsets = [3, 0], sizes = [1, 16], strides = [1, 1]} : vector<6x16xf32> to vector<1x16xf32>
    %328 = arith.maximumf %326, %327 : vector<1x16xf32>
    %329 = vector.extract_strided_slice %322 {offsets = [4, 0], sizes = [1, 16], strides = [1, 1]} : vector<6x16xf32> to vector<1x16xf32>
    %330 = vector.extract_strided_slice %322 {offsets = [5, 0], sizes = [1, 16], strides = [1, 1]} : vector<6x16xf32> to vector<1x16xf32>
    %331 = arith.maximumf %329, %330 : vector<1x16xf32>
    %332 = tpu.concatenate %301, %304, %307, %313, %316, %319, %325, %328, %331 in 0 : vector<1x16xf32>, vector<1x16xf32>, vector<1x16xf32>, vector<1x16xf32>, vector<1x16xf32>, vector<1x16xf32>, vector<1x16xf32>, vector<1x16xf32>, vector<1x16xf32> -> vector<9x16xf32>
    %c0_169 = arith.constant 0 : index
    %c0_170 = arith.constant 0 : index
    %333 = vector.load %arg15[%c0_169, %c0_170] : memref<25x9xf32, #tpu.memory_space<vmem>>, vector<25x9xf32>
    %cst_171 = arith.constant dense<0.000000e+00> : vector<25x16xf32>
    %334 = tpu.matmul %333, %332, %cst_171 {dimension_numbers = #tpu.dot_dimension_numbers<[1], [0], [0], [1], [0, 0, 1, 1], [], []>} : vector<25x9xf32>, vector<9x16xf32>, vector<25x16xf32> -> vector<25x16xf32>
    %c0_172 = arith.constant 0 : index
    %c0_173 = arith.constant 0 : index
    %c0_174 = arith.constant 0 : index
    %335 = vector.load %arg18[%c0_172, %c0_173, %c0_174] : memref<1x25x16xf32, #tpu.memory_space<vmem>>, vector<1x25x16xf32>
    %336 = vector.shape_cast %335 : vector<1x25x16xf32> to vector<25x16xf32>
    %337 = vector.shape_cast %334 : vector<25x16xf32> to vector<1x25x16xf32>
    tpu.vector_store %arg18[%c0_172, %c0_173, %c0_174], %337 {strides = array<i32>} : memref<1x25x16xf32, #tpu.memory_space<vmem>>, vector<1x25x16xf32>,
    return
  }
  func.func @transform_0(%arg0: i32) -> (i32, i32, i32) {
    %c0_i32 = arith.constant 0 : i32
    %c0_i32_0 = arith.constant 0 : i32
    %c0_i32_1 = arith.constant 0 : i32
    return %arg0, %c0_i32, %c0_i32_0 : i32, i32, i32
  }
  func.func @transform_1(%arg0: i32) -> (i32, i32, i32) {
    %c0_i32 = arith.constant 0 : i32
    %c0_i32_0 = arith.constant 0 : i32
    %c0_i32_1 = arith.constant 0 : i32
    return %arg0, %c0_i32, %c0_i32_0 : i32, i32, i32
  }
  func.func @transform_2(%arg0: i32) -> (i32, i32, i32) {
    %c0_i32 = arith.constant 0 : i32
    %c0_i32_0 = arith.constant 0 : i32
    %c0_i32_1 = arith.constant 0 : i32
    return %arg0, %c0_i32, %c0_i32_0 : i32, i32, i32
  }
  func.func @transform_3(%arg0: i32) -> (i32, i32) {
    %c0_i32 = arith.constant 0 : i32
    %c0_i32_0 = arith.constant 0 : i32
    %c0_i32_1 = arith.constant 0 : i32
    return %c0_i32, %c0_i32_0 : i32, i32
  }
  func.func @transform_4(%arg0: i32) -> (i32, i32) {
    %c0_i32 = arith.constant 0 : i32
    %c0_i32_0 = arith.constant 0 : i32
    %c0_i32_1 = arith.constant 0 : i32
    return %c0_i32, %c0_i32_0 : i32, i32
  }
  func.func @transform_5(%arg0: i32) -> (i32, i32) {
    %c0_i32 = arith.constant 0 : i32
    %c0_i32_0 = arith.constant 0 : i32
    %c0_i32_1 = arith.constant 0 : i32
    return %c0_i32, %c0_i32_0 : i32, i32
  }
  func.func @transform_6(%arg0: i32) -> (i32, i32) {
    %c0_i32 = arith.constant 0 : i32
    %c0_i32_0 = arith.constant 0 : i32
    %c0_i32_1 = arith.constant 0 : i32
    return %c0_i32, %c0_i32_0 : i32, i32
  }
  func.func @transform_7(%arg0: i32) -> (i32, i32) {
    %c0_i32 = arith.constant 0 : i32
    %c0_i32_0 = arith.constant 0 : i32
    %c0_i32_1 = arith.constant 0 : i32
    return %c0_i32, %c0_i32_0 : i32, i32
  }
  func.func @transform_8(%arg0: i32) -> (i32, i32) {
    %c0_i32 = arith.constant 0 : i32
    %c0_i32_0 = arith.constant 0 : i32
    %c0_i32_1 = arith.constant 0 : i32
    return %c0_i32, %c0_i32_0 : i32, i32
  }
  func.func @transform_9(%arg0: i32) -> (i32, i32) {
    %c0_i32 = arith.constant 0 : i32
    %c0_i32_0 = arith.constant 0 : i32
    %c0_i32_1 = arith.constant 0 : i32
    return %c0_i32, %c0_i32_0 : i32, i32
  }
  func.func @transform_10(%arg0: i32) -> (i32, i32) {
    %c0_i32 = arith.constant 0 : i32
    %c0_i32_0 = arith.constant 0 : i32
    %c0_i32_1 = arith.constant 0 : i32
    return %c0_i32, %c0_i32_0 : i32, i32
  }
  func.func @transform_11(%arg0: i32) -> (i32, i32) {
    %c0_i32 = arith.constant 0 : i32
    %c0_i32_0 = arith.constant 0 : i32
    %c0_i32_1 = arith.constant 0 : i32
    return %c0_i32, %c0_i32_0 : i32, i32
  }
  func.func @transform_12(%arg0: i32) -> (i32, i32) {
    %c0_i32 = arith.constant 0 : i32
    %c0_i32_0 = arith.constant 0 : i32
    %c0_i32_1 = arith.constant 0 : i32
    return %c0_i32, %c0_i32_0 : i32, i32
  }
  func.func @transform_13(%arg0: i32) -> (i32, i32) {
    %c0_i32 = arith.constant 0 : i32
    %c0_i32_0 = arith.constant 0 : i32
    %c0_i32_1 = arith.constant 0 : i32
    return %c0_i32, %c0_i32_0 : i32, i32
  }
  func.func @transform_14(%arg0: i32) -> (i32, i32) {
    %c0_i32 = arith.constant 0 : i32
    %c0_i32_0 = arith.constant 0 : i32
    %c0_i32_1 = arith.constant 0 : i32
    return %c0_i32, %c0_i32_0 : i32, i32
  }
  func.func @transform_15(%arg0: i32) -> (i32, i32) {
    %c0_i32 = arith.constant 0 : i32
    %c0_i32_0 = arith.constant 0 : i32
    %c0_i32_1 = arith.constant 0 : i32
    return %c0_i32, %c0_i32_0 : i32, i32
  }
  func.func @transform_16(%arg0: i32) -> (i32, i32) {
    %c0_i32 = arith.constant 0 : i32
    %c0_i32_0 = arith.constant 0 : i32
    %c0_i32_1 = arith.constant 0 : i32
    return %c0_i32, %c0_i32_0 : i32, i32
  }
  func.func @transform_17(%arg0: i32) -> (i32, i32, i32) {
    %c0_i32 = arith.constant 0 : i32
    %c0_i32_0 = arith.constant 0 : i32
    %c0_i32_1 = arith.constant 0 : i32
    return %arg0, %c0_i32, %c0_i32_0 : i32, i32, i32
  }
}

module attributes {stable_mosaic.version = 11 : i64} {
  func.func @_classifier_kernel(%arg0: i32, %arg1: memref<2x400xf32, #tpu.memory_space<vmem>>, %arg2: memref<400x3xf32, #tpu.memory_space<vmem>>, %arg3: memref<1x3xf32, #tpu.memory_space<vmem>>, %arg4: memref<2x3xf32, #tpu.memory_space<vmem>>) attributes {dimension_semantics = [#tpu.dimension_semantics<arbitrary>], iteration_bounds = array<i64: 1>, scalar_prefetch = 0 : i64, scratch_operands = 0 : i64, tpu.core_type = #tpu.core_type<tc>, window_params = [{pipeline_mode = #tpu.pipeline_mode<synchronous>, transform_indices = @transform_0, window_bounds = array<i64: 2, 400>}, {pipeline_mode = #tpu.pipeline_mode<synchronous>, transform_indices = @transform_1, window_bounds = array<i64: 400, 3>}, {pipeline_mode = #tpu.pipeline_mode<synchronous>, transform_indices = @transform_2, window_bounds = array<i64: 1, 3>}, {pipeline_mode = #tpu.pipeline_mode<synchronous>, transform_indices = @transform_3, window_bounds = array<i64: 2, 3>}]} {
    %c0 = arith.constant 0 : index
    %c0_0 = arith.constant 0 : index
    %0 = vector.load %arg1[%c0, %c0_0] : memref<2x400xf32, #tpu.memory_space<vmem>>, vector<2x400xf32>
    %c0_1 = arith.constant 0 : index
    %c0_2 = arith.constant 0 : index
    %1 = vector.load %arg2[%c0_1, %c0_2] : memref<400x3xf32, #tpu.memory_space<vmem>>, vector<400x3xf32>
    %cst = arith.constant dense<0.000000e+00> : vector<2x3xf32>
    %2 = tpu.matmul %0, %1, %cst {dimension_numbers = #tpu.dot_dimension_numbers<[1], [0], [0], [1], [0, 0, 1, 1], [], []>} : vector<2x400xf32>, vector<400x3xf32>, vector<2x3xf32> -> vector<2x3xf32>
    %c0_3 = arith.constant 0 : index
    %c0_4 = arith.constant 0 : index
    %3 = vector.load %arg3[%c0_3, %c0_4] : memref<1x3xf32, #tpu.memory_space<vmem>>, vector<1x3xf32>
    %4 = vector.broadcast %3 : vector<1x3xf32> to vector<2x3xf32>
    %5 = arith.addf %2, %4 : vector<2x3xf32>
    %c0_5 = arith.constant 0 : index
    %c0_6 = arith.constant 0 : index
    %6 = vector.load %arg4[%c0_5, %c0_6] : memref<2x3xf32, #tpu.memory_space<vmem>>, vector<2x3xf32>
    tpu.vector_store %arg4[%c0_5, %c0_6], %5 {strides = array<i32>} : memref<2x3xf32, #tpu.memory_space<vmem>>, vector<2x3xf32>,
    return
  }
  func.func @transform_0(%arg0: i32) -> (i32, i32) {
    %c0_i32 = arith.constant 0 : i32
    %c0_i32_0 = arith.constant 0 : i32
    %c0_i32_1 = arith.constant 0 : i32
    return %c0_i32, %c0_i32_0 : i32, i32
  }
  func.func @transform_1(%arg0: i32) -> (i32, i32) {
    %c0_i32 = arith.constant 0 : i32
    %c0_i32_0 = arith.constant 0 : i32
    %c0_i32_1 = arith.constant 0 : i32
    return %c0_i32, %c0_i32_0 : i32, i32
  }
  func.func @transform_2(%arg0: i32) -> (i32, i32) {
    %c0_i32 = arith.constant 0 : i32
    %c0_i32_0 = arith.constant 0 : i32
    %c0_i32_1 = arith.constant 0 : i32
    return %c0_i32, %c0_i32_0 : i32, i32
  }
  func.func @transform_3(%arg0: i32) -> (i32, i32) {
    %c0_i32 = arith.constant 0 : i32
    %c0_i32_0 = arith.constant 0 : i32
    %c0_i32_1 = arith.constant 0 : i32
    return %c0_i32, %c0_i32_0 : i32, i32
  }
}

</mosaic_0001>

<bundles_post_ra>
// kernel: menet_cs_forward.3
= control target key start
LH: loop header
LB: loop body
LE: loop exit
PB: predicated region body
PF: predicated region fallthrough
CT: control target
= control target key end

     0   :  { %v377_v4 = vmov 0.0|0.0   ;;  %v378_v26 = vmov 1983009808   ;;  %v78_v28 = vlaneseq  ;;  %s577_s0 = inlined_call_operand.vmem [shape: f32[2,400], index: 0, kind: input, shape index: {}]   ;;  %s578_s1 = inlined_call_operand.vmem [shape: f32[400,3], index: 1, kind: input, shape index: {}]   ;;  %s579_s2 = inlined_call_operand.vmem [shape: f32[1,3], index: 2, kind: input, shape index: {}]   ;;  %s580_s3 = inlined_call_operand.hbm [shape: f32[2,3], index: 3, kind: output, shape index: {}]  }
   0x1   :  { %v32_v0 = vld [vmem:[%s578_s1 + $0x80] sm:$0xff]  ;;  %v33_v1 = vld [vmem:[%s578_s1 + $0x88] sm:$0xff]  ;;  %322 = vmatprep.subr.bf16.mxu1 %v377_v4  ;;  %v34_v10 = vld [vmem:[%s578_s1 + $0x90] sm:$0xff]  ;;  %v76_v27 = vunpack.c.l.s4 %v378_v26 }
   0x2   :  { %v16_v2 = vld [vmem:[%s578_s1] sm:$0xff]  ;;  %v290_v3 = vpack.c.bf16 %v33_v1, %v32_v0  ;;  %v17_v5 = vld [vmem:[%s578_s1 + $0x8] sm:$0xff]  ;;  %v35_v11 = vld [vmem:[%s578_s1 + $0x98] sm:$0xff]  ;;  %v79_v39 = vshrl.u32 %v78_v28, 7 }
   0x3   :  { %v48_v6 = vld [vmem:[%s578_s1 + $0x100] sm:$0xff]  ;;  %v49_v7 = vld [vmem:[%s578_s1 + $0x108] sm:$0xff]  ;;  %v292_v8 = vpack.c.bf16 %v17_v5, %v16_v2  ;;  %v18_v12 = vld [vmem:[%s578_s1 + $0x10] sm:$0xff]  ;;  %v294_v13 = vpack.c.bf16 %v35_v11, %v34_v10  ;;  %v77_v38 = vunpack.c.0.s8 %v76_v27 }
   0x4   :  { %v323_v9 = vpack.c.bf16 %v49_v7, %v48_v6  ;;  %291 = vmatprep.subr.bf16.mxu0 %v290_v3  ;;  %v19_v14 = vld [vmem:[%s578_s1 + $0x18] sm:$0xff]  ;;  %v50_v15 = vld [vmem:[%s578_s1 + $0x110] sm:$0xff]  ;;  %v36_v19 = vld [vmem:[%s578_s1 + $0xa0] sm:$0xff] }
   0x5   :  { %v51_v16 = vld [vmem:[%s578_s1 + $0x118] sm:$0xff]  ;;  %293 = vmatpush3.bf16.msra.mxu0 %v292_v8  ;;  %v296_v17 = vpack.c.bf16 %v19_v14, %v18_v12  ;;  %v37_v20 = vld [vmem:[%s578_s1 + $0xa8] sm:$0xff]  ;;  %v20_v21 = vld [vmem:[%s578_s1 + $0x20] sm:$0xff]  ;;  %v80_v49 = vsub.s32 %v77_v38, %v79_v39 }
   0x6   :  { %324 = vmatpush1.bf16.msra.mxu1 %v323_v9  ;;  %v326_v18 = vpack.c.bf16 %v51_v16, %v50_v15  ;;  %295 = vmatprep.subr.bf16.mxu0 %v294_v13  ;;  %v298_v22 = vpack.c.bf16 %v37_v20, %v36_v19  ;;  %v21_v23 = vld [vmem:[%s578_s1 + $0x28] sm:$0xff]  ;;  %v52_v24 = vld [vmem:[%s578_s1 + $0x120] sm:$0xff]  ;;  %v38_v29 = vld [vmem:[%s578_s1 + $0xb0] sm:$0xff] }
   0x7   :  { %325 = vmatprep.subr.bf16.mxu1 %v377_v4  ;;  %v53_v25 = vld [vmem:[%s578_s1 + $0x128] sm:$0xff]  ;;  %v39_v30 = vld [vmem:[%s578_s1 + $0xb8] sm:$0xff]  ;;  %v300_v31 = vpack.c.bf16 %v21_v23, %v20_v21  ;;  %v22_v33 = vld [vmem:[%s578_s1 + $0x30] sm:$0xff] }
   0x8   :  { %v329_v32 = vpack.c.bf16 %v53_v25, %v52_v24  ;;  %v302_v34 = vpack.c.bf16 %v39_v30, %v38_v29  ;;  %v23_v35 = vld [vmem:[%s578_s1 + $0x38] sm:$0xff]  ;;  %v54_v36 = vld [vmem:[%s578_s1 + $0x130] sm:$0xff]  ;;  %v40_v40 = vld [vmem:[%s578_s1 + $0xc0] sm:$0xff] }
   0x9   :  { %297 = vmatpush3.bf16.msra.mxu0 %v296_v17  ;;  %v55_v37 = vld [vmem:[%s578_s1 + $0x138] sm:$0xff]  ;;  %v41_v41 = vld [vmem:[%s578_s1 + $0xc8] sm:$0xff]  ;;  %v304_v42 = vpack.c.bf16 %v23_v35, %v22_v33  ;;  %v24_v44 = vld [vmem:[%s578_s1 + $0x40] sm:$0xff] }
   0xa   :  { %327 = vmatpush1.bf16.msra.mxu1 %v326_v18  ;;  %299 = vmatprep.subr.bf16.mxu0 %v298_v22  ;;  %v332_v43 = vpack.c.bf16 %v55_v37, %v54_v36  ;;  %v306_v45 = vpack.c.bf16 %v41_v41, %v40_v40  ;;  %v25_v46 = vld [vmem:[%s578_s1 + $0x48] sm:$0xff]  ;;  %v56_v47 = vld [vmem:[%s578_s1 + $0x140] sm:$0xff]  ;;  %v42_v50 = vld [vmem:[%s578_s1 + $0xd0] sm:$0xff] }
   0xb   :  { %328 = vmatprep.subr.bf16.mxu1 %v377_v4  ;;  %v57_v48 = vld [vmem:[%s578_s1 + $0x148] sm:$0xff]  ;;  %v43_v51 = vld [vmem:[%s578_s1 + $0xd8] sm:$0xff]  ;;  %v308_v52 = vpack.c.bf16 %v25_v46, %v24_v44  ;;  %v26_v54 = vld [vmem:[%s578_s1 + $0x50] sm:$0xff] }
   0xc   :  { %v335_v53 = vpack.c.bf16 %v57_v48, %v56_v47  ;;  %v27_v55 = vld [vmem:[%s578_s1 + $0x58] sm:$0xff]  ;;  %v15_v56 = vld [vmem:[%s577_s0] sm:$0xff]  ;;  %v310_v57 = vpack.c.bf16 %v43_v51, %v42_v50  ;;  %v58_v58 = vld [vmem:[%s578_s1 + $0x150] sm:$0xff] }
   0xd   :  { %301 = vmatpush3.bf16.msra.mxu0 %v300_v31  ;;  %v59_v59 = vld [vmem:[%s578_s1 + $0x158] sm:$0xff]  ;;  %v74_v60 = vcombine.high %v15_v56, %v15_v56  ;;  %v81_v61 = vrot.slane %v15_v56, %v80_v49 }
   0xe   :  { %330 = vmatpush1.bf16.msra.mxu1 %v329_v32  ;;  %303 = vmatprep.subr.bf16.mxu0 %v302_v34 }
   0xf   :  { %331 = vmatprep.subr.bf16.mxu1 %v377_v4 }
  0x11   :  { %305 = vmatpush3.bf16.msra.mxu0 %v304_v42 }
  0x12   :  { %333 = vmatpush1.bf16.msra.mxu1 %v332_v43  ;;  %307 = vmatprep.subr.bf16.mxu0 %v306_v45 }
  0x13   :  { %334 = vmatprep.subr.bf16.mxu1 %v377_v4 }
  0x14   :  { %8 = vsyncpa [#allocation3], 0  ;;  %v44_v62 = vld [vmem:[%s578_s1 + $0xe0] sm:$0xff]  ;;  %v45_v63 = vld [vmem:[%s578_s1 + $0xe8] sm:$0xff]  ;;  %v89_v0 = vcombine.high %v81_v61, %v81_v61  ;;  %v88_v1 = vrot.slane %v74_v60, %v80_v49  ;;  %v312_v2 = vpack.c.bf16 %v27_v55, %v26_v54  ;;  %v338_v3 = vpack.c.bf16 %v59_v59, %v58_v58  ;;  %s379_s0 = smov [#allocation2]  }
  0x15   :  { %309 = vmatpush3.bf16.msra.mxu0 %v308_v52  ;;  %v28_v5 = vld [vmem:[%s578_s1 + $0x60] sm:$0xff]  ;;  %vm94_vm0 = vcmask 130048   ;;  %v314_v6 = vpack.c.bf16 %v45_v63, %v44_v62  ;;  %v29_v7 = vld [vmem:[%s578_s1 + $0x68] sm:$0xff]  ;;  %v46_v11 = vld [vmem:[%s578_s1 + $0xf0] sm:$0xff]  ;;  %s245_s7 = sshll.u32 %s379_s0, 4  ;;  %vm237_vm1 = vcmask 17408   ;;  %s246_s7 = int_to_ptr.vmem [resolvable:$true] %s245_s7 }
  0x16   :  { %336 = vmatpush1.bf16.msra.mxu1 %v335_v53  ;;  %311 = vmatprep.subr.bf16.mxu0 %v310_v57  ;;  %v60_v8 = vld [vmem:[%s578_s1 + $0x160] sm:$0xff]  ;;  %v61_v9 = vld [vmem:[%s578_s1 + $0x168] sm:$0xff]  ;;  %v90_v10 = vcombine.high %v88_v1, %v88_v1  ;;  %v47_v12 = vld [vmem:[%s578_s1 + $0xf8] sm:$0xff]  ;;  %v316_v13 = vpack.c.bf16 %v29_v7, %v28_v5  ;;  %p358_p1 = scmp.lt.s32.totalorder %s246_s7, %s246_s7 }
  0x17   :  { %337 = vmatprep.subr.bf16.mxu1 %v377_v4  ;;  %161 = vmatprep.mubr.f32.mxu0 %v89_v0  ;;  %v341_v14 = vpack.c.bf16 %v61_v9, %v60_v8  ;;  %v30_v15 = vld [vmem:[%s578_s1 + $0x70] sm:$0xff]  ;;  %v318_v16 = vpack.c.bf16 %v47_v12, %v46_v11  ;;  %v31_v17 = vld [vmem:[%s578_s1 + $0x78] sm:$0xff]  ;;  %v64_v22 = vld [vmem:[%s578_s1 + $0x180] sm:$0xff] }
  0x18   :  { %254 = vmatprep.mubr.msk.f32.mxu1 %vm94_vm0, %v90_v10  ;;  %v62_v18 = vld [vmem:[%s578_s1 + $0x170] sm:$0xff]  ;;  %v63_v19 = vld [vmem:[%s578_s1 + $0x178] sm:$0xff]  ;;  %v320_v20 = vpack.c.bf16 %v31_v17, %v30_v15  ;;  %v65_v23 = vld [vmem:[%s578_s1 + $0x188] sm:$0xff]  ;;  %s353_s1 = scalar_lea.vmem %s246_s7, 32 }
  0x19   :  { %313 = vmatpush3.bf16.msra.mxu0 %v312_v2  ;;  %v344_v21 = vpack.c.bf16 %v63_v19, %v62_v18  ;;  %v347_v24 = vpack.c.bf16 %v65_v23, %v64_v22  ;;  %v253_v27 = vld [vmem:[%s579_s2] ss:$0 sm:$0xff]  ;;  %p354_p0 = scmp.ne.s32.totalorder %s246_s7, %s353_s1  ;;  %p359_p2 = scmp.lt.s32.totalorder %s353_s1, %s353_s1 }
  0x1a   :  { %339 = vmatpush1.bf16.msra.mxu1 %v338_v3  ;;  %315 = vmatprep.subr.bf16.mxu0 %v314_v6 }
  0x1b   :  { %340 = vmatprep.subr.bf16.mxu1 %v377_v4  ;;  %p360_p3 = por %p359_p2, %p358_p1 }
  0x1d   :  { %317 = vmatpush3.bf16.msra.mxu0 %v316_v13  ;;  %p361_p4 = pnand %p360_p3, %p354_p0 }
  0x1e   :  { %342 = vmatpush1.bf16.msra.mxu1 %v341_v14  ;;  %319 = vmatprep.subr.bf16.mxu0 %v318_v16 }
  0x1f   :  { %343 = vmatprep.subr.bf16.mxu1 %v377_v4 }
  0x21   :  { %321 = vmatpush3.bf16.msra.mxu0 %v320_v20 }
  0x22   :  { %345 = vmatpush1.bf16.msra.mxu1 %v344_v21 }
  0x23   :  { %346 = vmatprep.subr.bf16.mxu1 %v377_v4 }
  0x24   :  { %162 = vmatmul.mubr.f32.vlgmr.msra.gmra.mrb[0].mxu0 %v81_v61 }
  0x26   :  { %348 = vmatpush1.bf16.msra.mxu1 %v347_v24 }
  0x29   :  { %232 = vmatmul.mubr.f32.vlgmr.msra.gmra.mrb[0].mxu1 %v88_v1 }
  0xf7   :  { %v287_v25 = vpop.f32.mrb[0].mxu0 }
  0xf8   :  { %v288_v26 = vpop.f32.mrb[1].mxu0 }
  0xf9   :  { %v289_v28 = vadd.f32 %v288_v26, %v287_v25 }
  0xfb   :  { %v164_v29 = vadd.f32 %v289_v28, %v253_v27 }
  0xfc   :  { %v233_v30 = vpop.f32.mrb[0].mxu1 }
  0xfd   :  { %v235_v31 = vpop.f32.mrb[1].mxu1  ;;  %v234_v32 = vadd.f32 %v233_v30, %v164_v29 }
  0xff   :  { %238 = vst.msk [vmem:[#allocation2] sm:$0x3] %vm237_vm1, %v234_v32 }
 0x100   :  { %364 = shalt.err (!%p361_p4)
}
 0x101   :  { %s365_s2 = scalar_lea.hbm %s580_s3, 32 }
 0x102   :  { %p366_p5 = scmp.ne.s32.totalorder %s580_s3, %s365_s2  ;;  %p369_p6 = scmp.lt.u32.totalorder %s365_s2, %s580_s3 }
 0x104   :  { %p371_p7 = pnand %p369_p6, %p366_p5 }
 0x106   :  { %374 = shalt.err (!%p371_p7)
}
 0x107   :  { %248 = dma.vmem_to_hbm [thread:$0]  %s246_s7, 32, %s580_s3, [#allocation3]  }
 0x108   :  { %375 = dma.done.wait [#allocation3], 32  }
 0x109   :  { %376 = vsyncadd [#allocation3], 4294967264 }
 0x10a   :  { %252 = vsyncpa [#allocation3], 1 }

// kernel: menet_cs_forward.2
= control target key start
LH: loop header
LB: loop body
LE: loop exit
PB: predicated region body
PF: predicated region fallthrough
CT: control target
= control target key end

     0   :  { %s6674_s24 = smov 0   ;;  %s8977_s0 = inlined_call_operand.vmem [shape: f32[2,256,4], index: 0, kind: input, shape index: {}]   ;;  %s8978_s1 = inlined_call_operand.vmem [shape: f32[2,36,36], index: 1, kind: input, shape index: {}]   ;;  %s8979_s2 = inlined_call_operand.vmem [shape: f32[2,36,36], index: 2, kind: input, shape index: {}]   ;;  %s8980_s3 = inlined_call_operand.vmem [shape: f32[36,16], index: 3, kind: input, shape index: {}]   ;;  %s8981_s4 = inlined_call_operand.vmem [shape: f32[3,16], index: 4, kind: input, shape index: {}]   ;;  %s8982_s5 = inlined_call_operand.vmem [shape: f32[36,16], index: 5, kind: input, shape index: {}]   ;;  %s8983_s6 = inlined_call_operand.vmem [shape: f32[3,16], index: 6, kind: input, shape index: {}]   ;;  %s8984_s7 = inlined_call_operand.vmem [shape: f32[16,16], index: 7, kind: input, shape index: {}]   ;;  %s8985_s8 = inlined_call_operand.vmem [shape: f32[2,16], index: 8, kind: input, shape index: {}]   ;;  %s8986_s9 = inlined_call_operand.vmem [shape: f32[144,16], index: 9, kind: input, shape index: {}]   ;;  %s8987_s10 = inlined_call_operand.vmem [shape: f32[2,16], index: 10, kind: input, shape index: {}]   ;;  %s8988_s11 = inlined_call_operand.vmem [shape: f32[25,3], index: 11, kind: input, shape index: {}]   ;;  %s8989_s12 = inlined_call_operand.vmem [shape: f32[25,256], index: 12, kind: input, shape index: {}]   ;;  %s8990_s13 = inlined_call_operand.vmem [shape: f32[25,36], index: 13, kind: input, shape index: {}]   ;;  %s8991_s14 = inlined_call_operand.vmem [shape: f32[25,9], index: 14, kind: input, shape index: {}]   ;;  %s8992_s15 = inlined_call_operand.vmem [shape: f32[36,25], index: 15, kind: input, shape index: {}]   ;;  %s8993_s16 = inlined_call_operand.vmem [shape: f32[36,25], index: 16, kind: input, shape index: {}]   ;;  %s8994_s17 = inlined_call_operand.vmem [shape: f32[2,25,16], index: 17, kind: output, shape index: {}]  }
   0x1   :  { %9004 = sst [smem:[#allocation4_spill]] %s8977_s0 }
   0x2   :  { %9005 = sst [smem:[#allocation5_spill]] %s8978_s1 }
   0x3 LB: > { %s5942_s25 = sadd.s32 4294967295, %s6567_s24   ;;  %p5946_p0 = scmp.ge.s32.totalorder %s6567_s24, 1  ;;  %s6567_s24 = sphi %s6674_s24, %s27_s24  }
   0x4   : > { %p507_p1 = scmp.lt.s32.totalorder %s6567_s24, 3 }
   0x6   : > { %p508_p2 = pnand %p5946_p0, %p507_p1 }
   0x7   : > { %p569_p3 = scmp.lt.s32.totalorder (!%p508_p2), %s5942_s25, 1  ;;  %v622_v0 = vld [vmem:[%s8989_s12 + $0x8] sm:$0xff] (!%p508_p2)  ;;  %s9006_s30 = sld [smem:[#allocation4_spill]] (!%p508_p2)  ;;  %v621_v49 = vld [vmem:[%s8989_s12] sm:$0xff] (!%p508_p2)  ;;  %v624_v50 = vld [vmem:[%s8989_s12 + $0x18] sm:$0xff] (!%p508_p2)  ;;  %vm714_vm0 = vcmask (!%p508_p2), 31744  }
   0x8   : > { %511 = sbr.rel (%p508_p2) target bundleno = 4992 (0x1380), region = 88  ;;  %693 = vmatprep.mubr.f32.mxu0 (!%p508_p2), %v622_v0  ;;  %v623_v51 = vld [vmem:[%s8989_s12 + $0x10] sm:$0xff] (!%p508_p2)  ;;  %v626_v52 = vld [vmem:[%s8989_s12 + $0x28] sm:$0xff] (!%p508_p2)  ;;  %v625_v53 = vld [vmem:[%s8989_s12 + $0x20] sm:$0xff] (!%p508_p2)  ;;  %vm724_vm1 = vcmask (!%p508_p2), 24576   ;;  %vm741_vm2 = vcmask (!%p508_p2), 7168  }
   0x9   : > { %v628_v54 = vld [vmem:[%s8989_s12 + $0x38] sm:$0x1] (!%p508_p2)  ;;  %v627_v55 = vld [vmem:[%s8989_s12 + $0x30] sm:$0x1] (!%p508_p2)  ;;  %vm745_vm3 = vcmask (!%p508_p2), 0   ;;  %vm794_vm4 = vcmask (!%p508_p2), 8200  }
   0xa   : > { %vm790_vm5 = vcmask (!%p508_p2), 15368   ;;  %vm859_vm6 = vcmask (!%p508_p2), 16400   ;;  %vm855_vm7 = vcmask (!%p508_p2), 23568   ;;  %s6569_s1 = smov (!%p508_p2), 127   ;;  %vm6571_vm8 = vmmov (!%p508_p2), 0   ;;  %s9007_s20 = sld [smem:[#allocation5_spill]] (!%p508_p2) }
   0xb   : > { %vm8996_vm9 = vcmask (!%p508_p2), 1043456   ;;  %vm939_vm10 = vcmask (!%p508_p2), 293888   ;;  %vm8997_vm11 = vcmask (!%p508_p2), 1040384   ;;  %vm6574_vm12 = vmmov (!%p508_p2), 1  }
   0xc   : > { %vm6973_vm13 = vmpackc.low (!%p508_p2), %vm8997_vm11, %vm6574_vm12  ;;  %vm1232_vm14 = vcmask (!%p508_p2), 203776   ;;  %vm1476_vm15 = vcmask (!%p508_p2), 130048   ;;  %vm2612_vm12 = vcmask (!%p508_p2), 392448  }
   0xf   : > { %s9035_s25 = smov (!%p569_p3, %s5942_s25), 1 }
  0x10   : > { %s6068_s28 = sshll.u32 %s9035_s25, 8 }
  0x11   : > { %s6691_s18 = scalar_lea.vmem %s9006_s30, %s6068_s28 }
  0x12   : > { %v605_v1 = vld [vmem:[%s6691_s18 + $0x80] sm:$0xff]  ;;  %v606_v2 = vld [vmem:[%s6691_s18 + $0x88] sm:$0xff]  ;;  %v607_v6 = vld [vmem:[%s6691_s18 + $0x90] sm:$0xff] }
  0x13   : > { %v589_v3 = vld [vmem:[%s6691_s18] sm:$0xff]  ;;  %v6315_v4 = vpack.c.bf16 %v606_v2, %v605_v1  ;;  %v590_v5 = vld [vmem:[%s6691_s18 + $0x8] sm:$0xff]  ;;  %v608_v7 = vld [vmem:[%s6691_s18 + $0x98] sm:$0xff] }
  0x14   : > { %v6317_v8 = vpack.c.bf16 %v590_v5, %v589_v3  ;;  %v6319_v9 = vpack.c.bf16 %v608_v7, %v607_v6  ;;  %v591_v10 = vld [vmem:[%s6691_s18 + $0x10] sm:$0xff]  ;;  %v592_v11 = vld [vmem:[%s6691_s18 + $0x18] sm:$0xff]  ;;  %v609_v12 = vld [vmem:[%s6691_s18 + $0xa0] sm:$0xff] }
  0x15   : > { %6316 = vmatprep.subr.bf16.mxu0 %v6315_v4  ;;  %v610_v13 = vld [vmem:[%s6691_s18 + $0xa8] sm:$0xff]  ;;  %v6321_v14 = vpack.c.bf16 %v592_v11, %v591_v10  ;;  %v593_v16 = vld [vmem:[%s6691_s18 + $0x20] sm:$0xff]  ;;  %v611_v18 = vld [vmem:[%s6691_s18 + $0xb0] sm:$0xff] }
  0x16   : > { %6318 = vmatpush3.bf16.msra.mxu0 %v6317_v8  ;;  %v6323_v15 = vpack.c.bf16 %v610_v13, %v609_v12  ;;  %v594_v17 = vld [vmem:[%s6691_s18 + $0x28] sm:$0xff]  ;;  %v612_v19 = vld [vmem:[%s6691_s18 + $0xb8] sm:$0xff]  ;;  %v595_v22 = vld [vmem:[%s6691_s18 + $0x30] sm:$0xff] }
  0x17   : > { %6320 = vmatprep.subr.bf16.mxu0 %v6319_v9  ;;  %v6325_v20 = vpack.c.bf16 %v594_v17, %v593_v16  ;;  %v6327_v21 = vpack.c.bf16 %v612_v19, %v611_v18  ;;  %v596_v23 = vld [vmem:[%s6691_s18 + $0x38] sm:$0xff]  ;;  %v613_v24 = vld [vmem:[%s6691_s18 + $0xc0] sm:$0xff]  ;;  %v614_v25 = vld [vmem:[%s6691_s18 + $0xc8] sm:$0xff] }
  0x18   : > { %v6329_v26 = vpack.c.bf16 %v596_v23, %v595_v22  ;;  %v6331_v27 = vpack.c.bf16 %v614_v25, %v613_v24  ;;  %v597_v28 = vld [vmem:[%s6691_s18 + $0x40] sm:$0xff]  ;;  %v598_v29 = vld [vmem:[%s6691_s18 + $0x48] sm:$0xff]  ;;  %v615_v30 = vld [vmem:[%s6691_s18 + $0xd0] sm:$0xff] }
  0x19   : > { %v616_v31 = vld [vmem:[%s6691_s18 + $0xd8] sm:$0xff]  ;;  %v6333_v32 = vpack.c.bf16 %v598_v29, %v597_v28  ;;  %v599_v34 = vld [vmem:[%s6691_s18 + $0x50] sm:$0xff]  ;;  %v617_v36 = vld [vmem:[%s6691_s18 + $0xe0] sm:$0xff] }
  0x1a   : > { %6322 = vmatpush3.bf16.msra.mxu0 %v6321_v14  ;;  %v6335_v33 = vpack.c.bf16 %v616_v31, %v615_v30  ;;  %v600_v35 = vld [vmem:[%s6691_s18 + $0x58] sm:$0xff]  ;;  %v618_v37 = vld [vmem:[%s6691_s18 + $0xe8] sm:$0xff]  ;;  %v601_v40 = vld [vmem:[%s6691_s18 + $0x60] sm:$0xff] }
  0x1b   : > { %6324 = vmatprep.subr.bf16.mxu0 %v6323_v15  ;;  %v6337_v38 = vpack.c.bf16 %v600_v35, %v599_v34  ;;  %v6339_v39 = vpack.c.bf16 %v618_v37, %v617_v36  ;;  %v602_v41 = vld [vmem:[%s6691_s18 + $0x68] sm:$0xff]  ;;  %v619_v42 = vld [vmem:[%s6691_s18 + $0xf0] sm:$0xff]  ;;  %v620_v43 = vld [vmem:[%s6691_s18 + $0xf8] sm:$0xff] }
  0x1c   : > { %v6341_v44 = vpack.c.bf16 %v602_v41, %v601_v40  ;;  %v6343_v45 = vpack.c.bf16 %v620_v43, %v619_v42  ;;  %v603_v46 = vld [vmem:[%s6691_s18 + $0x70] sm:$0xff]  ;;  %v604_v47 = vld [vmem:[%s6691_s18 + $0x78] sm:$0xff]  ;;  %v6749_v11 = vld [vmem:[%s8988_s11 + $0x8] sm:$0xff] }
  0x1d   : > { %v6345_v48 = vpack.c.bf16 %v604_v47, %v603_v46  ;;  %v6754_v15 = vld [vmem:[%s8988_s11] sm:$0xff]  ;;  %v6759_v16 = vld [vmem:[%s8988_s11 + $0x10] sm:$0xff]  ;;  %v6767_v18 = vld [vmem:[%s8988_s11 + $0x18] sm:$0x1] }
  0x1e   : > { %6326 = vmatpush3.bf16.msra.mxu0 %v6325_v20 }
  0x1f   : > { %6328 = vmatprep.subr.bf16.mxu0 %v6327_v21 }
  0x22   : > { %6330 = vmatpush3.bf16.msra.mxu0 %v6329_v26 }
  0x23   : > { %6332 = vmatprep.subr.bf16.mxu0 %v6331_v27 }
  0x26   : > { %6334 = vmatpush3.bf16.msra.mxu0 %v6333_v32 }
  0x27   : > { %6336 = vmatprep.subr.bf16.mxu0 %v6335_v33 }
  0x2a   : > { %6338 = vmatpush3.bf16.msra.mxu0 %v6337_v38 }
  0x2b   : > { %6340 = vmatprep.subr.bf16.mxu0 %v6339_v39 }
  0x2e   : > { %6342 = vmatpush3.bf16.msra.mxu0 %v6341_v44 }
  0x2f   : > { %6344 = vmatprep.subr.bf16.mxu0 %v6343_v45 }
  0x32   : > { %6346 = vmatpush3.bf16.msra.mxu0 %v6345_v48 }
  0x35   : > { %694 = vmatmul.mubr.f32.vlgmr.msra.gmra.mrb[0].mxu0 %v621_v49 }
  0x36   : > { %698 = vmatprep.mubr.f32.mxu0 %v624_v50 }
  0x39   : > { %699 = vmatmul.mubr.f32.gmra.mrb[2].mxu0 %v623_v51 }
  0x3a   : > { %703 = vmatprep.mubr.f32.mxu0 %v626_v52 }
  0x3d   : > { %704 = vmatmul.mubr.f32.gmra.mrb[4].mxu0 %v625_v53 }
  0x3e   : > { %708 = vmatprep.mubr.f32.mxu0 %v628_v54 }
  0x41   : > { %709 = vmatmul.mubr.f32.gmra.mrb[6].mxu0 %v627_v55 }
 0x108   : > { %v6102_v56 = vpop.f32.mrb[0].mxu0 }
 0x109   : > { %v6103_v57 = vpop.f32.mrb[1].mxu0 }
 0x10a   : > { %v6104_v58 = vadd.f32 %v6103_v57, %v6102_v56 }
 0x10c   : > { %v6105_v59 = vpop.f32.mrb[2].mxu0  ;;  %v715_v60 = vsel %vm714_vm0, %v6104_v58, 0.0 }
 0x10d   : > { %v6106_v61 = vpop.f32.mrb[3].mxu0  ;;  %716 = vadd.xlane.f32.xlu0 %v715_v60 }
 0x10e   : > { %v6107_v62 = vadd.f32 %v6106_v61, %v6105_v59 }
 0x110   : > { %v6108_v63 = vpop.f32.mrb[4].mxu0  ;;  %v718_v0 = vsel %vm714_vm0, %v6107_v62, 0.0 }
 0x111   : > { %v6109_v1 = vpop.f32.mrb[5].mxu0  ;;  %719 = vadd.xlane.f32.xlu0 %v718_v0 }
 0x112   : > { %v6110_v2 = vadd.f32 %v6109_v1, %v6108_v63 }
 0x114   : > { %v6111_v3 = vpop.f32.mrb[6].mxu0  ;;  %v721_v4 = vsel %vm714_vm0, %v6110_v2, 0.0  ;;  %vm8995_vm0 = vcmask 122880  }
 0x115   : > { %v6112_v5 = vpop.f32.mrb[7].mxu0  ;;  %722 = vadd.xlane.f32.xlu1 %v721_v4 }
 0x116   : > { %v6113_v6 = vadd.f32 %v6112_v5, %v6111_v3 }
 0x118   : > { %v725_v7 = vsel %vm724_vm1, %v6113_v6, 0.0  ;;  %vm2357_vm1 = vcmask 1042434  }
 0x119   : > { %726 = vadd.xlane.f32.xlu1 %v725_v7 }
 0x19a   : > { %v717_v8 = vpop.xlane.xlu0 %716 }
 0x19b   : > { %v729_v13 = vmul.f32 0.25, %v717_v8 }
 0x19d   : > { %v6770_v20 = vmul.f32 %v6754_v15, %v729_v13 }
 0x19e   : > { %v720_v9 = vpop.xlane.xlu0 %719 }
 0x19f   : > { %v730_v10 = vmul.f32 0.25, %v720_v9  ;;  %v742_v25 = vsel %vm741_vm2, %v6770_v20, inf  ;;  %v791_v35 = vsel %vm790_vm5, %v6770_v20, inf  ;;  %v856_v42 = vsel %vm855_vm7, %v6770_v20, inf }
 0x1a1   : > { %v6762_v17 = vmul.f32 %v6749_v11, %v730_v10 }
 0x1a2   : > { %v723_v12 = vpop.xlane.xlu1 %722 }
 0x1a3   : > { %v731_v14 = vmul.f32 0.25, %v723_v12  ;;  %v743_v24 = vsel %vm741_vm2, %v6762_v17, inf  ;;  %v792_v31 = vsel %vm790_vm5, %v6762_v17, inf  ;;  %v857_v38 = vsel %vm855_vm7, %v6762_v17, inf }
 0x1a4   : > { %v747_v29 = vmin.f32 %v742_v25, %v743_v24  ;;  %v796_v37 = vmin.f32 %v791_v35, %v792_v31  ;;  %v861_v43 = vmin.f32 %v856_v42, %v857_v38 }
 0x1a5   : > { %v6773_v21 = vmul.f32 %v6759_v16, %v731_v14 }
 0x1a6   : > { %v727_v19 = vpop.xlane.xlu1 %726 }
 0x1a7   : > { %v732_v22 = vmul.f32 0.25, %v727_v19  ;;  %v744_v26 = vsel %vm741_vm2, %v6773_v21, inf  ;;  %v793_v32 = vsel %vm790_vm5, %v6773_v21, inf  ;;  %v858_v39 = vsel %vm855_vm7, %v6773_v21, inf }
 0x1a9   : > { %v6776_v23 = vmul.f32 %v6767_v18, %v732_v22 }
 0x1ab   : > { %v746_v27 = vsel %vm745_vm3, %v6776_v23, inf  ;;  %v795_v28 = vsel %vm794_vm4, %v6776_v23, inf  ;;  %v860_v36 = vsel %vm859_vm6, %v6776_v23, inf }
 0x1ac   : > { %v748_v30 = vmin.f32 %v744_v26, %v746_v27  ;;  %v797_v34 = vmin.f32 %v793_v32, %v795_v28  ;;  %v862_v41 = vmin.f32 %v858_v39, %v860_v36 }
 0x1ae   : > { %v749_v33 = vmin.f32 %v747_v29, %v748_v30  ;;  %v798_v40 = vmin.f32 %v796_v37, %v797_v34  ;;  %v863_v44 = vmin.f32 %v861_v43, %v862_v41 }
 0x1b0   : > { %750 = vmin.xlane.f32.xlu0 %v749_v33 }
 0x1b4   : > { %799 = vmin.xlane.f32.xlu0 %v798_v40 }
 0x1b8   : > { %864 = vmin.xlane.f32.xlu0 %v863_v44 }
 0x23d   : > { %v751_v45 = vpop.xlane.xlu0 %750 }
 0x23e   : > { %v752_v46 = vrot.slane %v751_v45, 4 }
 0x240   : > { %v753_v47 = vmin.f32 %v751_v45, %v752_v46 }
 0x241   : > { %v800_v0 = vpop.xlane.xlu0 %799 }
 0x242   : > { %v754_v48 = vrot.slane %v753_v47, 2  ;;  %v801_v1 = vrot.slane %v800_v0, 4 }
 0x244   : > { %v755_v49 = vmin.f32 %v753_v47, %v754_v48  ;;  %v802_v2 = vmin.f32 %v800_v0, %v801_v1 }
 0x245   : > { %v865_v34 = vpop.xlane.xlu0 %864 }
 0x246   : > { %v756_v50 = vrot.slane %v755_v49, 1  ;;  %v803_v4 = vrot.slane %v802_v2, 2  ;;  %v866_v35 = vrot.slane %v865_v34, 4 }
 0x248   : > { %v757_v51 = vmin.f32 %v755_v49, %v756_v50  ;;  %v804_v7 = vmin.f32 %v802_v2, %v803_v4  ;;  %v867_v36 = vmin.f32 %v865_v34, %v866_v35  ;;  %v929_v2 = vld [vmem:[%s8980_s3] sm:$0xff]  ;;  %v931_v4 = vld [vmem:[%s8980_s3 + $0x10] sm:$0xff] }
 0x24a   : > { %6478 = vpush %v757_v51  ;;  %v805_v10 = vrot.slane %v804_v7, 1  ;;  %v868_v38 = vrot.slane %v867_v36, 2 }
 0x24c   : > { %v806_v14 = vmin.f32 %v804_v7, %v805_v10  ;;  %v869_v41 = vmin.f32 %v867_v36, %v868_v38  ;;  %v932_v7 = vld [vmem:[%s8980_s3 + $0x18] sm:$0xff]  ;;  %v933_v10 = vld [vmem:[%s8980_s3 + $0x20] sm:$0xf] }
 0x24e   : > { %v870_v44 = vrot.slane %v869_v41, 1 }
 0x250   : > { %v871_v47 = vmin.f32 %v869_v41, %v870_v44 }
 0x27b   : > { %s6479_s29 = spop %6478 }
 0x27c   : > { %v759_v52 = vstv %s6479_s29  ;;  %s6577_s29 = smov 32  }
 0x27d   : > { %v6803_v53 = vsub.f32 %v6770_v20, %v759_v52  ;;  %v6806_v54 = vsub.f32 %v6762_v17, %v759_v52  ;;  %v6809_v55 = vsub.f32 %v6773_v21, %v759_v52  ;;  %v6812_v56 = vsub.f32 %v6776_v23, %v759_v52 }
 0x27f   : > { %v764_v57 = vsel %vm741_vm2, %v6803_v53, -inf  ;;  %v765_v58 = vsel %vm741_vm2, %v6806_v54, -inf  ;;  %v766_v59 = vsel %vm741_vm2, %v6809_v55, -inf  ;;  %v767_v60 = vsel %vm745_vm3, %v6812_v56, -inf }
 0x280   : > { %v768_v61 = vmax.f32 %v764_v57, %v765_v58  ;;  %v769_v62 = vmax.f32 %v766_v59, %v767_v60 }
 0x282   : > { %v770_v63 = vmax.f32 %v768_v61, %v769_v62 }
 0x284   : > { %771 = vmax.xlane.f32.xlu1 %v770_v63 }
 0x311   : > { %v772_v3 = vpop.xlane.xlu1 %771 }
 0x312   : > { %v773_v5 = vrot.slane %v772_v3, 4 }
 0x314   : > { %v774_v6 = vmax.f32 %v772_v3, %v773_v5  ;;  %v930_v3 = vld [vmem:[%s8980_s3 + $0x8] sm:$0xff]  ;;  %v6570_v5 = vmov 0.0|0.0  }
 0x315   : > { %6471 = vmatprep.subr.bf16.mxu1 %v6570_v5  ;;  %6347 = vmatprep.subr.bf16.mxu0 %v6570_v5 }
 0x316   : > { %v775_v8 = vrot.slane %v774_v6, 2 }
 0x318   : > { %v776_v9 = vmax.f32 %v774_v6, %v775_v8  ;;  %v6348_v6 = vpack.c.bf16 %v930_v3, %v929_v2  ;;  %v6572_v8 = vmov 0.0  }
 0x319   : > { %6190 = vmatprep.mubr.msk.f32.mxu1 %vm6571_vm8, %v6572_v8  ;;  %6184 = vmatprep.mubr.msk.f32.mxu0 %vm6571_vm8, %v6572_v8  ;;  %1950 = vst.msk [vmem:[#allocation2] sm:$0xff] %vm1476_vm15, %v6572_v8  ;;  %1951 = vst.msk [vmem:[#allocation2 + $0x8] sm:$0xff] %vm1476_vm15, %v6572_v8 }
 0x31a   : > { %v777_v12 = vrot.slane %v776_v9, 1  ;;  %6474 = vmatpush3.bf16.msra.mxu1 %v6348_v6  ;;  %6349 = vmatpush3.bf16.msra.mxu0 %v6348_v6  ;;  %1952 = vst.msk [vmem:[#allocation2 + $0x10] sm:$0xff] %vm1476_vm15, %v6572_v8  ;;  %1953 = vst.msk [vmem:[#allocation2 + $0x18] sm:$0xff] %vm1476_vm15, %v6572_v8 }
 0x31b   : > { %6472 = vmatprep.subr.bf16.mxu1 %v6570_v5  ;;  %6350 = vmatprep.subr.bf16.mxu0 %v6570_v5  ;;  %1954 = vst.msk [vmem:[#allocation2 + $0x20] sm:$0xff] %vm1476_vm15, %v6572_v8  ;;  %1955 = vst.msk [vmem:[#allocation2 + $0x28] sm:$0xff] %vm1476_vm15, %v6572_v8 }
 0x31c   : > { %v778_v13 = vmax.f32 %v776_v9, %v777_v12  ;;  %v6351_v9 = vpack.c.bf16 %v932_v7, %v931_v4  ;;  %1956 = vst.msk [vmem:[#allocation2 + $0x30] sm:$0xff] %vm1476_vm15, %v6572_v8  ;;  %1957 = vst.msk [vmem:[#allocation2 + $0x38] sm:$0xff] %vm1476_vm15, %v6572_v8 }
 0x31e   : > { %6480 = vpush %v778_v13  ;;  %6475 = vmatpush3.bf16.msra.mxu1 %v6351_v9  ;;  %6352 = vmatpush3.bf16.msra.mxu0 %v6351_v9 }
 0x31f   : > { %6482 = vpush %v806_v14  ;;  %6473 = vmatprep.subr.mxu1 %v6572_v8  ;;  %6182 = vmatprep.subr.mxu0 %v6572_v8 }
 0x322   : > { %6476 = vmatpush3.msk.msra.mxu1 %vm8996_vm9, %v933_v10  ;;  %6183 = vmatpush3.msk.msra.mxu0 %vm8996_vm9, %v933_v10 }
 0x323   : > { %6353 = vmatprep.subr.bf16.mxu1 %v6570_v5  ;;  %6359 = vmatprep.subr.bf16.mxu0 %v6570_v5 }
 0x34f   : > { %s6822_s0 = spop %6480 }
 0x350   : > { %s6483_s30 = spop %6482 }
 0x351   : > { %v808_v19 = vstv %s6483_s30  ;;  %s6477_s30 = smul.u32 40, %s9035_s25 }
 0x352   : > { %v809_v22 = vsub.f32 %v6770_v20, %v808_v19  ;;  %v810_v24 = vsub.f32 %v6762_v17, %v808_v19  ;;  %v811_v25 = vsub.f32 %v6773_v21, %v808_v19  ;;  %v812_v26 = vsub.f32 %v6776_v23, %v808_v19 }
 0x353   : > { %s6882_s21 = scalar_lea.vmem %s9007_s20, %s6477_s30  ;;  %s6920_s28 = scalar_lea.vmem %s8979_s2, %s6477_s30 }
 0x354   : > { %v813_v27 = vsel %vm790_vm5, %v809_v22, -inf  ;;  %v814_v28 = vsel %vm790_vm5, %v810_v24, -inf  ;;  %v815_v29 = vsel %vm790_vm5, %v811_v25, -inf  ;;  %v816_v30 = vsel %vm794_vm4, %v812_v26, -inf  ;;  %v926_v12 = vld [vmem:[%s6882_s21 + $0x10] sm:$0xff]  ;;  %v924_v36 = vld [vmem:[%s6882_s21] sm:$0xff] }
 0x355   : > { %v817_v31 = vmax.f32 %v813_v27, %v814_v28  ;;  %v818_v32 = vmax.f32 %v815_v29, %v816_v30  ;;  %6191 = vmatmul.mubr.msk.f32.vlgmr.msra.gmra.mrb[0].mxu1 %vm939_vm10, %v926_v12  ;;  %v1079_v27 = vld [vmem:[%s8982_s5] sm:$0xff]  ;;  %v1080_v28 = vld [vmem:[%s8982_s5 + $0x8] sm:$0xff]  ;;  %6185 = vmatmul.mubr.msk.f32.vlgmr.msra.gmra.mrb[8].mxu0 %vm939_vm10, %v924_v36  ;;  %s6573_s30 = smov 126  }
 0x356   : > { %6193 = vmatprep.mubr.msk.f32.mxu1 %vm6571_vm8, %v6572_v8  ;;  %v6354_v29 = vpack.c.bf16 %v1080_v28, %v1079_v27  ;;  %v928_v35 = vld [vmem:[%s6882_s21 + $0x20] sm:$0xf]  ;;  %6187 = vmatprep.mubr.msk.f32.mxu0 %vm6571_vm8, %v6572_v8 }
 0x357   : > { %v819_v33 = vmax.f32 %v817_v31, %v818_v32  ;;  %v927_v31 = vld [vmem:[%s6882_s21 + $0x18] sm:$0xff]  ;;  %v1081_v32 = vld [vmem:[%s8982_s5 + $0x10] sm:$0xff]  ;;  %v1074_v38 = vld [vmem:[%s6920_s28] sm:$0xff] }
 0x358   : > { %6355 = vmatpush3.bf16.msra.mxu1 %v6354_v29 }
 0x359   : > { %820 = vmax.xlane.f32.xlu1 %v819_v33  ;;  %6194 = vmatmul.mubr.msk.f32.gmra.mrb[2].mxu1 %vm939_vm10, %v927_v31  ;;  %v1082_v33 = vld [vmem:[%s8982_s5 + $0x18] sm:$0xff] }
 0x35a   : > { %6356 = vmatprep.subr.bf16.mxu1 %v6570_v5  ;;  %6196 = vmatprep.mubr.msk.f32.mxu1 %vm6571_vm8, %v6572_v8  ;;  %v6357_v34 = vpack.c.bf16 %v1082_v33, %v1081_v32  ;;  %v5962_v32 = vld [vmem:[%s8983_s6] ss:$0 sm:$0xff] }
 0x35c   : > { %6358 = vmatpush3.bf16.msra.mxu1 %v6357_v34 }
 0x35d   : > { %6197 = vmatmul.mubr.msk.f32.gmra.mrb[4].mxu1 %vm939_vm10, %v928_v35  ;;  %6207 = vmatprep.subr.mxu1 %v6572_v8 }
 0x35e   : > { %6209 = vmatprep.mubr.msk.f32.mxu1 %vm6571_vm8, %v6572_v8 }
 0x3e6   : > { %v821_v37 = vpop.xlane.xlu1 %820 }
 0x3e7   : > { %v822_v39 = vrot.slane %v821_v37, 4 }
 0x3e9   : > { %v823_v40 = vmax.f32 %v821_v37, %v822_v39  ;;  %v1083_v37 = vld [vmem:[%s8982_s5 + $0x20] sm:$0xf] }
 0x3ea   : > { %6208 = vmatpush3.msk.msra.mxu1 %vm8996_vm9, %v1083_v37  ;;  %v5960_v37 = vld [vmem:[%s8981_s4 + $0x1] ss:$0 sm:$0xff] }
 0x3eb   : > { %v824_v42 = vrot.slane %v823_v40, 2  ;;  %6210 = vmatmul.mubr.msk.f32.vlgmr.msra.gmra.mrb[6].mxu1 %vm939_vm10, %v1074_v38 }
 0x3ec   : > { %6212 = vmatprep.mubr.msk.f32.mxu1 %vm6571_vm8, %v6572_v8 }
 0x3ed   : > { %v825_v43 = vmax.f32 %v823_v40, %v824_v42  ;;  %v925_v42 = vld [vmem:[%s6882_s21 + $0x8] sm:$0xff] }
 0x3ee   : > { %6188 = vmatmul.mubr.msk.f32.gmra.mrb[10].mxu0 %vm939_vm10, %v925_v42  ;;  %v5961_v42 = vld [vmem:[%s8981_s4 + $0x2] ss:$0 sm:$0xff] }
 0x3ef   : > { %v826_v45 = vrot.slane %v825_v43, 1  ;;  %6232 = vmatprep.mubr.msk.f32.mxu0 %vm6571_vm8, %v6572_v8 }
 0x3f1   : > { %v827_v46 = vmax.f32 %v825_v43, %v826_v45  ;;  %v1075_v43 = vld [vmem:[%s6920_s28 + $0x8] sm:$0xff] }
 0x3f2   : > { %6213 = vmatmul.mubr.msk.f32.gmra.mrb[8].mxu1 %vm939_vm10, %v1075_v43 }
 0x3f3   : > { %6484 = vpush %v827_v46  ;;  %6215 = vmatprep.mubr.msk.f32.mxu1 %vm6571_vm8, %v6572_v8  ;;  %v1076_v46 = vld [vmem:[%s6920_s28 + $0x10] sm:$0xff] }
 0x3f4   : > { %6486 = vpush %v871_v47  ;;  %v1077_v47 = vld [vmem:[%s6920_s28 + $0x18] sm:$0xff] }
 0x3f6   : > { %6216 = vmatmul.mubr.msk.f32.gmra.mrb[10].mxu1 %vm939_vm10, %v1076_v46  ;;  %v5970_v46 = vld [vmem:[%s8983_s6 + $0x2] ss:$0 sm:$0xff] }
 0x3f7   : > { %6218 = vmatprep.mubr.msk.f32.mxu1 %vm6571_vm8, %v6572_v8 }
 0x3fa   : > { %6219 = vmatmul.mubr.msk.f32.gmra.mrb[12].mxu1 %vm939_vm10, %v1077_v47 }
 0x3fb   : > { %6221 = vmatprep.mubr.msk.f32.mxu1 %vm6571_vm8, %v6572_v8 }
 0x424   : > { %s6485_s18 = spop %6484 }
 0x425   : > { %v829_v48 = vstv %s6485_s18  ;;  %s6487_s19 = spop %6486 }
 0x426   : > { %6547 = vrcp.f32 %v829_v48  ;;  %v873_v49 = vstv %s6487_s19  ;;  %v1078_v48 = vld [vmem:[%s6920_s28 + $0x20] sm:$0xf] }
 0x427   : > { %v6833_v50 = vsub.f32 %v6770_v20, %v873_v49  ;;  %v6836_v51 = vsub.f32 %v6762_v17, %v873_v49  ;;  %v6839_v52 = vsub.f32 %v6773_v21, %v873_v49  ;;  %v6842_v57 = vsub.f32 %v6776_v23, %v873_v49  ;;  %6222 = vmatmul.mubr.msk.f32.gmra.mrb[14].mxu1 %vm939_vm10, %v1078_v48 }
 0x428   : > { %v780_v49 = vstv %s6822_s0  ;;  %v1025_v33 = vpop.f32.mrb[8].mxu0  ;;  %s6579_s0 = smov 80  }
 0x429   : > { %v878_v58 = vsel %vm855_vm7, %v6833_v50, -inf  ;;  %v879_v59 = vsel %vm855_vm7, %v6836_v51, -inf  ;;  %v880_v60 = vsel %vm855_vm7, %v6839_v52, -inf  ;;  %v881_v20 = vsel %vm859_vm6, %v6842_v57, -inf  ;;  %v6186_v35 = vpop.f32.mrb[9].mxu0 }
 0x42a   : > { %v882_v17 = vmax.f32 %v878_v58, %v879_v59  ;;  %v883_v61 = vmax.f32 %v880_v60, %v881_v20 }
 0x42c   : > { %v884_v62 = vmax.f32 %v882_v17, %v883_v61 }
 0x42e   : > { %885 = vmax.xlane.f32.xlu1 %v884_v62 }
 0x430   : > { %v6548_v21 = vpop.eup %6547 }
 0x431   : > { %v831_v63 = vmul.f32 %v6548_v21, %v809_v22  ;;  %v833_v23 = vmul.f32 %v6548_v21, %v811_v25  ;;  %v832_v0 = vmul.f32 %v6548_v21, %v810_v24  ;;  %v834_v1 = vmul.f32 %v6548_v21, %v812_v26 }
 0x433   : > { %839 = vrot.lane.b32.xlu0 %v831_v63, %s6569_s1 }
 0x437   : > { %843 = vrot.lane.b32.xlu0 %v833_v23, %s6569_s1 }
 0x43f   : > { %841 = vrot.lane.b32.xlu1 %v832_v0, %s6569_s1 }
 0x443   : > { %845 = vrot.lane.b32.xlu1 %v834_v1, %s6569_s1 }
 0x4bb   : > { %v886_v13 = vpop.xlane.xlu1 %885 }
 0x4bc   : > { %v887_v14 = vrot.slane %v886_v13, 4 }
 0x4be   : > { %v888_v19 = vmax.f32 %v886_v13, %v887_v14 }
 0x4c0   : > { %v889_v22 = vrot.slane %v888_v19, 2 }
 0x4c2   : > { %v890_v24 = vmax.f32 %v888_v19, %v889_v22  ;;  %v1227_v19 = vld [vmem:[%s8992_s15] sm:$0xff]  ;;  %v1228_v22 = vld [vmem:[%s8992_s15 + $0x8] sm:$0xff] }
 0x4c4   : > { %v891_v25 = vrot.slane %v890_v24, 1 }
 0x4c6   : > { %v892_v26 = vmax.f32 %v890_v24, %v891_v25  ;;  %v1229_v24 = vld [vmem:[%s8992_s15 + $0x10] sm:$0xff]  ;;  %v1230_v25 = vld [vmem:[%s8992_s15 + $0x18] sm:$0xff] }
 0x4c8   : > { %6488 = vpush %v892_v26  ;;  %v1231_v26 = vld [vmem:[%s8992_s15 + $0x20] sm:$0xf] }
 0x4f9   : > { %s6489_s18 = spop %6488 }
 0x4fa   : > { %v894_v30 = vstv %s6489_s18  ;;  %s6578_s18 = smov 48  }
 0x4fb   : > { %6549 = vrcp.f32 %v894_v30  ;;  %v5953_v30 = vld [vmem:[%s8981_s4] ss:$0 sm:$0xff] }
 0x4fc   : > { %6551 = vrcp.f32 %v780_v49  ;;  %v1026_v34 = vadd.f32 %v5953_v30, %v1025_v33 }
 0x505   : > { %v6550_v39 = vpop.eup %6549 }
 0x506   : > { %v898_v40 = vmul.f32 %v6550_v39, %v6839_v52  ;;  %v896_v41 = vmul.f32 %v6550_v39, %v6833_v50  ;;  %v897_v44 = vmul.f32 %v6550_v39, %v6836_v51  ;;  %v899_v45 = vmul.f32 %v6550_v39, %v6842_v57  ;;  %v6965_v50 = vpop.f32.mrb[0].mxu1  ;;  %v842_v51 = vpop.permute.xlu1 %841 }
 0x507   : > { %v6192_v52 = vpop.f32.mrb[1].mxu1  ;;  %v840_v57 = vpop.permute.xlu0 %839 }
 0x508   : > { %908 = vrot.lane.b32.xlu0 %v898_v40, %s6573_s30  ;;  %904 = vrot.lane.b32.xlu1 %v896_v41, %s6573_s30  ;;  %v6552_v58 = vpop.eup %6551  ;;  %v1040_v27 = vpop.f32.mrb[2].mxu1  ;;  %v1049_v40 = vmax.f32 %v1026_v34, 0.0  ;;  %v5969_v41 = vld [vmem:[%s8983_s6 + $0x1] ss:$0 sm:$0xff] }
 0x509   : > { %v782_v60 = vmul.f32 %v6552_v58, %v6803_v53  ;;  %v783_v62 = vmul.f32 %v6552_v58, %v6806_v54  ;;  %v784_v21 = vmul.f32 %v6552_v58, %v6809_v55  ;;  %v785_v3 = vmul.f32 %v6552_v58, %v6812_v56  ;;  %v6195_v28 = vpop.f32.mrb[3].mxu1 }
 0x50a   : > { %v846_v59 = vpop.permute.xlu1 %845  ;;  %v1045_v29 = vpop.f32.mrb[4].mxu1 }
 0x50b   : > { %v844_v20 = vpop.permute.xlu0 %843  ;;  %v851_v61 = vadd.f32 %v840_v57, %v782_v60  ;;  %v852_v63 = vadd.f32 %v842_v51, %v783_v62  ;;  %v854_v6 = vadd.f32 %v846_v59, %v785_v3  ;;  %v6198_v31 = vpop.f32.mrb[5].mxu1 }
 0x50c   : > { %906 = vrot.lane.b32.xlu1 %v897_v44, %s6573_s30  ;;  %v853_v2 = vadd.f32 %v844_v20, %v784_v21  ;;  %v1173_v36 = vpop.f32.mrb[6].mxu1  ;;  %v1030_v44 = vpop.f32.mrb[10].mxu0 }
 0x50d   : > { %v1174_v38 = vadd.f32 %v5962_v32, %v1173_v36  ;;  %v6211_v39 = vpop.f32.mrb[7].mxu1  ;;  %v1031_v47 = vadd.f32 %v5953_v30, %v1030_v44  ;;  %v6189_v48 = vpop.f32.mrb[11].mxu0 }
 0x50e   : > { %v1178_v51 = vpop.f32.mrb[8].mxu1 }
 0x50f   : > { %v1197_v43 = vmax.f32 %v1174_v38, 0.0  ;;  %v1050_v57 = vmax.f32 %v1031_v47, 0.0  ;;  %v1179_v58 = vadd.f32 %v5962_v32, %v1178_v51  ;;  %v6214_v59 = vpop.f32.mrb[9].mxu1 }
 0x510   : > { %910 = vrot.lane.b32.xlu1 %v899_v45, %s6573_s30  ;;  %v1059_v45 = vmul.f32 %v5960_v37, %v1049_v40 }
 0x511   : > { %v1207_v49 = vmul.f32 %v5969_v41, %v1197_v43  ;;  %v1060_v20 = vmul.f32 %v5960_v37, %v1050_v57 }
 0x512   : > { %v1069_v52 = vadd.f32 %v5961_v42, %v1059_v45 }
 0x513   : > { %v1217_v60 = vadd.f32 %v5970_v46, %v1207_v49  ;;  %v1070_v62 = vadd.f32 %v5961_v42, %v1060_v20 }
 0x57a   : > { %v905_v17 = vpop.permute.xlu1 %904  ;;  %v909_v0 = vpop.permute.xlu0 %908 }
 0x57b   : > { %v916_v23 = vadd.f32 %v905_v17, %v851_v61  ;;  %v918_v9 = vadd.f32 %v909_v0, %v853_v2  ;;  %v1198_v17 = vmax.f32 %v1179_v58, 0.0  ;;  %v7028_v61 = vadd.f32 %v1217_v60, %v1069_v52  ;;  %v1372_v60 = vld [vmem:[%s8990_s13] sm:$0xff] }
 0x57c   : > { %6257 = vmatprep.mubr.msk.f32.mxu1 %vm939_vm10, %v1372_v60 }
 0x57d   : > { %v920_v7 = vmul.f32 0.33333334, %v916_v23  ;;  %v922_v14 = vmul.f32 0.33333334, %v918_v9  ;;  %v1208_v21 = vmul.f32 %v5969_v41, %v1198_v17  ;;  %v1036_v9 = vadd.f32 %v5953_v30, %v6965_v50 }
 0x57e   : > { %v907_v1 = vpop.permute.xlu1 %906 }
 0x57f   : > { %v917_v4 = vadd.f32 %v907_v1, %v852_v63  ;;  %v6575_v63 = vmov 0   ;;  %v1218_v23 = vadd.f32 %v5970_v46, %v1208_v21  ;;  %v1183_v1 = vpop.f32.mrb[10].mxu1 }
 0x580   : > { %6525 = vset.pattern.permute.xlu0 %v6575_v63  ;;  %6526 = vset.pattern.permute.xlu1 %v6575_v63  ;;  %v6217_v2 = vpop.f32.mrb[11].mxu1 }
 0x581   : > { %v921_v10 = vmul.f32 0.33333334, %v917_v4  ;;  %v7030_v0 = vadd.f32 %v1218_v23, %v1070_v62  ;;  %v1188_v3 = vpop.f32.mrb[12].mxu1 }
 0x582   : > { %v911_v53 = vpop.permute.xlu1 %910  ;;  %v6220_v4 = vpop.f32.mrb[13].mxu1 }
 0x583   : > { %v6360_v12 = vpack.c.bf16 %v921_v10, %v920_v7  ;;  %v919_v13 = vadd.f32 %v911_v53, %v854_v6  ;;  %v1193_v6 = vpop.f32.mrb[14].mxu1  ;;  %v1184_v10 = vadd.f32 %v5962_v32, %v1183_v1  ;;  %v1051_v53 = vmax.f32 %v1036_v9, 0.0  ;;  %v1373_v9 = vld [vmem:[%s8990_s13 + $0x8] sm:$0xff] }
 0x584   : > { %v6223_v7 = vpop.f32.mrb[15].mxu1 }
 0x585   : > { %v923_v54 = vmul.f32 0.33333334, %v919_v13  ;;  %6361 = vmatpush3.bf16.msra.mxu0 %v6360_v12  ;;  %v1041_v12 = vadd.f32 %v5953_v30, %v1040_v27  ;;  %v1199_v13 = vmax.f32 %v1184_v10, 0.0  ;;  %v1677_v7 = vld [vmem:[%s8984_s7 + $0x8] sm:$0xff] }
 0x586   : > { %6362 = vmatprep.subr.bf16.mxu0 %v6570_v5 }
 0x587   : > { %v6363_v56 = vpack.c.bf16 %v923_v54, %v922_v14  ;;  %v1189_v14 = vadd.f32 %v5962_v32, %v1188_v3  ;;  %v1061_v54 = vmul.f32 %v5960_v37, %v1051_v53  ;;  %v1374_v53 = vld [vmem:[%s8990_s13 + $0x10] sm:$0xff] }
 0x589   : > { %6365 = vmatpush3.bf16.msk.msra.mxu0 %vm6973_vm13, %v6363_v56  ;;  %v1052_v56 = vmax.f32 %v1041_v12, 0.0  ;;  %v1375_v12 = vld [vmem:[%s8990_s13 + $0x18] sm:$0x1] }
 0x58a   : > { %6377 = vmatprep.subr.bf16.mxu0 %v6570_v5 }
 0x58b   : > { %v1062_v28 = vmul.f32 %v5960_v37, %v1052_v56 }
 0x58c   : > { %6233 = vmatmul.mubr.msk.f32.vlgmr.msra.gmra.mrb[12].mxu0 %vm1232_vm14, %v1227_v19  ;;  %v1046_v19 = vadd.f32 %v5953_v30, %v1045_v29 }
 0x58d   : > { %6235 = vmatprep.mubr.msk.f32.mxu0 %vm6571_vm8, %v6572_v8  ;;  %v1072_v36 = vadd.f32 %v5961_v42, %v1062_v28 }
 0x58e   : > { %v1053_v31 = vmax.f32 %v1046_v19, 0.0 }
 0x590   : > { %6236 = vmatmul.mubr.msk.f32.gmra.mrb[14].mxu0 %vm1232_vm14, %v1228_v22  ;;  %v1209_v22 = vmul.f32 %v5969_v41, %v1199_v13  ;;  %v1063_v38 = vmul.f32 %v5960_v37, %v1053_v31 }
 0x591   : > { %6238 = vmatprep.mubr.msk.f32.mxu0 %vm6571_vm8, %v6572_v8 }
 0x592   : > { %v1219_v33 = vadd.f32 %v5970_v46, %v1209_v22  ;;  %v1073_v27 = vadd.f32 %v5961_v42, %v1063_v38 }
 0x594   : > { %6239 = vmatmul.mubr.msk.f32.gmra.mrb[16].mxu0 %vm1232_vm14, %v1229_v24  ;;  %v1200_v24 = vmax.f32 %v1189_v14, 0.0 }
 0x595   : > { %6241 = vmatprep.mubr.msk.f32.mxu0 %vm6571_vm8, %v6572_v8 }
 0x596   : > { %v1210_v34 = vmul.f32 %v5969_v41, %v1200_v24 }
 0x598   : > { %6242 = vmatmul.mubr.msk.f32.gmra.mrb[18].mxu0 %vm1232_vm14, %v1230_v25  ;;  %v1194_v25 = vadd.f32 %v5962_v32, %v1193_v6  ;;  %v1220_v50 = vadd.f32 %v5970_v46, %v1210_v34 }
 0x599   : > { %6244 = vmatprep.mubr.msk.f32.mxu0 %vm6571_vm8, %v6572_v8 }
 0x59a   : > { %v1201_v35 = vmax.f32 %v1194_v25, 0.0  ;;  %v1225_v44 = vadd.f32 %v1220_v50, %v1072_v36 }
 0x59c   : > { %6245 = vmatmul.mubr.msk.f32.gmra.mrb[20].mxu0 %vm1232_vm14, %v1231_v26  ;;  %v1071_v26 = vadd.f32 %v5961_v42, %v1061_v54  ;;  %v1211_v39 = vmul.f32 %v5969_v41, %v1201_v35 }
 0x59d   : > { %6290 = vmatprep.mubr.msk.f32.mxu0 %vm6571_vm8, %v6572_v8 }
 0x59e   : > { %v1224_v40 = vadd.f32 %v1219_v33, %v1071_v26  ;;  %v1221_v43 = vadd.f32 %v5970_v46, %v1211_v39 }
 0x5a0   : > { %v1226_v45 = vadd.f32 %v1221_v43, %v1073_v27 }
 0x65f   : > { %v1318_v47 = vpop.f32.mrb[12].mxu0 }
 0x660   : > { %v1319_v29 = vadd.f32 1.0, %v1318_v47  ;;  %v6234_v30 = vpop.f32.mrb[13].mxu0 }
 0x662   : > { %1344 = vperm.xlu0 %6525, %v1319_v29  }
 0x663   : > { %v1323_v32 = vpop.f32.mrb[14].mxu0 }
 0x664   : > { %v1324_v48 = vadd.f32 1.0, %v1323_v32  ;;  %v6237_v49 = vpop.f32.mrb[15].mxu0 }
 0x666   : > { %1349 = vperm.xlu1 %6526, %v1324_v48  }
 0x667   : > { %v1328_v51 = vpop.f32.mrb[16].mxu0 }
 0x668   : > { %v1329_v52 = vadd.f32 1.0, %v1328_v51  ;;  %v6240_v57 = vpop.f32.mrb[17].mxu0 }
 0x66a   : > { %1354 = vperm.xlu1 %6526, %v1329_v52  }
 0x66b   : > { %v1333_v37 = vpop.f32.mrb[18].mxu0 }
 0x66c   : > { %v1334_v58 = vadd.f32 1.0, %v1333_v37  ;;  %v6243_v41 = vpop.f32.mrb[19].mxu0 }
 0x66e   : > { %1359 = vperm.xlu0 %6525, %v1334_v58  }
 0x66f   : > { %v1338_v42 = vpop.f32.mrb[20].mxu0 }
 0x670   : > { %v1339_v46 = vadd.f32 1.0, %v1338_v42  ;;  %v6246_v59 = vpop.f32.mrb[21].mxu0 }
 0x672   : > { %1364 = vperm.xlu1 %6526, %v1339_v46  }
 0x6e1   : > { %v1345_v20 = vpop.permute.xlu0 %1344 }
 0x6e2   : > { %v7054_v62 = vmul.f32 %v1345_v20, %v7028_v61 }
 0x6e5   : > { %v1350_v17 = vpop.permute.xlu1 %1349 }
 0x6e6   : > { %v7057_v21 = vmul.f32 %v1350_v17, %v7030_v0  ;;  %v1676_v0 = vld [vmem:[%s8984_s7] sm:$0xff] }
 0x6e7   : > { %v6375_v10 = vpack.c.bf16 %v1677_v7, %v1676_v0 }
 0x6e8   : > { %v6366_v63 = vpack.c.bf16 %v7057_v21, %v7054_v62 }
 0x6e9   : > { %v1355_v23 = vpop.permute.xlu1 %1354 }
 0x6ea   : > { %6367 = vmatprep.subr.bf16.mxu1 %v6366_v63  ;;  %v7061_v2 = vmul.f32 %v1355_v23, %v1224_v40 }
 0x6eb   : > { %6369 = vmatpush3.bf16.msra.mxu1 %v6366_v63 }
 0x6ed   : > { %v1360_v1 = vpop.permute.xlu0 %1359 }
 0x6ee   : > { %v7063_v3 = vmul.f32 %v1360_v1, %v1225_v44 }
 0x6f0   : > { %v6370_v4 = vpack.c.bf16 %v7063_v3, %v7061_v2 }
 0x6f1   : > { %v1365_v6 = vpop.permute.xlu1 %1364 }
 0x6f2   : > { %v7067_v61 = vmul.f32 %v1365_v6, %v1226_v45  ;;  %6371 = vmatprep.subr.bf16.mxu1 %v6370_v4 }
 0x6f3   : > { %6373 = vmatpush3.bf16.msra.mxu1 %v6370_v4 }
 0x6f4   : > { %6255 = vmatprep.subr.msk.mxu1 %vm8996_vm9, %v7067_v61 }
 0x6f7   : > { %6256 = vmatpush3.msk.msra.mxu1 %vm8996_vm9, %v7067_v61  ;;  %vm2716_vm9 = vcmask 519552  }
 0x6f8   : > { %6258 = vmatmul.mubr.msk.f32.vlgmr.msra.gmra.mrb[16].mxu1 %vm939_vm10, %v1373_v9  ;;  %6374 = vmatprep.subr.bf16.mxu1 %v6570_v5 }
 0x6f9   : > { %6260 = vmatprep.mubr.msk.f32.mxu1 %vm939_vm10, %v1374_v53  ;;  %6376 = vmatpush3.bf16.msra.mxu1 %v6375_v10 }
 0x6fa   : > { %6384 = vmatprep.subr.bf16.mxu1 %v6570_v5 }
 0x6fc   : > { %6261 = vmatmul.mubr.msk.f32.gmra.mrb[18].mxu1 %vm939_vm10, %v1375_v12  ;;  %vm2514_vm10 = vcmask 261248  }
 0x6fd   : > { %6267 = vmatprep.mubr.msk.f32.mxu1 %vm6571_vm8, %v6572_v8 }
 0x700   : > { %6268 = vmatmul.mubr.msk.f32.vlgmr.msra.gmra.mrb[20].mxu1 %vm1476_vm15, %v7054_v62 }
 0x701   : > { %6270 = vmatprep.mubr.msk.f32.mxu1 %vm6571_vm8, %v6572_v8 }
 0x704   : > { %6271 = vmatmul.mubr.msk.f32.gmra.mrb[22].mxu1 %vm1476_vm15, %v7057_v21 }
 0x705   : > { %6273 = vmatprep.mubr.msk.f32.mxu1 %vm6571_vm8, %v6572_v8 }
 0x708   : > { %6274 = vmatmul.mubr.msk.f32.gmra.mrb[24].mxu1 %vm1476_vm15, %v7061_v2 }
 0x709   : > { %6276 = vmatprep.mubr.msk.f32.mxu1 %vm6571_vm8, %v6572_v8 }
 0x70c   : > { %6277 = vmatmul.mubr.msk.f32.gmra.mrb[26].mxu1 %vm1476_vm15, %v7063_v3 }
 0x70d   : > { %6279 = vmatprep.mubr.msk.f32.mxu1 %vm6571_vm8, %v6572_v8 }
 0x710   : > { %6280 = vmatmul.mubr.msk.f32.gmra.mrb[28].mxu1 %vm1476_vm15, %v7067_v61 }
 0x7cb   : > { %v6259_v13 = vpop.f32.mrb[16].mxu1 }
 0x7cc   : > { %v1457_v14 = vpop.f32.mrb[17].mxu1  ;;  %v1480_v54 = vsel %vm1476_vm15, %v6259_v13, 0.0 }
 0x7cd   : > { %1481 = vadd.xlane.f32.xlu1 %v1480_v54  ;;  %v1477_v56 = vsel %vm1476_vm15, %v1457_v14, 0.0 }
 0x7ce   : > { %1478 = vadd.xlane.f32.xlu0 %v1477_v56 }
 0x7cf   : > { %v6262_v19 = vpop.f32.mrb[18].mxu1 }
 0x7d0   : > { %v1467_v22 = vpop.f32.mrb[19].mxu1  ;;  %v1487_v28 = vsel %vm8995_vm0, %v6262_v19, 0.0  ;;  %vm2617_vm0 = vcmask 388352  }
 0x7d1   : > { %v1483_v24 = vsel %vm1476_vm15, %v1467_v22, 0.0 }
 0x7d2   : > { %1484 = vadd.xlane.f32.xlu0 %v1483_v24 }
 0x7d3   : > { %v7116_v25 = vpop.f32.mrb[20].mxu1 }
 0x7d4   : > { %v6269_v26 = vpop.f32.mrb[21].mxu1 }
 0x7d6   : > { %1488 = vadd.xlane.f32.xlu0 %v1487_v28 }
 0x7d7   : > { %v7119_v31 = vpop.f32.mrb[22].mxu1 }
 0x7d8   : > { %v6272_v33 = vpop.f32.mrb[23].mxu1 }
 0x7db   : > { %v7121_v34 = vpop.f32.mrb[24].mxu1 }
 0x7dc   : > { %v6275_v35 = vpop.f32.mrb[25].mxu1 }
 0x7df   : > { %v7123_v36 = vpop.f32.mrb[26].mxu1 }
 0x7e0   : > { %v6278_v38 = vpop.f32.mrb[27].mxu1 }
 0x7e3   : > { %v7125_v50 = vpop.f32.mrb[28].mxu1 }
 0x7e4   : > { %v6281_v39 = vpop.f32.mrb[29].mxu1 }
 0x85a   : > { %v1482_v40 = vpop.xlane.xlu1 %1481 }
 0x85b   : > { %v1479_v27 = vpop.xlane.xlu0 %1478  ;;  %v1492_v43 = vmul.f32 0.0625, %v1482_v40 }
 0x85c   : > { %v1491_v44 = vmul.f32 0.0625, %v1479_v27 }
 0x85d   : > { %v7128_v29 = vmul.f32 %v1492_v43, %v6749_v11 }
 0x85e   : > { %v7131_v30 = vmul.f32 %v1491_v44, %v6754_v15 }
 0x85f   : > { %v1485_v45 = vpop.xlane.xlu0 %1484  ;;  %v1500_v57 = vsel %vm741_vm2, %v7128_v29, inf  ;;  %v1547_v41 = vsel %vm790_vm5, %v7128_v29, inf  ;;  %v1610_v63 = vsel %vm855_vm7, %v7128_v29, inf }
 0x860   : > { %v1493_v47 = vmul.f32 0.0625, %v1485_v45  ;;  %v1499_v52 = vsel %vm741_vm2, %v7131_v30, inf  ;;  %v1609_v17 = vsel %vm855_vm7, %v7131_v30, inf }
 0x861   : > { %v1503_v37 = vmin.f32 %v1499_v52, %v1500_v57  ;;  %v1613_v6 = vmin.f32 %v1609_v17, %v1610_v63 }
 0x862   : > { %v7134_v48 = vmul.f32 %v1493_v47, %v6759_v16 }
 0x863   : > { %v1489_v32 = vpop.xlane.xlu0 %1488 }
 0x864   : > { %v1494_v49 = vmul.f32 0.0625, %v1489_v32  ;;  %v1501_v11 = vsel %vm741_vm2, %v7134_v48, inf  ;;  %v1548_v42 = vsel %vm790_vm5, %v7134_v48, inf  ;;  %v1611_v23 = vsel %vm855_vm7, %v7134_v48, inf }
 0x866   : > { %v7137_v51 = vmul.f32 %v1494_v49, %v6767_v18  ;;  %v1546_v18 = vsel %vm790_vm5, %v7131_v30, inf }
 0x867   : > { %v1550_v20 = vmin.f32 %v1546_v18, %v1547_v41 }
 0x868   : > { %v1502_v15 = vsel %vm745_vm3, %v7137_v51, inf  ;;  %v1549_v16 = vsel %vm794_vm4, %v7137_v51, inf  ;;  %v1612_v60 = vsel %vm859_vm6, %v7137_v51, inf }
 0x869   : > { %v1504_v58 = vmin.f32 %v1501_v11, %v1502_v15  ;;  %v1551_v59 = vmin.f32 %v1548_v42, %v1549_v16  ;;  %v1614_v4 = vmin.f32 %v1611_v23, %v1612_v60 }
 0x86b   : > { %v1505_v46 = vmin.f32 %v1503_v37, %v1504_v58  ;;  %v1552_v1 = vmin.f32 %v1550_v20, %v1551_v59  ;;  %v1615_v0 = vmin.f32 %v1613_v6, %v1614_v4 }
 0x86d   : > { %1506 = vmin.xlane.f32.xlu0 %v1505_v46 }
 0x871   : > { %1553 = vmin.xlane.f32.xlu0 %v1552_v1 }
 0x875   : > { %1616 = vmin.xlane.f32.xlu0 %v1615_v0 }
 0x8fa   : > { %v1507_v7 = vpop.xlane.xlu0 %1506 }
 0x8fb   : > { %v1508_v9 = vrot.slane %v1507_v7, 4 }
 0x8fd   : > { %v1509_v10 = vmin.f32 %v1507_v7, %v1508_v9 }
 0x8fe   : > { %v1554_v27 = vpop.xlane.xlu0 %1553 }
 0x8ff   : > { %v1510_v53 = vrot.slane %v1509_v10, 2  ;;  %v1555_v43 = vrot.slane %v1554_v27, 4 }
 0x901   : > { %v1511_v12 = vmin.f32 %v1509_v10, %v1510_v53  ;;  %v1556_v44 = vmin.f32 %v1554_v27, %v1555_v43 }
 0x902   : > { %v1617_v6 = vpop.xlane.xlu0 %1616 }
 0x903   : > { %v1512_v13 = vrot.slane %v1511_v12, 1  ;;  %v1557_v47 = vrot.slane %v1556_v44, 2  ;;  %v1618_v0 = vrot.slane %v1617_v6, 4 }
 0x905   : > { %v1513_v14 = vmin.f32 %v1511_v12, %v1512_v13  ;;  %v1558_v52 = vmin.f32 %v1556_v44, %v1557_v47  ;;  %v1619_v7 = vmin.f32 %v1617_v6, %v1618_v0 }
 0x907   : > { %6490 = vpush %v1513_v14  ;;  %v1559_v15 = vrot.slane %v1558_v52, 1  ;;  %v1620_v10 = vrot.slane %v1619_v7, 2 }
 0x909   : > { %v1560_v58 = vmin.f32 %v1558_v52, %v1559_v15  ;;  %v1621_v13 = vmin.f32 %v1619_v7, %v1620_v10 }
 0x938   : > { %s6491_s21 = spop %6490 }
 0x939   : > { %v1515_v54 = vstv %s6491_s21  ;;  %s6580_s21 = smov 96  }
 0x93a   : > { %v7164_v56 = vsub.f32 %v7131_v30, %v1515_v54  ;;  %v7167_v19 = vsub.f32 %v7128_v29, %v1515_v54  ;;  %v7170_v22 = vsub.f32 %v7134_v48, %v1515_v54  ;;  %v7173_v24 = vsub.f32 %v7137_v51, %v1515_v54 }
 0x93c   : > { %v1520_v26 = vsel %vm741_vm2, %v7164_v56, -inf  ;;  %v1521_v28 = vsel %vm741_vm2, %v7167_v19, -inf  ;;  %v1522_v33 = vsel %vm741_vm2, %v7170_v22, -inf  ;;  %v1523_v35 = vsel %vm745_vm3, %v7173_v24, -inf  ;;  %vm2358_vm2 = vmor %vm8997_vm11, %vm2357_vm1 }
 0x93d   : > { %v1524_v38 = vmax.f32 %v1520_v26, %v1521_v28  ;;  %v1525_v39 = vmax.f32 %v1522_v33, %v1523_v35  ;;  %v1622_v26 = vrot.slane %v1621_v13, 1  ;;  %vm2359_vm3 = vcmask 1044484  }
 0x93e   : > { %vm2820_vm1 = vcmask 654848   ;;  %vm9000_vm11 = vcmask 650752  }
 0x93f   : > { %v1526_v40 = vmax.f32 %v1524_v38, %v1525_v39  ;;  %v1623_v35 = vmin.f32 %v1621_v13, %v1622_v26 }
 0x941   : > { %1527 = vmax.xlane.f32.xlu1 %v1526_v40 }
 0x9ce   : > { %v1528_v45 = vpop.xlane.xlu1 %1527 }
 0x9cf   : > { %v1529_v32 = vrot.slane %v1528_v45, 4 }
 0x9d1   : > { %v1530_v49 = vmax.f32 %v1528_v45, %v1529_v32 }
 0x9d3   : > { %v1531_v57 = vrot.slane %v1530_v49, 2 }
 0x9d5   : > { %v1532_v11 = vmax.f32 %v1530_v49, %v1531_v57 }
 0x9d7   : > { %v1533_v16 = vrot.slane %v1532_v11, 1 }
 0x9d9   : > { %v1534_v37 = vmax.f32 %v1532_v11, %v1533_v16 }
 0x9db   : > { %6492 = vpush %v1534_v37 }
 0x9dc   : > { %6494 = vpush %v1560_v58 }
 0xa0c   : > { %s7183_s19 = spop %6492 }
 0xa0d   : > { %s6495_s20 = spop %6494 }
 0xa0e   : > { %v1562_v18 = vstv %s6495_s20  ;;  %s6582_s20 = smov 64  }
 0xa0f   : > { %v1563_v41 = vsub.f32 %v7131_v30, %v1562_v18  ;;  %v1564_v42 = vsub.f32 %v7128_v29, %v1562_v18  ;;  %v1565_v46 = vsub.f32 %v7134_v48, %v1562_v18  ;;  %v1566_v59 = vsub.f32 %v7137_v51, %v1562_v18 }
 0xa11   : > { %v1567_v60 = vsel %vm790_vm5, %v1563_v41, -inf  ;;  %v1568_v20 = vsel %vm790_vm5, %v1564_v42, -inf  ;;  %v1569_v17 = vsel %vm790_vm5, %v1565_v46, -inf  ;;  %v1570_v63 = vsel %vm794_vm4, %v1566_v59, -inf  ;;  %vm2360_vm5 = vmor %vm2358_vm2, %vm2359_vm3 }
 0xa12   : > { %v1571_v23 = vmax.f32 %v1567_v60, %v1568_v20  ;;  %v1572_v1 = vmax.f32 %v1569_v17, %v1570_v63  ;;  %vm2361_vm4 = vcmask 1046534   ;;  %vm2894_vm2 = vcmask 786048  }
 0xa13   : > { %vm2961_vm3 = vcmask 917248  }
 0xa14   : > { %v1573_v4 = vmax.f32 %v1571_v23, %v1572_v1  ;;  %v1536_v1 = vstv %s7183_s19  ;;  %s6581_s19 = smov 16  }
 0xa16   : > { %1574 = vmax.xlane.f32.xlu1 %v1573_v4 }
 0xaa3   : > { %v1575_v9 = vpop.xlane.xlu1 %1574 }
 0xaa4   : > { %v1576_v53 = vrot.slane %v1575_v9, 4 }
 0xaa6   : > { %v1577_v12 = vmax.f32 %v1575_v9, %v1576_v53 }
 0xaa8   : > { %v1578_v14 = vrot.slane %v1577_v12, 2 }
 0xaaa   : > { %v1579_v54 = vmax.f32 %v1577_v12, %v1578_v14 }
 0xaac   : > { %v1580_v28 = vrot.slane %v1579_v54, 1 }
 0xaae   : > { %v1581_v33 = vmax.f32 %v1579_v54, %v1580_v28 }
 0xab0   : > { %6496 = vpush %v1581_v33 }
 0xab1   : > { %6498 = vpush %v1623_v35 }
 0xae1   : > { %s6497_s22 = spop %6496 }
 0xae2   : > { %v1583_v38 = vstv %s6497_s22  ;;  %s6499_s23 = spop %6498  ;;  %s6583_s22 = smov 112  }
 0xae3   : > { %6553 = vrcp.f32 %v1583_v38  ;;  %v1625_v39 = vstv %s6499_s23 }
 0xae4   : > { %v1626_v40 = vsub.f32 %v7131_v30, %v1625_v39  ;;  %v1627_v27 = vsub.f32 %v7128_v29, %v1625_v39  ;;  %v1628_v43 = vsub.f32 %v7134_v48, %v1625_v39  ;;  %v1629_v44 = vsub.f32 %v7137_v51, %v1625_v39 }
 0xae6   : > { %v1630_v45 = vsel %vm855_vm7, %v1626_v40, -inf  ;;  %v1631_v47 = vsel %vm855_vm7, %v1627_v27, -inf  ;;  %v1632_v32 = vsel %vm855_vm7, %v1628_v43, -inf  ;;  %v1633_v49 = vsel %vm859_vm6, %v1629_v44, -inf  ;;  %vm7300_vm7 = vmor %vm2360_vm5, %vm2361_vm4 }
 0xae7   : > { %v1634_v52 = vmax.f32 %v1630_v45, %v1631_v47  ;;  %v1635_v57 = vmax.f32 %v1632_v32, %v1633_v49  ;;  %vm9001_vm6 = vcmask 128000   ;;  %vm3022_vm4 = vcmask 1048448  }
 0xae8   : > { %vm8998_vm5 = vcmask 257152  }
 0xae9   : > { %v1636_v11 = vmax.f32 %v1634_v52, %v1635_v57  ;;  %v1809_v52 = vld [vmem:[%s8993_s16 + $0x10] sm:$0xff]  ;;  %v1810_v57 = vld [vmem:[%s8993_s16 + $0x18] sm:$0xff] }
 0xaeb   : > { %1637 = vmax.xlane.f32.xlu1 %v1636_v11  ;;  %v1811_v11 = vld [vmem:[%s8993_s16 + $0x20] sm:$0xf] }
 0xaed   : > { %v6554_v15 = vpop.eup %6553 }
 0xaee   : > { %v1585_v30 = vmul.f32 %v6554_v15, %v1563_v41  ;;  %v1587_v29 = vmul.f32 %v6554_v15, %v1565_v46  ;;  %v1586_v48 = vmul.f32 %v6554_v15, %v1564_v42  ;;  %v1588_v51 = vmul.f32 %v6554_v15, %v1566_v59 }
 0xaf0   : > { %1593 = vrot.lane.b32.xlu0 %v1585_v30, %s6569_s1 }
 0xaf4   : > { %1597 = vrot.lane.b32.xlu0 %v1587_v29, %s6569_s1 }
 0xafc   : > { %1595 = vrot.lane.b32.xlu1 %v1586_v48, %s6569_s1 }
 0xb00   : > { %1599 = vrot.lane.b32.xlu1 %v1588_v51, %s6569_s1 }
 0xb62   : > { %v1594_v6 = vpop.permute.xlu0 %1593 }
 0xb66   : > { %v1598_v10 = vpop.permute.xlu0 %1597 }
 0xb78   : > { %v1638_v16 = vpop.xlane.xlu1 %1637 }
 0xb79   : > { %v1639_v37 = vrot.slane %v1638_v16, 4 }
 0xb7b   : > { %v1640_v58 = vmax.f32 %v1638_v16, %v1639_v37 }
 0xb7c   : > { %v1596_v4 = vpop.permute.xlu1 %1595 }
 0xb7d   : > { %v1641_v18 = vrot.slane %v1640_v58, 2 }
 0xb7f   : > { %v1642_v60 = vmax.f32 %v1640_v58, %v1641_v18 }
 0xb80   : > { %v1600_v7 = vpop.permute.xlu1 %1599 }
 0xb81   : > { %v1643_v20 = vrot.slane %v1642_v60, 1 }
 0xb83   : > { %v1644_v17 = vmax.f32 %v1642_v60, %v1643_v20 }
 0xb85   : > { %6500 = vpush %v1644_v17 }
 0xbb6   : > { %s6501_s26 = spop %6500 }
 0xbb7   : > { %v1646_v41 = vstv %s6501_s26 }
 0xbb8   : > { %6555 = vrcp.f32 %v1646_v41 }
 0xbb9   : > { %6557 = vrcp.f32 %v1536_v1  ;;  %v6576_v1 = vmov 1983009808  }
 0xbc2   : > { %v6556_v46 = vpop.eup %6555 }
 0xbc3   : > { %v1650_v63 = vmul.f32 %v6556_v46, %v1628_v43  ;;  %v1648_v42 = vmul.f32 %v6556_v46, %v1626_v40  ;;  %v1649_v59 = vmul.f32 %v6556_v46, %v1627_v27  ;;  %v1651_v23 = vmul.f32 %v6556_v46, %v1629_v44  ;;  %v6558_v0 = vpop.eup %6557 }
 0xbc4   : > { %v1538_v9 = vmul.f32 %v6558_v0, %v7164_v56  ;;  %v1539_v13 = vmul.f32 %v6558_v0, %v7167_v19  ;;  %v1540_v14 = vmul.f32 %v6558_v0, %v7170_v22  ;;  %v1541_v38 = vmul.f32 %v6558_v0, %v7173_v24  ;;  %v1807_v22 = vld [vmem:[%s8993_s16] sm:$0xff]  ;;  %v1808_v24 = vld [vmem:[%s8993_s16 + $0x8] sm:$0xff] }
 0xbc5   : > { %1660 = vrot.lane.b32.xlu0 %v1650_v63, %s6573_s30  ;;  %1656 = vrot.lane.b32.xlu1 %v1648_v42, %s6573_s30  ;;  %v3069_v63 = vld [vmem:[%s8986_s9] sm:$0xff]  ;;  %v3070_v42 = vld [vmem:[%s8986_s9 + $0x8] sm:$0xff] }
 0xbc6   : > { %v1605_v12 = vadd.f32 %v1594_v6, %v1538_v9  ;;  %v1606_v54 = vadd.f32 %v1596_v4, %v1539_v13  ;;  %v1607_v35 = vadd.f32 %v1598_v10, %v1540_v14  ;;  %v1608_v40 = vadd.f32 %v1600_v7, %v1541_v38  ;;  %v5988_v7 = vld [vmem:[%s8985_s8 + $0x1] ss:$0 sm:$0xff] }
 0xbc7   : > { %v1970_v4 = vunpack.c.l.s4 %v6576_v1  ;;  %v1972_v6 = vlaneseq  ;;  %v2154_v13 = vld [vmem:[#allocation2] sm:$0xff] }
 0xbc9   : > { %1658 = vrot.lane.b32.xlu1 %v1649_v59, %s6573_s30  ;;  %v6385_v59 = vpack.c.bf16 %v3070_v42, %v3069_v63  ;;  %v1971_v9 = vunpack.c.0.s8 %v1970_v4  ;;  %v1973_v10 = vshrl.u32 %v1972_v6, 7 }
 0xbcb   : > { %6386 = vmatpush1.bf16.msra.mxu1 %v6385_v59  ;;  %v7261_v14 = vsub.s32 %v1971_v9, %v1973_v10 }
 0xbcc   : > { %6387 = vmatprep.subr.bf16.mxu1 %v6570_v5 }
 0xbcd   : > { %1662 = vrot.lane.b32.xlu1 %v1651_v23, %s6573_s30  ;;  %v5987_v23 = vld [vmem:[%s8985_s8] ss:$0 sm:$0xff] }
 0xbce   : > { %v1787_v0 = vmul.f32 %v5987_v23, %v7116_v25  ;;  %v1790_v25 = vmul.f32 %v5987_v23, %v7123_v36 }
 0xc37   : > { %v1657_v53 = vpop.permute.xlu1 %1656  ;;  %v1661_v28 = vpop.permute.xlu0 %1660 }
 0xc38   : > { %v1668_v26 = vadd.f32 %v1657_v53, %v1605_v12  ;;  %v1670_v43 = vadd.f32 %v1661_v28, %v1607_v35  ;;  %v1797_v53 = vadd.f32 %v5988_v7, %v1787_v0  ;;  %v1788_v12 = vmul.f32 %v5987_v23, %v7119_v31 }
 0xc39   : > { %v7264_v28 = vrot.slane %v2154_v13, %v7261_v14  ;;  %v1791_v35 = vmul.f32 %v5987_v23, %v7125_v50 }
 0xc3a   : > { %v1672_v27 = vmul.f32 0.33333334, %v1668_v26  ;;  %v1674_v32 = vmul.f32 0.33333334, %v1670_v43  ;;  %v1798_v26 = vadd.f32 %v5988_v7, %v1788_v12 }
 0xc3b   : > { %v1659_v33 = vpop.permute.xlu1 %1658  ;;  %v7274_v43 = vcombine.high %v7264_v28, %v7264_v28 }
 0xc3c   : > { %v1669_v39 = vadd.f32 %v1659_v33, %v1606_v54  ;;  %v1802_v54 = vmax.f32 %v1797_v53, 0.0  ;;  %v1789_v33 = vmul.f32 %v5987_v23, %v7121_v34 }
 0xc3e   : > { %v1673_v44 = vmul.f32 0.33333334, %v1669_v39 }
 0xc3f   : > { %v1663_v56 = vpop.permute.xlu1 %1662 }
 0xc40   : > { %v6378_v45 = vpack.c.bf16 %v1673_v44, %v1672_v27  ;;  %v1671_v47 = vadd.f32 %v1663_v56, %v1608_v40  ;;  %v2168_v40 = vcombine.high %v2154_v13, %v2154_v13  ;;  %v1803_v27 = vmax.f32 %v1798_v26, 0.0 }
 0xc41   : > { %v1799_v44 = vadd.f32 %v5988_v7, %v1789_v33  ;;  %v1800_v56 = vadd.f32 %v5988_v7, %v1790_v25 }
 0xc42   : > { %v1675_v49 = vmul.f32 0.33333334, %v1671_v47  ;;  %6379 = vmatpush3.bf16.msra.mxu0 %v6378_v45  ;;  %v1801_v45 = vadd.f32 %v5988_v7, %v1791_v35 }
 0xc43   : > { %6380 = vmatprep.subr.bf16.mxu0 %v6570_v5 }
 0xc44   : > { %v6381_v19 = vpack.c.bf16 %v1675_v49, %v1674_v32 }
 0xc46   : > { %6383 = vmatpush3.bf16.msk.msra.mxu0 %vm6973_vm13, %v6381_v19 }
 0xc47   : > { %6411 = vmatprep.subr.bf16.mxu0 %v6570_v5 }
 0xc49   : > { %6291 = vmatmul.mubr.msk.f32.vlgmr.msra.gmra.mrb[22].mxu0 %vm1232_vm14, %v1807_v22  ;;  %v2365_v22 = vrot.slane %v7274_v43, 7 }
 0xc4a   : > { %6293 = vmatprep.mubr.msk.f32.mxu0 %vm6571_vm8, %v6572_v8 }
 0xc4d   : > { %6294 = vmatmul.mubr.msk.f32.gmra.mrb[24].mxu0 %vm1232_vm14, %v1808_v24  ;;  %v1804_v24 = vmax.f32 %v1799_v44, 0.0 }
 0xc4e   : > { %6296 = vmatprep.mubr.msk.f32.mxu0 %vm6571_vm8, %v6572_v8 }
 0xc51   : > { %6297 = vmatmul.mubr.msk.f32.gmra.mrb[26].mxu0 %vm1232_vm14, %v1809_v52  ;;  %v1805_v52 = vmax.f32 %v1800_v56, 0.0 }
 0xc52   : > { %6299 = vmatprep.mubr.msk.f32.mxu0 %vm6571_vm8, %v6572_v8 }
 0xc55   : > { %6300 = vmatmul.mubr.msk.f32.gmra.mrb[28].mxu0 %vm1232_vm14, %v1810_v57  ;;  %v1806_v57 = vmax.f32 %v1801_v45, 0.0 }
 0xc56   : > { %6302 = vmatprep.mubr.msk.f32.mxu0 %vm6571_vm8, %v6572_v8  ;;  %vm9002_vm8 = vcmask 125952  }
 0xc59   : > { %6303 = vmatmul.mubr.msk.f32.gmra.mrb[30].mxu0 %vm1232_vm14, %v1811_v11  ;;  %vm8999_vm14 = vcmask 523648  }
 0xd1c   : > { %v1896_v15 = vpop.f32.mrb[22].mxu0 }
 0xd1d   : > { %v1897_v30 = vadd.f32 1.0, %v1896_v15  ;;  %v6292_v29 = vpop.f32.mrb[23].mxu0 }
 0xd1f   : > { %1922 = vperm.xlu0 %6525, %v1897_v30  }
 0xd20   : > { %v1901_v48 = vpop.f32.mrb[24].mxu0 }
 0xd21   : > { %v1902_v51 = vadd.f32 1.0, %v1901_v48  ;;  %v6295_v16 = vpop.f32.mrb[25].mxu0 }
 0xd22   : > { %v5995_v16 = vrot.slane %v7264_v28, 9 }
 0xd23   : > { %1927 = vperm.xlu1 %6526, %v1902_v51  }
 0xd24   : > { %v1906_v37 = vpop.f32.mrb[26].mxu0  ;;  %v2366_v10 = vsel %vm7300_vm7, %v5995_v16, %v2365_v22 }
 0xd25   : > { %v1907_v58 = vadd.f32 1.0, %v1906_v37  ;;  %v6298_v18 = vpop.f32.mrb[27].mxu0 }
 0xd27   : > { %1932 = vperm.xlu0 %6525, %v1907_v58  }
 0xd28   : > { %v1911_v60 = vpop.f32.mrb[28].mxu0 }
 0xd29   : > { %v1912_v8 = vadd.f32 1.0, %v1911_v60  ;;  %v6301_v20 = vpop.f32.mrb[29].mxu0  ;;  %v2367_v60 = vrot.slane %v2365_v22, 2 }
 0xd2b   : > { %1937 = vperm.xlu1 %6526, %v1912_v8  }
 0xd2c   : > { %v1916_v17 = vpop.f32.mrb[30].mxu0 }
 0xd2d   : > { %v1917_v41 = vadd.f32 1.0, %v1916_v17  ;;  %v6304_v46 = vpop.f32.mrb[31].mxu0 }
 0xd2f   : > { %1942 = vperm.xlu0 %6525, %v1917_v41  }
 0xd9e   : > { %v1923_v38 = vpop.permute.xlu0 %1922 }
 0xd9f   : > { %v1945_v39 = vmul.f32 %v1923_v38, %v1802_v54 }
 0xda1   : > { %v7270_v31 = vadd.f32 %v1945_v39, %v7054_v62  ;;  %v7282_v62 = vrot.slane %v2168_v40, %v7261_v14  ;;  %v3071_v39 = vld [vmem:[%s8986_s9 + $0x10] sm:$0xff]  ;;  %v3072_v40 = vld [vmem:[%s8986_s9 + $0x18] sm:$0xff] }
 0xda2   : > { %v1928_v34 = vpop.permute.xlu1 %1927  ;;  %v6388_v45 = vpack.c.bf16 %v3072_v40, %v3071_v39 }
 0xda3   : > { %v1968_v36 = vcombine.high %v7270_v31, %v7270_v31  ;;  %v1975_v50 = vrot.slane %v7270_v31, %v7261_v14  ;;  %v1946_v47 = vmul.f32 %v1928_v34, %v1803_v27  ;;  %v2351_v63 = vcombine.high %v7282_v62, %v7282_v62 }
 0xda4   : > { %v2368_v1 = vrot.slane %v7282_v62, 7  ;;  %6389 = vmatpush1.bf16.msra.mxu1 %v6388_v45 }
 0xda5   : > { %v1982_v32 = vrot.slane %v1968_v36, %v7261_v14  ;;  %v1983_v49 = vcombine.high %v1975_v50, %v1975_v50  ;;  %v7286_v19 = vadd.f32 %v1946_v47, %v7057_v21  ;;  %v2521_v21 = vcombine.low %v7274_v43, %v7282_v62  ;;  %6390 = vmatprep.subr.bf16.mxu1 %v6570_v5 }
 0xda6   : > { %v1933_v11 = vpop.permute.xlu0 %1932  ;;  %v2369_v53 = vsel %vm7300_vm7, %v2367_v60, %v2368_v1  ;;  %v7338_v56 = vrot.slane %v2368_v1, 2  ;;  %v7346_v22 = vrot.slane %v2351_v63, 7 }
 0xda7   : > { %v2044_v15 = vcombine.low %v1975_v50, %v1983_v49  ;;  %v1984_v30 = vcombine.high %v1982_v32, %v1982_v32  ;;  %v1985_v29 = vcombine.high %v7286_v19, %v7286_v19  ;;  %v1992_v48 = vrot.slane %v7286_v19, %v7261_v14 }
 0xda8   : > { %v1947_v51 = vmul.f32 %v1933_v11, %v1804_v24  ;;  %v2058_v58 = vrot.slane %v1982_v32, %v7261_v14  ;;  %v2423_v24 = vcombine.low %v2366_v10, %v2369_v53  ;;  %v2529_v60 = vrot.slane %v2521_v21, %v7261_v14  ;;  %v3075_v21 = vld [vmem:[%s8986_s9 + $0x30] sm:$0xff] }
 0xda9   : > { %v2051_v37 = vrot.slane %v2044_v15, %v7261_v14  ;;  %v1999_v18 = vrot.slane %v1985_v29, %v7261_v14  ;;  %v2000_v20 = vcombine.high %v1992_v48, %v1992_v48  ;;  %v2060_v17 = vcombine.low %v1984_v30, %v1992_v48  ;;  %v3074_v15 = vld [vmem:[%s8986_s9 + $0x28] sm:$0xff] }
 0xdaa   : > { %v7305_v41 = vadd.f32 %v1947_v51, %v7061_v2  ;;  %v1938_v46 = vpop.permute.xlu1 %1937 }
 0xdab   : > { %v2059_v42 = vcombine.low %v2051_v37, %v2058_v58  ;;  %v2001_v59 = vcombine.high %v1999_v18, %v1999_v18  ;;  %v1948_v23 = vmul.f32 %v1938_v46, %v1805_v52  ;;  %v2067_v4 = vrot.slane %v2060_v17, %v7261_v14 }
 0xdac   : > { %v2074_v6 = vrot.slane %v2000_v20, %v7261_v14  ;;  %v2002_v0 = vcombine.high %v7305_v41, %v7305_v41  ;;  %v2009_v2 = vrot.slane %v7305_v41, %v7261_v14  ;;  %v2372_v17 = vsel %vm7300_vm7, %v7338_v56, %v7346_v22 }
 0xdad   : > { %2148 = vst.msk [vmem:[#allocation2 + $0x9] sm:$0x3f] %vm9001_vm6, %v2059_v42  ;;  %v2076_v7 = vcombine.low %v1999_v18, %v2001_v59  ;;  %v7318_v9 = vadd.f32 %v1948_v23, %v7063_v3  ;;  %v7373_v46 = vrot.slane %v2423_v24, %v7261_v14 }
 0xdae   : > { %v2075_v12 = vcombine.low %v2067_v4, %v2074_v6  ;;  %v2016_v13 = vrot.slane %v2002_v0, %v7261_v14  ;;  %v2017_v54 = vcombine.high %v2009_v2, %v2009_v2  ;;  %v2090_v26 = vrot.slane %v2009_v2, %v7261_v14  ;;  %v1943_v33 = vpop.permute.xlu0 %1942  ;;  %v3076_v4 = vld [vmem:[%s8986_s9 + $0x38] sm:$0xff] }
 0xdaf   : > { %v2083_v25 = vrot.slane %v2076_v7, %v7261_v14  ;;  %v2019_v35 = vcombine.high %v7318_v9, %v7318_v9  ;;  %v2026_v3 = vrot.slane %v7318_v9, %v7261_v14  ;;  %v1949_v38 = vmul.f32 %v1943_v33, %v1806_v57 }
 0xdb0   : > { %2149 = vst.msk [vmem:[#allocation2 + $0x11] sm:$0x3f] %vm9001_vm6, %v2075_v12  ;;  %v2018_v27 = vcombine.high %v2016_v13, %v2016_v13  ;;  %v2092_v44 = vcombine.low %v2017_v54, %v2016_v13  ;;  %v6394_v13 = vpack.c.bf16 %v3076_v4, %v3075_v21 }
 0xdb1   : > { %v2091_v34 = vcombine.low %v2083_v25, %v2090_v26  ;;  %v2033_v36 = vrot.slane %v2019_v35, %v7261_v14  ;;  %v2034_v50 = vcombine.high %v2026_v3, %v2026_v3  ;;  %v7342_v47 = vadd.f32 %v1949_v38, %v7067_v61  ;;  %v3073_v61 = vld [vmem:[%s8986_s9 + $0x20] sm:$0xff] }
 0xdb2   : > { %v2099_v32 = vrot.slane %v2092_v44, %v7261_v14  ;;  %v2106_v49 = vrot.slane %v2018_v27, %v7261_v14  ;;  %v6391_v51 = vpack.c.bf16 %v3074_v15, %v3073_v61 }
 0xdb3   : > { %2150 = vst.msk [vmem:[#allocation2 + $0x19] sm:$0x3f] %vm9001_vm6, %v2091_v34  ;;  %v2108_v52 = vcombine.low %v2026_v3, %v2034_v50  ;;  %v2035_v57 = vcombine.high %v2033_v36, %v2033_v36  ;;  %v2042_v11 = vrot.slane %v7342_v47, %v7261_v14  ;;  %v2122_v29 = vrot.slane %v2033_v36, %v7261_v14 }
 0xdb4   : > { %v2107_v30 = vcombine.low %v2099_v32, %v2106_v49  ;;  %v2155_v48 = vld [vmem:[#allocation2 + $0x8] sm:$0xff]  ;;  %6392 = vmatpush1.bf16.msra.mxu1 %v6391_v51 }
 0xdb5   : > { %v2115_v16 = vrot.slane %v2108_v52, %v7261_v14  ;;  %v2043_v37 = vcombine.high %v2042_v11, %v2042_v11  ;;  %v2124_v58 = vcombine.low %v2035_v57, %v2042_v11  ;;  %v7361_v18 = vrot.slane %v2155_v48, %v7261_v14  ;;  %6393 = vmatprep.subr.bf16.mxu1 %v6570_v5 }
 0xdb6   : > { %2151 = vst.msk [vmem:[#allocation2 + $0x21] sm:$0x3f] %vm9001_vm6, %v2107_v30  ;;  %v2184_v20 = vcombine.high %v2155_v48, %v2155_v48 }
 0xdb7   : > { %v2123_v63 = vcombine.low %v2115_v16, %v2122_v29  ;;  %v2131_v42 = vrot.slane %v2124_v58, %v7261_v14  ;;  %v2138_v59 = vrot.slane %v2043_v37, %v7261_v14  ;;  %v6001_v23 = vcombine.high %v7282_v62, %v7361_v18  ;;  %v2156_v1 = vld [vmem:[#allocation2 + $0x10] sm:$0xff] }
 0xdb8   : > { %v2198_v6 = vrot.slane %v2184_v20, %v7261_v14  ;;  %v2199_v0 = vcombine.high %v7361_v18, %v7361_v18  ;;  %v2200_v2 = vcombine.high %v2156_v1, %v2156_v1  ;;  %v2207_v7 = vrot.slane %v2156_v1, %v7261_v14  ;;  %6395 = vmatpush1.bf16.msra.mxu1 %v6394_v13 }
 0xdb9   : > { %2152 = vst.msk [vmem:[#allocation2 + $0x29] sm:$0x3f] %vm9001_vm6, %v2123_v63  ;;  %v2139_v10 = vcombine.low %v2131_v42, %v2138_v59  ;;  %v2536_v53 = vrot.slane %v6001_v23, %v7261_v14  ;;  %v5996_v12 = vrot.slane %v7361_v18, 9  ;;  %6396 = vmatprep.subr.bf16.mxu1 %v6570_v5 }
 0xdba   : > { %v2636_v54 = vcombine.low %v7361_v18, %v2199_v0  ;;  %v2637_v26 = vcombine.low %v2198_v6, %v2207_v7  ;;  %v2281_v33 = vcombine.low %v2199_v0, %v2198_v6  ;;  %v6005_v25 = vcombine.high %v2198_v6, %v2207_v7  ;;  %v2157_v35 = vld [vmem:[#allocation2 + $0x18] sm:$0xff] }
 0xdbb   : > { %2153 = vst.msk [vmem:[#allocation2 + $0x31] sm:$0x3f] %vm9001_vm6, %v2139_v10  ;;  %v2537_v3 = vcombine.low %v2529_v60, %v2536_v53  ;;  %v7396_v38 = vrot.slane %v2200_v2, %v7261_v14  ;;  %v2215_v39 = vcombine.high %v2207_v7, %v2207_v7  ;;  %v7399_v40 = vrot.slane %v2157_v35, %v7261_v14 }
 0xdbc   : > { %v2644_v27 = vrot.slane %v2636_v54, %v7261_v14  ;;  %v2651_v44 = vrot.slane %v2637_v26, %v7261_v14  ;;  %v7404_v56 = vrot.slane %v2281_v33, %v7261_v14  ;;  %v2834_v45 = vrot.slane %v6005_v25, %v7261_v14 }
 0xdbd   : > { %2597 = vrot.lane.b32.xlu0 %v2537_v3, %s6577_s29  ;;  %v2352_v34 = vcombine.high %v2198_v6, %v2198_v6  ;;  %v2539_v36 = vcombine.low %v2215_v39, %v7396_v38  ;;  %v6002_v50 = vcombine.high %v7396_v38, %v7399_v40  ;;  %v2282_v32 = vcombine.low %v2207_v7, %v2215_v39 }
 0xdbe   : > { %v2652_v49 = vcombine.low %v2644_v27, %v2651_v44  ;;  %v2835_v22 = vcombine.low %v7404_v56, %v2834_v45  ;;  %v2298_v24 = vcombine.low %v7396_v38, %v7399_v40  ;;  %v2375_v52 = vrot.slane %v2199_v0, 7 }
 0xdbf   : > { %v2381_v57 = vrot.slane %v2352_v34, 7  ;;  %v2538_v11 = vcombine.low %v2198_v6, %v2352_v34  ;;  %v7416_v61 = vrot.slane %v2539_v36, %v7261_v14  ;;  %v7419_v15 = vrot.slane %v6002_v50, %v7261_v14 }
 0xdc0   : > { %2696 = vrot.lane.b32.xlu1 %v2652_v49, %s6578_s18  ;;  %v7423_v30 = vrot.slane %v2282_v32, %v7261_v14  ;;  %v7426_v29 = vrot.slane %v2298_v24, %v7261_v14  ;;  %v2376_v48 = vsel %vm7300_vm7, %v5996_v12, %v2375_v52  ;;  %v2377_v51 = vrot.slane %v2375_v52, 2  ;;  %v2158_v12 = vld [vmem:[#allocation2 + $0x20] sm:$0xff] }
 0xdc1   : > { %2879 = vrot.lane.b32.xlu0 %v2835_v22, %s6579_s0  ;;  %v2546_v16 = vrot.slane %v2538_v11, %v7261_v14  ;;  %v3029_v37 = vcombine.low %v7416_v61, %v7419_v15  ;;  %v2424_v58 = vcombine.low %v2372_v17, %v2376_v48  ;;  %v2378_v60 = vrot.slane %v2198_v6, 7 }
 0xdc2   : > { %v2918_v20 = vcombine.low %v7423_v30, %v7426_v29  ;;  %v5997_v63 = vrot.slane %v2207_v7, 9  ;;  %v2385_v42 = vrot.slane %v2215_v39, 7  ;;  %v7438_v59 = vcombine.high %v7399_v40, %v7399_v40 }
 0xdc3   : > { %v2554_v23 = vcombine.low %v2546_v16, %v7416_v61  ;;  %3054 = vst.msk [vmem:[#allocation3 + $0x8] sm:$0xff] %vm1476_vm15, %v3029_v37  ;;  %v2438_v1 = vrot.slane %v2424_v58, %v7261_v14  ;;  %v2379_v21 = vsel %vm7300_vm7, %v2377_v51, %v2378_v60  ;;  %v2380_v17 = vrot.slane %v2378_v60, 2 }
 0xdc4   : > { %v2386_v4 = vsel %vm7300_vm7, %v5997_v63, %v2385_v42  ;;  %v2729_v6 = vcombine.low %v2376_v48, %v2379_v21  ;;  %v2653_v0 = vcombine.low %v7399_v40, %v7438_v59  ;;  %v2216_v2 = vcombine.high %v2157_v35, %v2157_v35  ;;  %v2159_v63 = vld [vmem:[#allocation2 + $0x28] sm:$0xff] }
 0xdc5   : > { %2599 = vrot.lane.b32.xlu1 %v2554_v23, %s6577_s29  ;;  %2946 = vrot.lane.b32.xlu0 %v2918_v20, %s6580_s21  ;;  %v2382_v7 = vsel %vm7300_vm7, %v2380_v17, %v2381_v57  ;;  %v2353_v10 = vcombine.high %v7396_v38, %v7396_v38  ;;  %v2387_v53 = vrot.slane %v2385_v42, 2  ;;  %v2439_v25 = vcombine.low %v7373_v46, %v2438_v1 }
 0xdc6   : > { %v2730_v13 = vcombine.low %v2382_v7, %v2386_v4  ;;  %v2737_v54 = vrot.slane %v2729_v6, %v7261_v14  ;;  %v2660_v26 = vrot.slane %v2653_v0, %v7261_v14  ;;  %v7458_v33 = vrot.slane %v2216_v2, %v7261_v14 }
 0xdc7   : > { %v2836_v35 = vcombine.low %v7396_v38, %v2353_v10  ;;  %v2388_v3 = vrot.slane %v7396_v38, 7  ;;  %v2440_v44 = vcombine.low %v2379_v21, %v2382_v7  ;;  %v2232_v45 = vcombine.high %v2158_v12, %v2158_v12 }
 0xdc8   : > { %v2744_v39 = vrot.slane %v2730_v13, %v7261_v14  ;;  %v2299_v27 = vcombine.low %v7438_v59, %v7458_v33  ;;  %v2661_v34 = vcombine.low %v7416_v61, %v2660_v26  ;;  %v2391_v36 = vrot.slane %v2353_v10, 7 }
 0xdc9   : > { %2499 = vrot.lane.b32.xlu1 %v2439_v25, %s6581_s19  ;;  %v7470_v46 = vsel %vm7300_vm7, %v2387_v53, %v2388_v3  ;;  %v7473_v50 = vrot.slane %v2158_v12, %v7261_v14  ;;  %v7480_v24 = vrot.slane %v2232_v45, %v7261_v14  ;;  %v2843_v52 = vrot.slane %v2836_v35, %v7261_v14  ;;  %v7528_v53 = vld [vmem:[#allocation2 + $0x30] sm:$0xff] }
 0xdca   : > { %v2745_v38 = vcombine.low %v2737_v54, %v2744_v39  ;;  %v3060_v32 = vld [vmem:[#allocation3 + $0x8] sm:$0xff]  ;;  %v7476_v49 = vrot.slane %v2299_v27, %v7261_v14  ;;  %v2441_v22 = vcombine.low %v2386_v4, %v7470_v46  ;;  %v7490_v11 = vcombine.high %v7458_v33, %v7458_v33 }
 0xdcb   : > { %6010 = vmatprep.mubr.msk.f32.mxu1 %vm1476_vm15, %v3060_v32  ;;  %v7486_v57 = vcombine.high %v7473_v50, %v7473_v50  ;;  %v2390_v61 = vrot.slane %v2388_v3, 2  ;;  %v2448_v48 = vrot.slane %v2440_v44, %v7261_v14  ;;  %v5998_v16 = vrot.slane %v7399_v40, 9 }
 0xdcc   : > { %2805 = vrot.lane.b32.xlu0 %v2745_v38, %s6582_s20  ;;  %v2455_v51 = vrot.slane %v2441_v22, %v7261_v14  ;;  %v2395_v37 = vrot.slane %v7438_v59, 7  ;;  %v2556_v60 = vcombine.low %v7458_v33, %v7490_v11  ;;  %v2844_v42 = vcombine.low %v2843_v52, %v7476_v49 }
 0xdcd   : > { %2698 = vrot.lane.b32.xlu1 %v2661_v34, %s6578_s18  ;;  %v2315_v58 = vcombine.low %v7473_v50, %v7486_v57  ;;  %v2572_v20 = vcombine.low %v7486_v57, %v7480_v24  ;;  %v7507_v40 = vsel %vm7300_vm7, %v2390_v61, %v2391_v36  ;;  %v2662_v6 = vcombine.low %v7458_v33, %v7473_v50 }
 0xdce   : > { %v2456_v23 = vcombine.low %v2448_v48, %v2455_v51  ;;  %v2396_v59 = vsel %vm7300_vm7, %v5998_v16, %v2395_v37  ;;  %v2570_v21 = vrot.slane %v2556_v60, %v7261_v14  ;;  %v7521_v0 = vrot.slane %v2159_v63, %v7261_v14 }
 0xdcf   : > { %v7512_v1 = vrot.slane %v2315_v58, %v7261_v14  ;;  %v2580_v17 = vrot.slane %v2572_v20, %v7261_v14  ;;  %v2457_v4 = vcombine.low %v7507_v40, %v2396_v59  ;;  %v7525_v2 = vcombine.high %v7480_v24, %v7480_v24 }
 0xdd0   : > { %2881 = vrot.lane.b32.xlu0 %v2844_v42, %s6579_s0  ;;  %v2248_v7 = vcombine.high %v2159_v63, %v2159_v63  ;;  %v6003_v54 = vcombine.high %v7480_v24, %v7521_v0  ;;  %v2571_v25 = vcombine.low %v7419_v15, %v2570_v21  ;;  %v6006_v35 = vcombine.high %v7458_v33, %v7473_v50 }
 0xdd1   : > { %2501 = vrot.lane.b32.xlu1 %v2456_v23, %s6581_s19  ;;  %v3030_v10 = vcombine.low %v2570_v21, %v2580_v17  ;;  %v2919_v12 = vcombine.low %v7476_v49, %v7512_v1  ;;  %v7533_v13 = vrot.slane %v2457_v4, %v7261_v14  ;;  %v2846_v26 = vcombine.low %v7480_v24, %v7525_v2  ;;  %v7584_v21 = vld [vmem:[#allocation2 + $0x38] sm:$0xff] }
 0xdd2   : > { %v7544_v3 = vrot.slane %v2248_v7, %v7261_v14  ;;  %v7548_v39 = vcombine.high %v7521_v0, %v7521_v0  ;;  %v2669_v27 = vrot.slane %v2662_v6, %v7261_v14  ;;  %v7554_v44 = vrot.slane %v7528_v53, %v7261_v14 }
 0xdd3   : > { %3055 = vst.msk [vmem:[#allocation3 + $0x18] sm:$0xff] %vm1476_vm15, %v3030_v10  ;;  %v2397_v15 = vrot.slane %v2395_v37, 2  ;;  %v7558_v45 = vrot.slane %v6003_v54, %v7261_v14  ;;  %v2860_v34 = vrot.slane %v2846_v26, %v7261_v14  ;;  %v2398_v36 = vrot.slane %v7458_v33, 7 }
 0xdd4   : > { %2948 = vrot.lane.b32.xlu0 %v2919_v12, %s6580_s21  ;;  %v2332_v38 = vcombine.low %v7548_v39, %v7544_v3  ;;  %v2401_v32 = vrot.slane %v7490_v11, 7  ;;  %v2979_v22 = vcombine.low %v2455_v51, %v7533_v13  ;;  %v2671_v52 = vcombine.low %v7521_v0, %v7548_v39 }
 0xdd5   : > { %2601 = vrot.lane.b32.xlu1 %v2571_v25, %s6577_s29  ;;  %v2672_v61 = vcombine.low %v7544_v3, %v7554_v44  ;;  %v2670_v48 = vcombine.low %v2669_v27, %v2580_v17  ;;  %v2853_v16 = vrot.slane %v6006_v35, %v7261_v14  ;;  %v2399_v37 = vsel %vm7300_vm7, %v2397_v15, %v2398_v36 }
 0xdd6   : > { %v7574_v33 = vrot.slane %v2332_v38, %v7261_v14  ;;  %v2411_v11 = vrot.slane %v7525_v2, 7  ;;  %v2746_v51 = vcombine.low %v7470_v46, %v7507_v40  ;;  %v2747_v58 = vcombine.low %v2396_v59, %v2399_v37 }
 0xdd7   : > { %v2400_v60 = vrot.slane %v2398_v36, 2  ;;  %v2588_v20 = vcombine.low %v2580_v17, %v7558_v45  ;;  %v2861_v63 = vcombine.low %v2853_v16, %v2860_v34  ;;  %v2405_v42 = vrot.slane %v7486_v57, 7 }
 0xdd8   : > { %3007 = vrot.lane.b32.xlu0 %v2979_v22, %s6583_s22  ;;  %v2408_v23 = vrot.slane %v7480_v24, 7  ;;  %2350 = vst.msk [vmem:[#allocation3 + $0x40] sm:$0xf] %vm9002_vm8, %v7574_v33  ;;  %v2679_v4 = vrot.slane %v2671_v52, %v7261_v14  ;;  %v2686_v46 = vrot.slane %v2672_v61, %v7261_v14  ;;  %v6007_v40 = vcombine.high %v7544_v3, %v7554_v44 }
 0xdd9   : > { %2700 = vrot.lane.b32.xlu1 %v2670_v48, %s6578_s18  ;;  %v2402_v59 = vsel %vm7300_vm7, %v2400_v60, %v2401_v32  ;;  %v2761_v17 = vrot.slane %v2747_v58, %v7261_v14  ;;  %v5999_v6 = vrot.slane %v7473_v50, 9  ;;  %v2407_v2 = vrot.slane %v2405_v42, 2 }
 0xdda   : > { %v2458_v57 = vcombine.low %v2399_v37, %v2402_v59  ;;  %v2410_v7 = vrot.slane %v2408_v23, 2  ;;  %v7599_v10 = vcombine.high %v7544_v3, %v7544_v3  ;;  %v7603_v12 = vrot.slane %v7584_v21, %v7261_v14 }
 0xddb   : > { %v2754_v54 = vrot.slane %v2746_v51, %v7261_v14  ;;  %v2406_v26 = vsel %vm7300_vm7, %v5999_v6, %v2405_v42  ;;  %v2409_v50 = vsel %vm7300_vm7, %v2407_v2, %v2408_v23  ;;  %v2620_v25 = vcombine.high %v7528_v53, %v7528_v53 }
 0xddc   : > { %2603 = vrot.lane.b32.xlu0 %v2588_v20, %s6577_s29  ;;  %v2687_v35 = vcombine.low %v2679_v4, %v2686_v46  ;;  %v2869_v27 = vrot.slane %v6007_v40, %v7261_v14  ;;  %v2474_v15 = vcombine.low %v2406_v26, %v2409_v50  ;;  %v7616_v34 = vsel %vm7300_vm7, %v2410_v7, %v2411_v11 }
 0xddd   : > { %2883 = vrot.lane.b32.xlu1 %v2861_v63, %s6579_s0  ;;  %v2762_v36 = vcombine.low %v2754_v54, %v2761_v17  ;;  %v2472_v38 = vrot.slane %v2458_v57, %v7261_v14  ;;  %v2589_v32 = vcombine.low %v7544_v3, %v7599_v10  ;;  %v7622_v22 = vrot.slane %v2620_v25, %v7261_v14 }
 0xdde   : > { %v7627_v53 = vcombine.high %v7554_v44, %v7554_v44  ;;  %v2264_v52 = vcombine.low %v7264_v28, %v7274_v43  ;;  %v2316_v61 = vcombine.low %v7480_v24, %v7521_v0  ;;  %v2764_v48 = vcombine.low %v2409_v50, %v7616_v34 }
 0xddf   : > { %v2596_v16 = vrot.slane %v2589_v32, %v7261_v14  ;;  %v6009_v37 = vcombine.high %v7622_v22, %v7603_v12  ;;  %v2870_v11 = vcombine.low %v7574_v33, %v2869_v27  ;;  %v7640_v51 = vrot.slane %v2474_v15, %v7261_v14 }
 0xde0   : > { %2702 = vrot.lane.b32.xlu0 %v2687_v35, %s6578_s18  ;;  %v2688_v28 = vcombine.low %v7627_v53, %v7622_v22  ;;  %v2415_v43 = vrot.slane %v7548_v39, 7  ;;  %v2473_v58 = vcombine.low %v7533_v13, %v2472_v38  ;;  %v7650_v20 = vcombine.high %v7603_v12, %v7603_v12 }
 0xde1   : > { %2807 = vrot.lane.b32.xlu1 %v2762_v36, %s6582_s20  ;;  %v3031_v24 = vcombine.low %v7558_v45, %v2596_v16  ;;  %v3039_v60 = vrot.slane %v6009_v37, %v7261_v14  ;;  %v2763_v63 = vcombine.low %v2402_v59, %v2406_v26  ;;  %v6000_v23 = vrot.slane %v7521_v0, 9 }
 0xde2   : > { %v2695_v42 = vrot.slane %v2688_v28, %v7261_v14  ;;  %v2902_v39 = vcombine.high %v7584_v21, %v7584_v21  ;;  %v7659_v13 = vrot.slane %v2316_v61, %v7261_v14  ;;  %v2778_v45 = vrot.slane %v2764_v48, %v7261_v14  ;;  %v3078_v61 = vld [vmem:[%s8986_s9 + $0x48] sm:$0xff] }
 0xde3   : > { %3056 = vst.msk [vmem:[#allocation3 + $0x28] sm:$0xff] %vm1476_vm15, %v3031_v24  ;;  %v2922_v4 = vcombine.low %v7622_v22, %v7603_v12  ;;  %v2418_v46 = vrot.slane %v7544_v3, 7  ;;  %v2980_v40 = vcombine.low %v2472_v38, %v7640_v51  ;;  %v2921_v0 = vcombine.low %v7554_v44, %v7627_v53  ;;  %v3080_v24 = vld [vmem:[%s8986_s9 + $0x58] sm:$0xff] }
 0xde4   : > { %2885 = vrot.lane.b32.xlu0 %v2870_v11, %s6579_s0  ;;  %v3040_v21 = vcombine.low %v2695_v42, %v3039_v60  ;;  %v7671_v59 = vsel %vm7300_vm7, %v6000_v23, %v2415_v43  ;;  %v2920_v17 = vcombine.low %v7659_v13, %v7574_v33  ;;  %v7677_v57 = vcombine.high %v7622_v22, %v7622_v22 }
 0xde5   : > { %2503 = vrot.lane.b32.xlu1 %v2473_v58, %s6581_s19  ;;  %v2721_v6 = vrot.slane %v7627_v53, 7  ;;  %v2724_v3 = vrot.slane %v7622_v22, 7  ;;  %v2771_v2 = vrot.slane %v2763_v63, %v7261_v14  ;;  %v2421_v7 = vrot.slane %v7599_v10, 7  ;;  %v3079_v58 = vld [vmem:[%s8986_s9 + $0x50] sm:$0xff] }
 0xde6   : > { %3057 = vst.msk [vmem:[#allocation3 + $0x38] sm:$0xff] %vm1476_vm15, %v3040_v21  ;;  %v2417_v54 = vrot.slane %v2415_v43, 2  ;;  %v2420_v26 = vrot.slane %v2418_v46, 2  ;;  %v2475_v33 = vcombine.low %v7616_v34, %v7671_v59  ;;  %v6008_v50 = vrot.slane %v7603_v12, 9 }
 0xde7   : > { %v2971_v25 = vrot.slane %v7650_v20, 7  ;;  %v2265_v35 = vcombine.low %v7282_v62, %v7361_v18  ;;  %v2779_v27 = vcombine.low %v2771_v2, %v2778_v45  ;;  %v2929_v15 = vrot.slane %v2921_v0, %v7261_v14 }
 0xde8   : > { %3009 = vrot.lane.b32.xlu0 %v2980_v40, %s6583_s22  ;;  %v2936_v10 = vrot.slane %v2922_v4, %v7261_v14  ;;  %v2272_v36 = vrot.slane %v2264_v52, %v7261_v14  ;;  %v2723_v38 = vrot.slane %v2721_v6, 2  ;;  %v2726_v32 = vrot.slane %v2724_v3, 2  ;;  %v3077_v52 = vld [vmem:[%s8986_s9 + $0x40] sm:$0xff] }
 0xde9   : > { %2950 = vrot.lane.b32.xlu1 %v2920_v17, %s6580_s21  ;;  %v2727_v53 = vrot.slane %v7677_v57, 7  ;;  %v2419_v12 = vsel %vm7300_vm7, %v2417_v54, %v2418_v46  ;;  %v2422_v34 = vsel %vm7300_vm7, %v2420_v26, %v2421_v7  ;;  %v7702_v62 = vrot.slane %v2902_v39, %v7261_v14  ;;  %v3083_v26 = vld [vmem:[%s8986_s9 + $0x70] sm:$0xff] }
 0xdea   : > { %v2279_v18 = vrot.slane %v2265_v35, %v7261_v14  ;;  %v2489_v48 = vrot.slane %v2475_v33, %v7261_v14  ;;  %v2937_v37 = vcombine.low %v2929_v15, %v2936_v10  ;;  %v6004_v11 = vrot.slane %v7554_v44, 9  ;;  %v3084_v33 = vld [vmem:[%s8986_s9 + $0x78] sm:$0xff] }
 0xdeb   : > { %v2972_v28 = vsel %vm7300_vm7, %v6008_v50, %v2971_v25  ;;  %v2491_v60 = vcombine.low %v2419_v12, %v2422_v34  ;;  %v2728_v63 = vsel %vm7300_vm7, %v2726_v32, %v2727_v53  ;;  %v6397_v44 = vpack.c.bf16 %v3078_v61, %v3077_v52  ;;  %v3085_v32 = vld [vmem:[%s8986_s9 + $0x80] sm:$0xff] }
 0xdec   : > { %2809 = vrot.lane.b32.xlu0 %v2779_v27, %s6582_s20  ;;  %v2280_v43 = vcombine.low %v2272_v36, %v2279_v18  ;;  %v2722_v23 = vsel %vm7300_vm7, %v6004_v11, %v2721_v6  ;;  %v7731_v39 = vcombine.high %v7702_v62, %v7702_v62  ;;  %v2297_v45 = vcombine.low %v7404_v56, %v7423_v30  ;;  %v3081_v56 = vld [vmem:[%s8986_s9 + $0x60] sm:$0xff]  ;;  %v3082_v30 = vld [vmem:[%s8986_s9 + $0x68] sm:$0xff] }
 0xded   : > { %2605 = vrot.lane.b32.xlu1 %v2596_v16, %s6577_s29  ;;  %v2725_v16 = vsel %vm7300_vm7, %v2723_v38, %v2724_v3  ;;  %v2490_v4 = vcombine.low %v7640_v51, %v2489_v48  ;;  %v7739_v46 = vrot.slane %v7702_v62, 7  ;;  %6398 = vmatpush1.bf16.msra.mxu1 %v6397_v44  ;;  %v6400_v40 = vpack.c.bf16 %v3080_v24, %v3079_v58 }
 0xdee   : > { %2345 = vst.msk [vmem:[#allocation3] sm:$0xff] %vm1476_vm15, %v2280_v43  ;;  %v2314_v0 = vcombine.low %v7426_v29, %v7476_v49  ;;  %v2797_v21 = vcombine.low %v2725_v16, %v2728_v63  ;;  %v2982_v17 = vcombine.low %v2722_v23, %v2725_v16  ;;  %v2983_v6 = vcombine.low %v2728_v63, %v2972_v28 }
 0xdef   : > { %6399 = vmatprep.subr.bf16.mxu1 %v6570_v5  ;;  %2346 = vst.msk [vmem:[#allocation3 + $0x10] sm:$0xff] %vm1476_vm15, %v2297_v45  ;;  %v2331_v51 = vcombine.low %v7512_v1, %v7659_v13  ;;  %v2498_v29 = vrot.slane %v2491_v60, %v7261_v14  ;;  %v2780_v49 = vcombine.low %v7671_v59, %v2419_v12  ;;  %v2973_v3 = vrot.slane %v2971_v25, 2 }
 0xdf0   : > { %2952 = vrot.lane.b32.xlu0 %v2937_v37, %s6580_s21  ;;  %2347 = vst.msk [vmem:[#allocation3 + $0x20] sm:$0xff] %vm1476_vm15, %v2314_v0  ;;  %v2976_v2 = vrot.slane %v7739_v46, 2  ;;  %v6403_v7 = vpack.c.bf16 %v3082_v30, %v3081_v56  ;;  %v2804_v1 = vrot.slane %v2797_v21, %v7261_v14  ;;  %v2990_v13 = vrot.slane %v2982_v17, %v7261_v14  ;;  %v3062_v30 = vld [vmem:[#allocation3 + $0x18] sm:$0xff] }
 0xdf1   : > { %2704 = vrot.lane.b32.xlu1 %v2695_v42, %s6578_s18  ;;  %v2781_v42 = vcombine.low %v2422_v34, %v2722_v23  ;;  %2348 = vst.msk [vmem:[#allocation3 + $0x30] sm:$0xff] %vm1476_vm15, %v2331_v51  ;;  %6401 = vmatpush1.bf16.msra.mxu1 %v6400_v40  ;;  %v2997_v59 = vrot.slane %v2983_v6, %v7261_v14  ;;  %v2977_v54 = vrot.slane %v7731_v39, 7 }
 0xdf2   : > { %6402 = vmatprep.subr.bf16.mxu1 %v6570_v5  ;;  %v2981_v50 = vcombine.low %v2489_v48, %v2498_v29  ;;  %v2788_v25 = vrot.slane %v2780_v49, %v7261_v14  ;;  %v2938_v27 = vcombine.low %v7650_v20, %v7702_v62  ;;  %v6406_v15 = vpack.c.bf16 %v3084_v33, %v3083_v26  ;;  %v3086_v20 = vld [vmem:[%s8986_s9 + $0x88] sm:$0xff] }
 0xdf3   : > { %v2795_v35 = vrot.slane %v2781_v42, %v7261_v14  ;;  %v2998_v10 = vcombine.low %v2990_v13, %v2997_v59  ;;  %v2975_v36 = vsel %vm7300_vm7, %v2973_v3, %v7739_v46  ;;  %v7782_v38 = vsel %vm7300_vm7, %v2976_v2, %v2977_v54  ;;  %v3064_v59 = vld [vmem:[#allocation3 + $0x28] sm:$0xff] }
 0xdf4   : > { %2505 = vrot.lane.b32.xlu0 %v2490_v4, %s6581_s19  ;;  %v2871_v12 = vcombine.low %v7622_v22, %v7677_v57  ;;  %v2945_v34 = vrot.slane %v2938_v27, %v7261_v14  ;;  %v2999_v18 = vcombine.low %v2975_v36, %v7782_v38  ;;  %v6409_v52 = vpack.c.bf16 %v3086_v20, %v3085_v32  ;;  %v3066_v36 = vld [vmem:[#allocation3 + $0x38] sm:$0xff] }
 0xdf5   : > { %2507 = vrot.lane.b32.xlu1 %v2498_v29, %s6581_s19  ;;  %6404 = vmatpush1.bf16.msra.mxu1 %v6403_v7  ;;  %v2796_v53 = vcombine.low %v2788_v25, %v2795_v35  ;;  %v3041_v48 = vcombine.low %v7702_v62, %v7731_v39 }
 0xdf6   : > { %6405 = vmatprep.subr.bf16.mxu1 %v6570_v5  ;;  %v2878_v61 = vrot.slane %v2871_v12, %v7261_v14  ;;  %v3006_v22 = vrot.slane %v2999_v18, %v7261_v14  ;;  %v7854_v12 = vld [vmem:[%s8987_s10] ss:$0 sm:$0xff]  ;;  %v7859_v18 = vld [vmem:[%s8987_s10 + $0x1] ss:$0 sm:$0xff] }
 0xdf7   : > { %v3048_v57 = vrot.slane %v3041_v48, %v7261_v14 }
 0xdf8   : > { %2813 = vrot.lane.b32.xlu0 %v2804_v1, %s6582_s20 }
 0xdf9   : > { %3011 = vrot.lane.b32.xlu1 %v2981_v50, %s6583_s22  ;;  %6407 = vmatpush1.bf16.msra.mxu1 %v6406_v15  ;;  %3058 = vst.msk [vmem:[#allocation3 + $0x48] sm:$0xf] %vm9002_vm8, %v3048_v57 }
 0xdfa   : > { %6408 = vmatprep.subr.bf16.mxu1 %v6570_v5 }
 0xdfc   : > { %3013 = vrot.lane.b32.xlu0 %v2998_v10, %s6583_s22 }
 0xdfd   : > { %2811 = vrot.lane.b32.xlu1 %v2796_v53, %s6582_s20  ;;  %6410 = vmatpush1.bf16.msra.mxu1 %v6409_v52 }
 0xdfe   : > { %6438 = vmatprep.subr.bf16.mxu1 %v6570_v5 }
 0xe00   : > { %2954 = vrot.lane.b32.xlu0 %v2945_v34, %s6580_s21  ;;  %v7808_v37 = vld [vmem:[#allocation3 + $0x48] sm:$0xf] }
 0xe01   : > { %2887 = vrot.lane.b32.xlu1 %v2878_v61, %s6579_s0  ;;  %4294 = vst.msk [vmem:[#allocation3 + $0x48] sm:$0xf] %vm9002_vm8, %v3048_v57 }
 0xe05   : > { %3015 = vrot.lane.b32.xlu1 %v3006_v22, %s6583_s22 }
 0xe2f   : > { %v2598_v11 = vpop.permute.xlu0 %2597 }
 0xe32   : > { %v2697_v28 = vpop.permute.xlu1 %2696 }
 0xe33   : > { %v2880_v43 = vpop.permute.xlu0 %2879 }
 0xe37   : > { %v2600_v58 = vpop.permute.xlu1 %2599  ;;  %v2947_v24 = vpop.permute.xlu0 %2946 }
 0xe3b   : > { %v2500_v60 = vpop.permute.xlu1 %2499 }
 0xe3c   : > { %2515 = vst.msk [vmem:[#allocation3] sm:$0xff] %vm2514_vm10, %v2500_v60 }
 0xe3d   : > { %2613 = vst.msk [vmem:[#allocation3] sm:$0xff] %vm2612_vm12, %v2598_v11 }
 0xe3e   : > { %2712 = vst.msk [vmem:[#allocation3] sm:$0xff] %vm8999_vm14, %v2697_v28  ;;  %v2806_v16 = vpop.permute.xlu0 %2805 }
 0xe3f   : > { %2821 = vst.msk [vmem:[#allocation3] sm:$0xff] %vm2820_vm1, %v2806_v16  ;;  %v2699_v63 = vpop.permute.xlu1 %2698 }
 0xe40   : > { %2895 = vst.msk [vmem:[#allocation3] sm:$0xff] %vm2894_vm2, %v2880_v43 }
 0xe41   : > { %2962 = vst.msk [vmem:[#allocation3] sm:$0xff] %vm2961_vm3, %v2947_v24  ;;  %v3411_v24 = vld [vmem:[#allocation2] sm:$0xff] }
 0xe42   : > { %v2882_v44 = vpop.permute.xlu0 %2881 }
 0xe43   : > { %v2502_v23 = vpop.permute.xlu1 %2501 }
 0xe44   : > { %2516 = vst.msk [vmem:[#allocation3 + $0x10] sm:$0xff] %vm2514_vm10, %v2502_v23 }
 0xe45   : > { %2614 = vst.msk [vmem:[#allocation3 + $0x10] sm:$0xff] %vm2612_vm12, %v2600_v58 }
 0xe46   : > { %2713 = vst.msk [vmem:[#allocation3 + $0x10] sm:$0xff] %vm8999_vm14, %v2699_v63  ;;  %v2949_v39 = vpop.permute.xlu0 %2948 }
 0xe47   : > { %v2602_v45 = vpop.permute.xlu1 %2601 }
 0xe4a   : > { %v3008_v4 = vpop.permute.xlu0 %3007 }
 0xe4b   : > { %3023 = vst.msk [vmem:[#allocation3] sm:$0xff] %vm3022_vm4, %v3008_v4  ;;  %v2701_v40 = vpop.permute.xlu1 %2700 }
 0xe4e   : > { %v2604_v0 = vpop.permute.xlu0 %2603 }
 0xe4f   : > { %v2884_v21 = vpop.permute.xlu1 %2883 }
 0xe52   : > { %v2703_v17 = vpop.permute.xlu0 %2702  ;;  %v3059_v6 = vld [vmem:[#allocation3] sm:$0xff] }
 0xe53   : > { %3167 = vmatmul.mubr.f32.vlgmr.msra.gmra.mrb[30].mxu1 %v3059_v6  ;;  %v2808_v56 = vpop.permute.xlu1 %2807 }
 0xe54   : > { %2822 = vst.msk [vmem:[#allocation3 + $0x10] sm:$0xff] %vm2820_vm1, %v2808_v56  ;;  %6011 = vmatprep.mubr.msk.f32.mxu1 %vm1476_vm15, %v3062_v30 }
 0xe55   : > { %2896 = vst.msk [vmem:[#allocation3 + $0x10] sm:$0xff] %vm2894_vm2, %v2882_v44  ;;  %v3432_v44 = vrot.slane %v3411_v24, %v7261_v14 }
 0xe56   : > { %2963 = vst.msk [vmem:[#allocation3 + $0x10] sm:$0xff] %vm2961_vm3, %v2949_v39  ;;  %v2886_v51 = vpop.permute.xlu0 %2885 }
 0xe57   : > { %v2504_v29 = vpop.permute.xlu1 %2503 }
 0xe58   : > { %2517 = vst.msk [vmem:[#allocation3 + $0x20] sm:$0xff] %vm2514_vm10, %v2504_v29 }
 0xe59   : > { %2615 = vst.msk [vmem:[#allocation3 + $0x20] sm:$0xff] %vm2612_vm12, %v2602_v45  ;;  %v3425_v45 = vcombine.high %v3411_v24, %v3411_v24 }
 0xe5a   : > { %2714 = vst.msk [vmem:[#allocation3 + $0x20] sm:$0xff] %vm8999_vm14, %v2701_v40  ;;  %v3010_v49 = vpop.permute.xlu0 %3009  ;;  %v3440_v40 = vcombine.high %v3432_v44, %v3432_v44 }
 0xe5b   : > { %3024 = vst.msk [vmem:[#allocation3 + $0x10] sm:$0xff] %vm3022_vm4, %v3010_v49  ;;  %v2951_v42 = vpop.permute.xlu1 %2950 }
 0xe5c   : > { %v3615_v6 = vrot.slane %v3440_v40, 7 }
 0xe5e   : > { %v2810_v3 = vpop.permute.xlu0 %2809 }
 0xe5f   : > { %2823 = vst.msk [vmem:[#allocation3 + $0x20] sm:$0xff] %vm2820_vm1, %v2810_v3  ;;  %v2606_v2 = vpop.permute.xlu1 %2605 }
 0xe60   : > { %2897 = vst.msk [vmem:[#allocation3 + $0x20] sm:$0xff] %vm2894_vm2, %v2884_v21  ;;  %v3439_v21 = vrot.slane %v3425_v45, %v7261_v14 }
 0xe61   : > { %2964 = vst.msk [vmem:[#allocation3 + $0x20] sm:$0xff] %vm2961_vm3, %v2951_v42 }
 0xe62   : > { %v2953_v7 = vpop.permute.xlu0 %2952  ;;  %v3061_v1 = vld [vmem:[#allocation3 + $0x10] sm:$0xff]  ;;  %v3769_v29 = vcombine.low %v3440_v40, %v3439_v21  ;;  %v3607_v42 = vcombine.high %v3439_v21, %v3439_v21  ;;  %v3618_v3 = vrot.slane %v3439_v21, 7 }
 0xe63   : > { %3172 = vmatmul.mubr.f32.gmra.mrb[32].mxu1 %v3061_v1  ;;  %v2705_v13 = vpop.permute.xlu1 %2704 }
 0xe64   : > { %6012 = vmatprep.mubr.msk.f32.mxu1 %vm1476_vm15, %v3064_v59  ;;  %v6017_v59 = vrot.slane %v3432_v44, 9 }
 0xe66   : > { %v2506_v54 = vpop.permute.xlu0 %2505 }
 0xe67   : > { %2518 = vst.msk [vmem:[#allocation3 + $0x30] sm:$0xff] %vm2514_vm10, %v2506_v54  ;;  %v2508_v26 = vpop.permute.xlu1 %2507  ;;  %v3617_v54 = vrot.slane %v3615_v6, 2 }
 0xe68   : > { %2616 = vst.msk [vmem:[#allocation3 + $0x30] sm:$0xff] %vm2612_vm12, %v2604_v0 }
 0xe69   : > { %2520 = vst.msk [vmem:[#allocation3 + $0x40] sm:$0xf] %vm8998_vm5, %v2508_v26  ;;  %vm2899_vm5 = vcmask 781952   ;;  %v3521_v26 = vcombine.low %v3432_v44, %v3440_v40 }
 0xe6a   : > { %2715 = vst.msk [vmem:[#allocation3 + $0x30] sm:$0xff] %vm8999_vm14, %v2703_v17  ;;  %v2814_v33 = vpop.permute.xlu0 %2813  ;;  %vm2966_vm14 = vcmask 913152  }
 0xe6b   : > { %2618 = vst.msk [vmem:[#allocation3 + $0x40] sm:$0xf] %vm2617_vm0, %v2606_v2  ;;  %v3012_v50 = vpop.permute.xlu1 %3011 }
 0xe6c   : > { %2717 = vst.msk [vmem:[#allocation3 + $0x40] sm:$0xf] %vm2716_vm9, %v2705_v13 }
 0xe6d   : > { %2826 = vst.msk [vmem:[#allocation3 + $0x40] sm:$0xf] %vm9000_vm11, %v2814_v33  ;;  %vm9003_vm11 = vcmask 1044352  }
 0xe6e   : > { %3025 = vst.msk [vmem:[#allocation3 + $0x20] sm:$0xff] %vm3022_vm4, %v3012_v50  ;;  %v3014_v25 = vpop.permute.xlu0 %3013 }
 0xe6f   : > { %v2812_v35 = vpop.permute.xlu1 %2811 }
 0xe70   : > { %2824 = vst.msk [vmem:[#allocation3 + $0x30] sm:$0xff] %vm2820_vm1, %v2812_v35  ;;  %v3777_v35 = vrot.slane %v3769_v29, %v7261_v14 }
 0xe71   : > { %2898 = vst.msk [vmem:[#allocation3 + $0x30] sm:$0xff] %vm2894_vm2, %v2886_v51 }
 0xe72   : > { %2965 = vst.msk [vmem:[#allocation3 + $0x30] sm:$0xff] %vm2961_vm3, %v2953_v7  ;;  %v2955_v27 = vpop.permute.xlu0 %2954 }
 0xe73   : > { %3026 = vst.msk [vmem:[#allocation3 + $0x30] sm:$0xff] %vm3022_vm4, %v3014_v25  ;;  %v2888_v15 = vpop.permute.xlu1 %2887 }
 0xe74   : > { %2900 = vst.msk [vmem:[#allocation3 + $0x40] sm:$0xf] %vm2899_vm5, %v2888_v15  ;;  %v3620_v15 = vrot.slane %v3618_v3, 2 }
 0xe75   : > { %v3063_v10 = vld [vmem:[#allocation3 + $0x20] sm:$0xff]  ;;  %2967 = vst.msk [vmem:[#allocation3 + $0x40] sm:$0xf] %vm2966_vm14, %v2955_v27 }
 0xe76   : > { %3177 = vmatmul.mubr.f32.gmra.mrb[34].mxu1 %v3063_v10  ;;  %v3621_v10 = vrot.slane %v3607_v42, 7 }
 0xe77   : > { %6013 = vmatprep.mubr.msk.f32.mxu1 %vm1476_vm15, %v3066_v36  ;;  %v3016_v32 = vpop.permute.xlu1 %3015 }
 0xe78   : > { %3028 = vst.msk [vmem:[#allocation3 + $0x40] sm:$0xf] %vm9003_vm11, %v3016_v32  ;;  %vm9016_vm11 = vcmask 650752  }
 0xe7a   : > { %v3065_v20 = vld [vmem:[#allocation3 + $0x30] sm:$0xff] }
 0xe7b   : > { %3182 = vmatmul.mubr.f32.gmra.mrb[36].mxu1 %v3065_v20 }
 0xe7c   : > { %6014 = vmatprep.mubr.msk.f32.mxu1 %vm1476_vm15, %v7808_v37 }
 0xe7f   : > { %v3067_v53 = vld [vmem:[#allocation3 + $0x40] sm:$0xf] }
 0xe80   : > { %3187 = vmatmul.mubr.f32.gmra.mrb[38].mxu1 %v3067_v53 }
 0xf26   : > { %v3168_v34 = vpop.f32.mrb[30].mxu1 }
 0xf27   : > { %v3197_v52 = vmul.f32 %v7854_v12, %v3168_v34  ;;  %v3170_v61 = vpop.f32.mrb[31].mxu1 }
 0xf28   : > { %v3619_v61 = vsel %vm7300_vm7, %v3617_v54, %v3618_v3 }
 0xf29   : > { %v3207_v48 = vadd.f32 %v7859_v18, %v3197_v52  ;;  %v3616_v52 = vsel %vm7300_vm7, %v6017_v59, %v3615_v6 }
 0xf2b   : > { %v3212_v22 = vmax.f32 %v3207_v48, 0.0 }
 0xf2d   : > { %v7864_v57 = vadd.f32 %v3212_v22, %v7270_v31  ;;  %v3529_v22 = vrot.slane %v3521_v26, %v7261_v14 }
 0xf2f   : > { %v3227_v37 = vcombine.high %v7864_v57, %v7864_v57  ;;  %v3234_v11 = vrot.slane %v7864_v57, %v7261_v14 }
 0xf31   : > { %v3241_v28 = vrot.slane %v3227_v37, %v7261_v14  ;;  %v3242_v43 = vcombine.high %v3234_v11, %v3234_v11 }
 0xf33   : > { %v3303_v58 = vcombine.low %v3234_v11, %v3242_v43  ;;  %v3317_v16 = vrot.slane %v3241_v28, %v7261_v14  ;;  %v3243_v56 = vcombine.high %v3241_v28, %v3241_v28 }
 0xf35   : > { %v3310_v60 = vrot.slane %v3303_v58, %v7261_v14 }
 0xf36   : > { %v3173_v63 = vpop.f32.mrb[32].mxu1 }
 0xf37   : > { %v3318_v31 = vcombine.low %v3310_v60, %v3317_v16  ;;  %v3198_v23 = vmul.f32 %v7854_v12, %v3173_v63  ;;  %v3175_v39 = vpop.f32.mrb[33].mxu1  ;;  %v3622_v60 = vsel %vm7300_vm7, %v3620_v15, %v3621_v10 }
 0xf39   : > { %3405 = vst.msk [vmem:[#allocation2 + $0x9] sm:$0x3f] %vm9001_vm6, %v3318_v31  ;;  %v3208_v4 = vadd.f32 %v7859_v18, %v3198_v23  ;;  %v3673_v31 = vcombine.low %v3616_v52, %v3619_v61 }
 0xf3b   : > { %v3213_v0 = vmax.f32 %v3208_v4, 0.0 }
 0xf3d   : > { %v7879_v17 = vadd.f32 %v3213_v0, %v7286_v19 }
 0xf3f   : > { %v3244_v30 = vcombine.high %v7879_v17, %v7879_v17  ;;  %v3251_v51 = vrot.slane %v7879_v17, %v7261_v14 }
 0xf40   : > { %v3412_v49 = vld [vmem:[#allocation2 + $0x8] sm:$0xff] }
 0xf41   : > { %v3258_v2 = vrot.slane %v3244_v30, %v7261_v14  ;;  %v3259_v7 = vcombine.high %v3251_v51, %v3251_v51  ;;  %v3319_v1 = vcombine.low %v3243_v56, %v3251_v51  ;;  %v3448_v13 = vrot.slane %v3412_v49, %v7261_v14 }
 0xf42   : > { %v3441_v19 = vcombine.high %v3412_v49, %v3412_v49  ;;  %v3681_v30 = vrot.slane %v3673_v31, %v7261_v14 }
 0xf43   : > { %v3326_v33 = vrot.slane %v3319_v1, %v7261_v14  ;;  %v3333_v50 = vrot.slane %v3259_v7, %v7261_v14  ;;  %v6023_v25 = vcombine.high %v3439_v21, %v3448_v13  ;;  %v3456_v27 = vcombine.high %v3448_v13, %v3448_v13 }
 0xf44   : > { %v3522_v36 = vcombine.low %v3439_v21, %v3448_v13  ;;  %v3260_v32 = vcombine.high %v3258_v2, %v3258_v2  ;;  %v7892_v34 = vrot.slane %v3441_v19, %v7261_v14  ;;  %v6018_v28 = vrot.slane %v3448_v13, 9 }
 0xf45   : > { %v3334_v20 = vcombine.low %v3326_v33, %v3333_v50  ;;  %v3784_v53 = vrot.slane %v6023_v25, %v7261_v14  ;;  %v3625_v48 = vrot.slane %v3456_v27, 7  ;;  %v3882_v39 = vcombine.low %v3448_v13, %v3456_v27 }
 0xf46   : > { %v3536_v43 = vrot.slane %v3522_v36, %v7261_v14  ;;  %v3335_v16 = vcombine.low %v3258_v2, %v3260_v32  ;;  %v3538_v63 = vcombine.low %v3456_v27, %v7892_v34  ;;  %v7913_v45 = vcombine.high %v7892_v34, %v7892_v34 }
 0xf47   : > { %3406 = vst.msk [vmem:[#allocation2 + $0x11] sm:$0x3f] %vm9001_vm6, %v3334_v20  ;;  %v3785_v11 = vcombine.low %v3777_v35, %v3784_v53  ;;  %v7908_v44 = vsel %vm7300_vm7, %v6018_v28, %v3625_v48  ;;  %v3628_v21 = vrot.slane %v7892_v34, 7  ;;  %v3890_v42 = vrot.slane %v3882_v39, %v7261_v14 }
 0xf48   : > { %v3537_v4 = vcombine.low %v3529_v22, %v3536_v43  ;;  %v3674_v0 = vcombine.low %v3622_v60, %v7908_v44  ;;  %v3342_v6 = vrot.slane %v3335_v16, %v7261_v14  ;;  %v7920_v56 = vrot.slane %v3538_v63, %v7261_v14 }
 0xf49   : > { %v3178_v37 = vpop.f32.mrb[34].mxu1  ;;  %3845 = vrot.lane.b32.xlu1 %v3785_v11, %s6577_s29  ;;  %v3631_v3 = vrot.slane %v7913_v45, 7  ;;  %v3786_v2 = vcombine.low %v7892_v34, %v7913_v45  ;;  %v3627_v59 = vrot.slane %v3625_v48, 2  ;;  %v3630_v33 = vrot.slane %v3628_v21, 2 }
 0xf4a   : > { %v3199_v58 = vmul.f32 %v7854_v12, %v3178_v37  ;;  %v3180_v24 = vpop.f32.mrb[35].mxu1  ;;  %3602 = vst.msk [vmem:[#allocation3] sm:$0xff] %vm1476_vm15, %v3537_v4  ;;  %v3688_v26 = vrot.slane %v3674_v0, %v7261_v14 }
 0xf4b   : > { %v7949_v48 = vsel %vm7300_vm7, %v3627_v59, %v3628_v21 }
 0xf4c   : > { %v3209_v23 = vadd.f32 %v7859_v18, %v3199_v58 }
 0xf4e   : > { %v3214_v40 = vmax.f32 %v3209_v23, 0.0  ;;  %v3183_v29 = vpop.f32.mrb[36].mxu1  ;;  %v3413_v49 = vld [vmem:[#allocation2 + $0x10] sm:$0xff] }
 0xf4f   : > { %v3200_v7 = vmul.f32 %v7854_v12, %v3183_v29  ;;  %v3185_v1 = vpop.f32.mrb[37].mxu1  ;;  %v3464_v13 = vrot.slane %v3413_v49, %v7261_v14  ;;  %v3457_v19 = vcombine.high %v3413_v49, %v3413_v49  ;;  %v3689_v49 = vcombine.low %v3681_v30, %v3688_v26 }
 0xf50   : > { %v7924_v51 = vadd.f32 %v3214_v40, %v7305_v41  ;;  %v3973_v30 = vcombine.low %v7908_v44, %v7949_v48 }
 0xf51   : > { %v3210_v50 = vadd.f32 %v7859_v18, %v3200_v7  ;;  %v6027_v25 = vcombine.high %v7892_v34, %v3464_v13  ;;  %v7940_v35 = vrot.slane %v3457_v19, %v7261_v14  ;;  %v3883_v27 = vcombine.low %v7892_v34, %v3464_v13 }
 0xf52   : > { %v3261_v41 = vcombine.high %v7924_v51, %v7924_v51  ;;  %v3268_v54 = vrot.slane %v7924_v51, %v7261_v14  ;;  %v3472_v32 = vcombine.high %v3464_v13, %v3464_v13  ;;  %v6019_v39 = vrot.slane %v3464_v13, 9 }
 0xf53   : > { %v3215_v20 = vmax.f32 %v3210_v50, 0.0  ;;  %v3188_v53 = vpop.f32.mrb[38].mxu1  ;;  %v4076_v52 = vrot.slane %v6027_v25, %v7261_v14  ;;  %v3897_v61 = vrot.slane %v3883_v27, %v7261_v14  ;;  %v3981_v45 = vrot.slane %v3973_v30, %v7261_v14 }
 0xf54   : > { %v3275_v15 = vrot.slane %v3261_v41, %v7261_v14  ;;  %v3276_v10 = vcombine.high %v3268_v54, %v3268_v54  ;;  %v3349_v36 = vrot.slane %v3268_v54, %v7261_v14  ;;  %v3201_v34 = vmul.f32 %v7854_v12, %v3188_v53  ;;  %v3190_v28 = vpop.f32.mrb[39].mxu1 }
 0xf55   : > { %v7953_v43 = vadd.f32 %v3215_v20, %v7318_v9  ;;  %v4077_v58 = vcombine.low %v7920_v56, %v4076_v52  ;;  %v3898_v24 = vcombine.low %v3890_v42, %v3897_v61  ;;  %v3787_v60 = vcombine.low %v3472_v32, %v7940_v35 }
 0xf56   : > { %v3277_v22 = vcombine.high %v3275_v15, %v3275_v15  ;;  %v3350_v37 = vcombine.low %v3342_v6, %v3349_v36  ;;  %v3351_v11 = vcombine.low %v3276_v10, %v3275_v15  ;;  %v3211_v31 = vadd.f32 %v7859_v18, %v3201_v34 }
 0xf57   : > { %v3539_v23 = vcombine.low %v3464_v13, %v3472_v32  ;;  %v3278_v12 = vcombine.high %v7953_v43, %v7953_v43  ;;  %v3285_v9 = vrot.slane %v7953_v43, %v7261_v14  ;;  %4121 = vrot.lane.b32.xlu1 %v4077_v58, %s6579_s0  ;;  %3942 = vrot.lane.b32.xlu0 %v3898_v24, %s6578_s18  ;;  %v3635_v4 = vrot.slane %v3472_v32, 7 }
 0xf58   : > { %v3358_v16 = vrot.slane %v3351_v11, %v7261_v14  ;;  %v3365_v63 = vrot.slane %v3277_v22, %v7261_v14  ;;  %3407 = vst.msk [vmem:[#allocation2 + $0x19] sm:$0x3f] %vm9001_vm6, %v3350_v37  ;;  %v3216_v0 = vmax.f32 %v3211_v31, 0.0  ;;  %v7968_v21 = vrot.slane %v3787_v60, %v7261_v14 }
 0xf59   : > { %v3553_v18 = vrot.slane %v3539_v23, %v7261_v14  ;;  %v3292_v6 = vrot.slane %v3278_v12, %v7261_v14  ;;  %v3293_v29 = vcombine.high %v3285_v9, %v3285_v9  ;;  %v3794_v42 = vrot.slane %v3786_v2, %v7261_v14 }
 0xf5a   : > { %v3366_v40 = vcombine.low %v3358_v16, %v3365_v63  ;;  %v7975_v7 = vadd.f32 %v3216_v0, %v7342_v47  ;;  %v3636_v13 = vsel %vm7300_vm7, %v6019_v39, %v3635_v4  ;;  %v3637_v19 = vrot.slane %v3635_v4, 2 }
 0xf5b   : > { %v3554_v1 = vcombine.low %v7920_v56, %v3553_v18  ;;  %v3367_v59 = vcombine.low %v3285_v9, %v3293_v29  ;;  %v3294_v41 = vcombine.high %v3292_v6, %v3292_v6  ;;  %3749 = vrot.lane.b32.xlu0 %v3689_v49, %s6581_s19  ;;  %v3638_v2 = vrot.slane %v7940_v35, 7 }
 0xf5c   : > { %3408 = vst.msk [vmem:[#allocation2 + $0x21] sm:$0x3f] %vm9001_vm6, %v3366_v40  ;;  %v3301_v54 = vrot.slane %v7975_v7, %v7261_v14  ;;  %v3802_v47 = vcombine.low %v3794_v42, %v7968_v21  ;;  %v3632_v56 = vsel %vm7300_vm7, %v3630_v33, %v3631_v3  ;;  %v3381_v50 = vrot.slane %v3292_v6, %v7261_v14 }
 0xf5d   : > { %3603 = vst.msk [vmem:[#allocation3 + $0x10] sm:$0xff] %vm1476_vm15, %v3554_v1  ;;  %v3374_v26 = vrot.slane %v3367_v59, %v7261_v14  ;;  %v3974_v44 = vcombine.low %v3632_v56, %v3636_v13  ;;  %v7996_v27 = vsel %vm7300_vm7, %v3637_v19, %v3638_v2  ;;  %v3690_v3 = vcombine.low %v7949_v48, %v3632_v56 }
 0xf5e   : > { %v3302_v15 = vcombine.high %v3301_v54, %v3301_v54  ;;  %v3383_v10 = vcombine.low %v3294_v41, %v3301_v54  ;;  %v3609_v33 = vcombine.high %v7940_v35, %v7940_v35  ;;  %v3691_v34 = vcombine.low %v3636_v13, %v7996_v27 }
 0xf5f   : > { %v3414_v25 = vld [vmem:[#allocation2 + $0x18] sm:$0xff]  ;;  %v3382_v20 = vcombine.low %v3374_v26, %v3381_v50  ;;  %3847 = vrot.lane.b32.xlu0 %v3802_v47, %s6577_s29  ;;  %v3988_v48 = vrot.slane %v3974_v44, %v7261_v14  ;;  %v3640_v40 = vrot.slane %v3638_v2, 2 }
 0xf60   : > { %v3473_v36 = vcombine.high %v3414_v25, %v3414_v25  ;;  %v3480_v32 = vrot.slane %v3414_v25, %v7261_v14  ;;  %v3390_v53 = vrot.slane %v3383_v10, %v7261_v14  ;;  %v3397_v52 = vrot.slane %v3302_v15, %v7261_v14 }
 0xf61   : > { %3409 = vst.msk [vmem:[#allocation2 + $0x29] sm:$0x3f] %vm9001_vm6, %v3382_v20  ;;  %v3641_v29 = vrot.slane %v3609_v33, 7  ;;  %v4078_v42 = vcombine.low %v7940_v35, %v3609_v33  ;;  %v8050_v41 = vrot.slane %v3691_v34, %v7261_v14  ;;  %v3989_v30 = vcombine.low %v3981_v45, %v3988_v48 }
 0xf62   : > { %v6024_v61 = vcombine.high %v7940_v35, %v3480_v32  ;;  %v3555_v22 = vcombine.low %v7940_v35, %v3480_v32  ;;  %v8010_v37 = vrot.slane %v3473_v36, %v7261_v14  ;;  %v8012_v11 = vcombine.high %v3480_v32, %v3480_v32 }
 0xf63   : > { %v3415_v28 = vld [vmem:[#allocation2 + $0x20] sm:$0xff]  ;;  %v3398_v58 = vcombine.low %v3390_v53, %v3397_v52  ;;  %v6020_v1 = vrot.slane %v3480_v32, 9  ;;  %v8068_v50 = vsel %vm7300_vm7, %v3640_v40, %v3641_v29  ;;  %v4085_v25 = vrot.slane %v4078_v42, %v7261_v14 }
 0xf64   : > { %v8017_v24 = vrot.slane %v6024_v61, %v7261_v14  ;;  %v3563_v60 = vrot.slane %v3555_v22, %v7261_v14  ;;  %v3489_v16 = vcombine.high %v3415_v28, %v3415_v28  ;;  %v3556_v63 = vcombine.low %v8012_v11, %v8010_v37 }
 0xf65   : > { %v3899_v31 = vcombine.low %v3480_v32, %v8012_v11  ;;  %v8025_v23 = vcombine.high %v8010_v37, %v8010_v37  ;;  %v8028_v12 = vrot.slane %v3415_v28, %v7261_v14  ;;  %3410 = vst.msk [vmem:[#allocation2 + $0x31] sm:$0x3f] %vm9001_vm6, %v3398_v58  ;;  %v3645_v13 = vrot.slane %v8012_v11, 7 }
 0xf66   : > { %v4265_v9 = vcombine.low %v7968_v21, %v8017_v24  ;;  %v4158_v39 = vcombine.low %v3553_v18, %v3563_v60  ;;  %v8034_v4 = vrot.slane %v3489_v16, %v7261_v14  ;;  %v3570_v0 = vrot.slane %v3556_v63, %v7261_v14 }
 0xf67   : > { %v3906_v6 = vrot.slane %v3899_v31, %v7261_v14  ;;  %v8040_v49 = vcombine.high %v8028_v12, %v8028_v12  ;;  %v3804_v18 = vcombine.low %v8010_v37, %v8025_v23  ;;  %v8058_v47 = vsel %vm7300_vm7, %v6020_v1, %v3645_v13 }
 0xf68   : > { %4290 = vst.msk [vmem:[#allocation3 + $0x8] sm:$0xff] %vm1476_vm15, %v4265_v9  ;;  %4186 = vrot.lane.b32.xlu1 %v4158_v39, %s6580_s21  ;;  %v3571_v19 = vcombine.low %v3563_v60, %v3570_v0  ;;  %v3416_v35 = vld [vmem:[#allocation2 + $0x28] sm:$0xff]  ;;  %v3707_v10 = vcombine.low %v8068_v50, %v8058_v47  ;;  %v8083_v20 = vcombine.high %v8034_v4, %v8034_v4  ;;  %v3651_v61 = vrot.slane %v8025_v23, 7 }
 0xf69   : > { %v3907_v59 = vcombine.low %v7968_v21, %v3906_v6  ;;  %v3820_v2 = vcombine.low %v8040_v49, %v8034_v4  ;;  %v3572_v54 = vcombine.low %v8028_v12, %v8040_v49  ;;  %v3698_v21 = vrot.slane %v3690_v3, %v7261_v14 }
 0xf6a   : > { %3604 = vst.msk [vmem:[#allocation3 + $0x20] sm:$0xff] %vm1476_vm15, %v3571_v19  ;;  %v3505_v56 = vcombine.high %v3416_v35, %v3416_v35  ;;  %v8064_v26 = vrot.slane %v3416_v35, %v7261_v14  ;;  %v3818_v44 = vrot.slane %v3804_v18, %v7261_v14  ;;  %v4086_v45 = vcombine.low %v4085_v25, %v3570_v0 }
 0xf6b   : > { %3944 = vrot.lane.b32.xlu0 %v3907_v59, %s6578_s18  ;;  %v8074_v15 = vrot.slane %v3820_v2, %v7261_v14  ;;  %v3706_v36 = vcombine.low %v3698_v21, %v8050_v41  ;;  %v3580_v33 = vrot.slane %v3572_v54, %v7261_v14  ;;  %v3908_v53 = vcombine.low %v8010_v37, %v8028_v12 }
 0xf6c   : > { %4049 = vrot.lane.b32.xlu1 %v3989_v30, %s6582_s20  ;;  %v3573_v32 = vcombine.low %v8034_v4, %v8064_v26  ;;  %v8092_v22 = vrot.slane %v3505_v56, %v7261_v14  ;;  %v3819_v48 = vcombine.low %v8017_v24, %v3818_v44  ;;  %v8102_v34 = vrot.slane %v3707_v10, %v7261_v14  ;;  %v3417_v40 = vld [vmem:[#allocation2 + $0x30] sm:$0xff] }
 0xf6d   : > { %v4266_v3 = vcombine.low %v3818_v44, %v8074_v15  ;;  %v3647_v28 = vrot.slane %v3645_v13, 2  ;;  %v3648_v58 = vrot.slane %v8010_v37, 7  ;;  %v6025_v16 = vcombine.high %v8034_v4, %v8064_v26 }
 0xf6e   : > { %v8095_v11 = vrot.slane %v3573_v32, %v7261_v14  ;;  %v4088_v63 = vcombine.low %v8034_v4, %v8083_v20  ;;  %v8112_v31 = vcombine.high %v8064_v26, %v8064_v26  ;;  %v4159_v24 = vcombine.low %v3570_v0, %v3580_v33 }
 0xf6f   : > { %3751 = vrot.lane.b32.xlu0 %v3706_v36, %s6581_s19  ;;  %v4296_v52 = vld [vmem:[#allocation3 + $0x8] sm:$0xff]  ;;  %4291 = vst.msk [vmem:[#allocation3 + $0x18] sm:$0xff] %vm1476_vm15, %v4266_v3  ;;  %v3915_v23 = vrot.slane %v3908_v53, %v7261_v14  ;;  %v3649_v9 = vsel %vm7300_vm7, %v3647_v28, %v3648_v58  ;;  %v3650_v39 = vrot.slane %v3648_v58, 2  ;;  %v6028_v6 = vcombine.high %v8010_v37, %v8028_v12 }
 0xf70   : > { %6032 = vmatprep.mubr.msk.f32.mxu0 %vm1476_vm15, %v4296_v52  ;;  %4123 = vrot.lane.b32.xlu1 %v4086_v45, %s6579_s0  ;;  %v3588_v60 = vcombine.low %v3580_v33, %v8095_v11  ;;  %v3589_v29 = vcombine.low %v8112_v31, %v8092_v22  ;;  %v3655_v42 = vrot.slane %v8040_v49, 7  ;;  %v4217_v18 = vcombine.low %v8050_v41, %v8102_v34 }
 0xf71   : > { %v3916_v0 = vcombine.low %v3915_v23, %v8074_v15  ;;  %v3991_v1 = vcombine.low %v8058_v47, %v3649_v9  ;;  %v3835_v13 = vrot.slane %v6025_v16, %v7261_v14  ;;  %v4102_v19 = vrot.slane %v4088_v63, %v7261_v14  ;;  %v8148_v47 = vld.sshfl [vmem:[#allocation2 + $0x38] sm:$0xff pattern:$0x76325410] }
 0xf72   : > { %3605 = vst.msk [vmem:[#allocation3 + $0x30] sm:$0xff] %vm1476_vm15, %v3588_v60  ;;  %v8132_v37 = vrot.slane %v3589_v29, %v7261_v14  ;;  %v3866_v59 = vcombine.high %v3417_v40, %v3417_v40  ;;  %v3990_v49 = vcombine.low %v7996_v27, %v8068_v50  ;;  %v8138_v30 = vsel %vm7300_vm7, %v3650_v39, %v3651_v61 }
 0xf73   : > { %3849 = vrot.lane.b32.xlu0 %v3819_v48, %s6577_s29  ;;  %v8141_v2 = vrot.slane %v3417_v40, %v7261_v14  ;;  %v3658_v41 = vrot.slane %v8034_v4, 7  ;;  %v4095_v54 = vrot.slane %v6028_v6, %v7261_v14  ;;  %v3657_v35 = vrot.slane %v3655_v42, 2 }
 0xf74   : > { %4188 = vrot.lane.b32.xlu1 %v4159_v24, %s6580_s21  ;;  %3606 = vst.msk [vmem:[#allocation3 + $0x40] sm:$0xf] %vm9002_vm8, %v8132_v37  ;;  %v3661_v27 = vrot.slane %v8083_v20, 7  ;;  %v4005_v21 = vrot.slane %v3991_v1, %v7261_v14  ;;  %v8155_v56 = vcombine.high %v8092_v22, %v8092_v22  ;;  %v3836_v4 = vcombine.low %v8074_v15, %v3835_v13 }
 0xf75   : > { %v4103_v50 = vcombine.low %v4095_v54, %v4102_v19  ;;  %v3708_v25 = vcombine.low %v3649_v9, %v8138_v30  ;;  %v8160_v44 = vrot.slane %v3866_v59, %v7261_v14  ;;  %v3998_v10 = vrot.slane %v3990_v49, %v7261_v14 }
 0xf76   : > { %v6021_v36 = vrot.slane %v8028_v12, 9  ;;  %v6029_v32 = vcombine.high %v8092_v22, %v8141_v2  ;;  %v3660_v20 = vrot.slane %v3658_v41, 2  ;;  %v3659_v45 = vsel %vm7300_vm7, %v3657_v35, %v3658_v41 }
 0xf77   : > { %3946 = vrot.lane.b32.xlu0 %v3916_v0, %s6578_s18  ;;  %v3837_v15 = vcombine.low %v8092_v22, %v8155_v56  ;;  %v8173_v3 = vcombine.high %v8141_v2, %v8141_v2  ;;  %v6031_v33 = vcombine.high %v8160_v44, %v8148_v47  ;;  %v4006_v12 = vcombine.low %v3998_v10, %v4005_v21 }
 0xf78   : > { %4245 = vrot.lane.b32.xlu1 %v4217_v18, %s6583_s22  ;;  %v3656_v53 = vsel %vm7300_vm7, %v6021_v36, %v3655_v42  ;;  %v3917_v52 = vcombine.low %v8064_v26, %v8112_v31  ;;  %v3918_v61 = vcombine.low %v8092_v22, %v8141_v2  ;;  %v3722_v48 = vrot.slane %v3708_v25, %v7261_v14 }
 0xf79   : > { %v3844_v28 = vrot.slane %v3837_v15, %v7261_v14  ;;  %v3934_v58 = vcombine.low %v8173_v3, %v8160_v44  ;;  %v4275_v60 = vrot.slane %v6031_v33, %v7261_v14  ;;  %v4160_v16 = vcombine.low %v8095_v11, %v8132_v37 }
 0xf7a   : > { %v4111_v63 = vrot.slane %v6029_v32, %v7261_v14  ;;  %v3724_v24 = vcombine.low %v3656_v53, %v3659_v45  ;;  %v8194_v23 = vsel %vm7300_vm7, %v3660_v20, %v3661_v27  ;;  %v3665_v40 = vrot.slane %v8112_v31, 7 }
 0xf7b   : > { %3851 = vrot.lane.b32.xlu0 %v3836_v4, %s6577_s29  ;;  %v4267_v9 = vcombine.low %v3835_v13, %v3844_v28  ;;  %v8198_v39 = vrot.slane %v3934_v58, %v7261_v14  ;;  %v3668_v6 = vrot.slane %v8092_v22, 7  ;;  %v3723_v11 = vcombine.low %v8102_v34, %v3722_v48  ;;  %v4305_v22 = vld [vmem:[%s8986_s9] sm:$0xff]  ;;  %v4306_v34 = vld [vmem:[%s8986_s9 + $0x8] sm:$0xff] }
 0xf7c   : > { %4125 = vrot.lane.b32.xlu1 %v4103_v50, %s6579_s0  ;;  %v3925_v29 = vrot.slane %v3917_v52, %v7261_v14  ;;  %v3932_v42 = vrot.slane %v3918_v61, %v7261_v14  ;;  %v4112_v18 = vcombine.low %v8132_v37, %v4111_v63  ;;  %v8210_v1 = vrot.slane %v3724_v24, %v7261_v14 }
 0xf7d   : > { %4292 = vst.msk [vmem:[#allocation3 + $0x28] sm:$0xff] %vm1476_vm15, %v4267_v9  ;;  %v4276_v0 = vcombine.low %v8198_v39, %v4275_v60  ;;  %v4008_v31 = vcombine.low %v3659_v45, %v8194_v23  ;;  %v3671_v13 = vrot.slane %v8155_v56, 7  ;;  %v3667_v19 = vrot.slane %v3665_v40, 2 }
 0xf7e   : > { %v3670_v37 = vrot.slane %v3668_v6, 2  ;;  %v4007_v59 = vcombine.low %v8138_v30, %v3656_v53  ;;  %v6022_v49 = vrot.slane %v8064_v26, 9  ;;  %v8227_v41 = vcombine.high %v8148_v47, %v8148_v47  ;;  %v4307_v30 = vld [vmem:[%s8986_s9 + $0x10] sm:$0xff]  ;;  %v4308_v26 = vld [vmem:[%s8986_s9 + $0x18] sm:$0xff]  ;;  %v4309_v53 = vld [vmem:[%s8986_s9 + $0x20] sm:$0xff] }
 0xf7f   : > { %4051 = vrot.lane.b32.xlu0 %v4006_v12, %s6582_s20  ;;  %4293 = vst.msk [vmem:[#allocation3 + $0x38] sm:$0xff] %vm1476_vm15, %v4276_v0  ;;  %v3933_v54 = vcombine.low %v3925_v29, %v3932_v42  ;;  %v4161_v35 = vcombine.low %v8141_v2, %v8173_v3  ;;  %v4162_v27 = vcombine.low %v8160_v44, %v8148_v47  ;;  %v3965_v32 = vrot.slane %v8173_v3, 7  ;;  %v4310_v3 = vld [vmem:[%s8986_s9 + $0x28] sm:$0xff] }
 0xf80   : > { %4190 = vrot.lane.b32.xlu1 %v4160_v16, %s6580_s21  ;;  %v6412_v21 = vpack.c.bf16 %v4306_v34, %v4305_v22  ;;  %v4218_v56 = vcombine.low %v3722_v48, %v8210_v1  ;;  %v4022_v4 = vrot.slane %v4008_v31, %v7261_v14  ;;  %v3666_v50 = vsel %vm7300_vm7, %v6022_v49, %v3665_v40  ;;  %v4312_v40 = vld [vmem:[%s8986_s9 + $0x38] sm:$0xff] }
 0xf81   : > { %v8245_v25 = vcombine.high %v8160_v44, %v8160_v44  ;;  %v3669_v10 = vsel %vm7300_vm7, %v3667_v19, %v3668_v6  ;;  %v3672_v36 = vsel %vm7300_vm7, %v3670_v37, %v3671_v13  ;;  %v3968_v20 = vrot.slane %v8160_v44, 7  ;;  %v4314_v13 = vld [vmem:[%s8986_s9 + $0x48] sm:$0xff] }
 0xf82   : > { %v4015_v45 = vrot.slane %v4007_v59, %v7261_v14  ;;  %6413 = vmatpush1.bf16.msra.mxu0 %v6412_v21  ;;  %v6415_v15 = vpack.c.bf16 %v4308_v26, %v4307_v30  ;;  %v3725_v33 = vcombine.low %v8194_v23, %v3666_v50  ;;  %v6030_v12 = vrot.slane %v8148_v47, 9  ;;  %v4315_v21 = vld [vmem:[%s8986_s9 + $0x50] sm:$0xff]  ;;  %v4316_v30 = vld [vmem:[%s8986_s9 + $0x58] sm:$0xff] }
 0xf83   : > { %3753 = vrot.lane.b32.xlu0 %v3723_v11, %s6581_s19  ;;  %6414 = vmatprep.subr.bf16.mxu0 %v6570_v5  ;;  %v4169_v61 = vrot.slane %v4161_v35, %v7261_v14  ;;  %v4176_v48 = vrot.slane %v4162_v27, %v7261_v14  ;;  %v3741_v58 = vcombine.low %v3669_v10, %v3672_v36  ;;  %v3967_v60 = vrot.slane %v3965_v32, 2 }
 0xf84   : > { %4127 = vrot.lane.b32.xlu1 %v4112_v18, %s6579_s0  ;;  %v4023_v52 = vcombine.low %v4015_v45, %v4022_v4  ;;  %v3970_v47 = vrot.slane %v3968_v20, 2  ;;  %v3971_v16 = vrot.slane %v8245_v25, 7  ;;  %v4209_v63 = vrot.slane %v8227_v41, 7  ;;  %v4317_v45 = vld [vmem:[%s8986_s9 + $0x60] sm:$0xff] }
 0xf85   : > { %v6026_v24 = vrot.slane %v8141_v2, 9  ;;  %v6418_v23 = vpack.c.bf16 %v4310_v3, %v4309_v53  ;;  %v3739_v9 = vrot.slane %v3725_v33, %v7261_v14  ;;  %v4177_v6 = vcombine.low %v4169_v61, %v4176_v48  ;;  %v4319_v53 = vld [vmem:[%s8986_s9 + $0x70] sm:$0xff] }
 0xf86   : > { %6416 = vmatpush1.bf16.msra.mxu0 %v6415_v15  ;;  %v3748_v11 = vrot.slane %v3741_v58, %v7261_v14  ;;  %v3969_v29 = vsel %vm7300_vm7, %v3967_v60, %v3968_v20  ;;  %v3972_v42 = vsel %vm7300_vm7, %v3970_v47, %v3971_v16  ;;  %v4210_v0 = vsel %vm7300_vm7, %v6030_v12, %v4209_v63  ;;  %v8330_v15 = vld [vmem:[#allocation2 + $0x38] sm:$0xff]  ;;  %v4321_v58 = vld [vmem:[%s8986_s9 + $0x80] sm:$0xff]  ;;  %v4322_v60 = vld [vmem:[%s8986_s9 + $0x88] sm:$0xff] }
 0xf87   : > { %3948 = vrot.lane.b32.xlu0 %v3933_v54, %s6578_s18  ;;  %6417 = vmatprep.subr.bf16.mxu0 %v6570_v5  ;;  %v3966_v2 = vsel %vm7300_vm7, %v6026_v24, %v3965_v32  ;;  %v3740_v31 = vcombine.low %v8210_v1, %v3739_v9  ;;  %v4024_v22 = vcombine.low %v3666_v50, %v3669_v10  ;;  %v4211_v1 = vrot.slane %v4209_v63, 2  ;;  %v8367_v24 = vld [vmem:[#allocation3 + $0x48] sm:$0xf] }
 0xf88   : > { %4247 = vrot.lane.b32.xlu1 %v4218_v56, %s6583_s22  ;;  %v4025_v34 = vcombine.low %v3672_v36, %v3966_v2  ;;  %v4219_v19 = vcombine.low %v3739_v9, %v3748_v11  ;;  %v4041_v37 = vcombine.low %v3969_v29, %v3972_v42  ;;  %v4220_v59 = vcombine.low %v3966_v2, %v3969_v29 }
 0xf89   : > { %v4221_v49 = vcombine.low %v3972_v42, %v4210_v0  ;;  %v4032_v35 = vrot.slane %v4024_v22, %v7261_v14  ;;  %v4178_v50 = vcombine.low %v8227_v41, %v7702_v62  ;;  %v4213_v10 = vsel %vm7300_vm7, %v4211_v1, %v7739_v46  ;;  %v4318_v62 = vld [vmem:[%s8986_s9 + $0x68] sm:$0xff] }
 0xf8a   : > { %6419 = vmatpush1.bf16.msra.mxu0 %v6418_v23  ;;  %v4039_v27 = vrot.slane %v4025_v34, %v7261_v14  ;;  %v4048_v26 = vrot.slane %v4041_v37, %v7261_v14  ;;  %v4228_v56 = vrot.slane %v4220_v59, %v7261_v14  ;;  %v6427_v36 = vpack.c.bf16 %v4316_v30, %v4315_v21 }
 0xf8b   : > { %3853 = vrot.lane.b32.xlu0 %v3844_v28, %s6577_s29  ;;  %v4311_v28 = vld [vmem:[%s8986_s9 + $0x30] sm:$0xff]  ;;  %6420 = vmatprep.subr.bf16.mxu0 %v6570_v5  ;;  %v4235_v4 = vrot.slane %v4221_v49, %v7261_v14  ;;  %v4113_v20 = vcombine.low %v8160_v44, %v8245_v25  ;;  %v4237_v46 = vcombine.low %v4213_v10, %v7782_v38  ;;  %v4320_v38 = vld [vmem:[%s8986_s9 + $0x78] sm:$0xff]  ;;  %vm9012_vm6 = vcmask 523648  }
 0xf8c   : > { %4053 = vrot.lane.b32.xlu1 %v4023_v52, %s6582_s20  ;;  %v6421_v18 = vpack.c.bf16 %v4312_v40, %v4311_v28  ;;  %v4040_v32 = vcombine.low %v4032_v35, %v4039_v27  ;;  %v5378_v44 = vcombine.high %v8330_v15, %v8330_v15  ;;  %v4185_v25 = vrot.slane %v4178_v50, %v7261_v14  ;;  %v4298_v49 = vld [vmem:[#allocation3 + $0x18] sm:$0xff]  ;;  %v4300_v50 = vld [vmem:[#allocation3 + $0x28] sm:$0xff] }
 0xf8d   : > { %v4236_v41 = vcombine.low %v4228_v56, %v4235_v4  ;;  %v6430_v33 = vpack.c.bf16 %v4318_v62, %v4317_v45  ;;  %v4120_v12 = vrot.slane %v4113_v20, %v7261_v14  ;;  %v4244_v52 = vrot.slane %v4237_v46, %v7261_v14  ;;  %v4302_v46 = vld [vmem:[#allocation3 + $0x38] sm:$0xff] }
 0xf8e   : > { %6422 = vmatpush1.bf16.msra.mxu0 %v6421_v18  ;;  %v8347_v3 = vrot.slane %v5378_v44, %v7261_v14  ;;  %v6433_v48 = vpack.c.bf16 %v4320_v38, %v4319_v53  ;;  %v6436_v63 = vpack.c.bf16 %v4322_v60, %v4321_v58  ;;  %v8414_v38 = vld [vmem:[%s8987_s10] ss:$0 sm:$0xff] }
 0xf8f   : > { %3950 = vrot.lane.b32.xlu0 %v8198_v39, %s6578_s18  ;;  %v4313_v39 = vld [vmem:[%s8986_s9 + $0x40] sm:$0xff]  ;;  %6423 = vmatprep.subr.bf16.mxu0 %v6570_v5 }
 0xf90   : > { %4192 = vrot.lane.b32.xlu1 %v4177_v6, %s6580_s21  ;;  %v6424_v54 = vpack.c.bf16 %v4314_v13, %v4313_v39  ;;  %v8353_v61 = vcombine.high %v8347_v3, %v8347_v3 }
 0xf92   : > { %6425 = vmatpush1.bf16.msra.mxu0 %v6424_v54  ;;  %v5513_v47 = vcombine.low %v8347_v3, %v8353_v61 }
 0xf93   : > { %3755 = vrot.lane.b32.xlu0 %v3740_v31, %s6581_s19  ;;  %6426 = vmatprep.subr.bf16.mxu0 %v6570_v5 }
 0xf94   : > { %4249 = vrot.lane.b32.xlu1 %v4219_v19, %s6583_s22  ;;  %v5520_v16 = vrot.slane %v5513_v47, %v7261_v14 }
 0xf96   : > { %6428 = vmatpush1.bf16.msra.mxu0 %v6427_v36  ;;  %5530 = vst.msk [vmem:[#allocation3 + $0x48] sm:$0xf] %vm9002_vm8, %v5520_v16  ;;  %vm9013_vm8 = vmmov %vm9012_vm6 }
 0xf97   : > { %3757 = vrot.lane.b32.xlu0 %v3748_v11, %s6581_s19  ;;  %6429 = vmatprep.subr.bf16.mxu0 %v6570_v5 }
 0xf98   : > { %4057 = vrot.lane.b32.xlu1 %v4048_v26, %s6582_s20 }
 0xf9a   : > { %6431 = vmatpush1.bf16.msra.mxu0 %v6430_v33 }
 0xf9b   : > { %4055 = vrot.lane.b32.xlu0 %v4040_v32, %s6582_s20  ;;  %6432 = vmatprep.subr.bf16.mxu0 %v6570_v5 }
 0xf9c   : > { %4251 = vrot.lane.b32.xlu1 %v4236_v41, %s6583_s22 }
 0xf9e   : > { %6434 = vmatpush1.bf16.msra.mxu0 %v6433_v48  ;;  %v8419_v48 = vld [vmem:[%s8987_s10 + $0x1] ss:$0 sm:$0xff] }
 0xf9f   : > { %4129 = vrot.lane.b32.xlu0 %v4120_v12, %s6579_s0  ;;  %6435 = vmatprep.subr.bf16.mxu0 %v6570_v5 }
 0xfa0   : > { %4194 = vrot.lane.b32.xlu1 %v4185_v25, %s6580_s21 }
 0xfa2   : > { %6437 = vmatpush1.bf16.msra.mxu0 %v6436_v63 }
 0xfa3   : > { %4253 = vrot.lane.b32.xlu0 %v4244_v52, %s6583_s22 }
 0xfbb   : > { %v3846_v28 = vpop.permute.xlu1 %3845 }
 0xfc9   : > { %v3943_v23 = vpop.permute.xlu0 %3942  ;;  %v4122_v40 = vpop.permute.xlu1 %4121 }
 0xfcd   : > { %v3750_v9 = vpop.permute.xlu0 %3749 }
 0xfce   : > { %3764 = vst.msk [vmem:[#allocation3] sm:$0xff] %vm2514_vm10, %v3750_v9  ;;  %v4647_v9 = vld [vmem:[#allocation2] sm:$0xff] }
 0xfcf   : > { %3860 = vst.msk [vmem:[#allocation3] sm:$0xff] %vm2612_vm12, %v3846_v28 }
 0xfd0   : > { %3957 = vst.msk [vmem:[#allocation3] sm:$0xff] %vm9012_vm6, %v3943_v23 }
 0xfd1   : > { %v3848_v6 = vpop.permute.xlu0 %3847 }
 0xfda   : > { %v4187_v11 = vpop.permute.xlu1 %4186 }
 0xfdd   : > { %v3945_v2 = vpop.permute.xlu0 %3944 }
 0xfde   : > { %v4050_v29 = vpop.permute.xlu1 %4049 }
 0xfdf   : > { %4064 = vst.msk [vmem:[#allocation3] sm:$0xff] %vm2820_vm1, %v4050_v29 }
 0xfe0   : > { %4136 = vst.msk [vmem:[#allocation3] sm:$0xff] %vm2894_vm2, %v4122_v40 }
 0xfe1   : > { %4201 = vst.msk [vmem:[#allocation3] sm:$0xff] %vm2961_vm3, %v4187_v11  ;;  %v3752_v42 = vpop.permute.xlu0 %3751 }
 0xfe2   : > { %3765 = vst.msk [vmem:[#allocation3 + $0x10] sm:$0xff] %vm2514_vm10, %v3752_v42  ;;  %v4124_v0 = vpop.permute.xlu1 %4123 }
 0xfe3   : > { %3861 = vst.msk [vmem:[#allocation3 + $0x10] sm:$0xff] %vm2612_vm12, %v3848_v6  ;;  %v8427_v6 = vrot.slane %v4647_v9, %v7261_v14 }
 0xfe4   : > { %3958 = vst.msk [vmem:[#allocation3 + $0x10] sm:$0xff] %vm9013_vm8, %v3945_v2  ;;  %vm9014_vm8 = vmmov %vm9012_vm6  ;;  %v4661_v2 = vcombine.high %v4647_v9, %v4647_v9 }
 0xfe5   : > { %v3850_v18 = vpop.permute.xlu0 %3849 }
 0xfe6   : > { %v4189_v31 = vpop.permute.xlu1 %4188 }
 0xfe9   : > { %v3947_v22 = vpop.permute.xlu0 %3946 }
 0xfea   : > { %v4246_v34 = vpop.permute.xlu1 %4245 }
 0xfeb   : > { %4260 = vst.msk [vmem:[#allocation3] sm:$0xff] %vm3022_vm4, %v4246_v34  ;;  %v8435_v34 = vrot.slane %v4661_v2, %v7261_v14 }
 0xfed   : > { %v3852_v39 = vpop.permute.xlu0 %3851 }
 0xfee   : > { %v4126_v13 = vpop.permute.xlu1 %4125 }
 0xff1   : > { %v4052_v19 = vpop.permute.xlu0 %4051 }
 0xff2   : > { %4065 = vst.msk [vmem:[#allocation3 + $0x10] sm:$0xff] %vm2820_vm1, %v4052_v19  ;;  %v4191_v37 = vpop.permute.xlu1 %4190  ;;  %v4295_v59 = vld [vmem:[#allocation3] sm:$0xff] }
 0xff3   : > { %4137 = vst.msk [vmem:[#allocation3 + $0x10] sm:$0xff] %vm2894_vm2, %v4124_v0  ;;  %4403 = vmatmul.mubr.f32.vlgmr.msra.gmra.mrb[32].mxu0 %v4295_v59  ;;  %v4854_v59 = vrot.slane %v8435_v34, 7 }
 0xff4   : > { %4202 = vst.msk [vmem:[#allocation3 + $0x10] sm:$0xff] %vm2961_vm3, %v4189_v31  ;;  %6033 = vmatprep.mubr.msk.f32.mxu0 %vm1476_vm15, %v4298_v49  ;;  %v5541_v49 = vld [vmem:[%s8986_s9] sm:$0xff] }
 0xff5   : > { %v3754_v1 = vpop.permute.xlu0 %3753 }
 0xff6   : > { %3766 = vst.msk [vmem:[#allocation3 + $0x20] sm:$0xff] %vm2514_vm10, %v3754_v1  ;;  %v4128_v54 = vpop.permute.xlu1 %4127  ;;  %v5542_v1 = vld [vmem:[%s8986_s9 + $0x8] sm:$0xff] }
 0xff7   : > { %3862 = vst.msk [vmem:[#allocation3 + $0x20] sm:$0xff] %vm2612_vm12, %v3850_v18 }
 0xff8   : > { %3959 = vst.msk [vmem:[#allocation3 + $0x20] sm:$0xff] %vm9012_vm6, %v3947_v22  ;;  %vm9015_vm6 = vcmask 257152  }
 0xff9   : > { %v3949_v35 = vpop.permute.xlu0 %3948 }
 0xffa   : > { %v4248_v27 = vpop.permute.xlu1 %4247 }
 0xffb   : > { %4261 = vst.msk [vmem:[#allocation3 + $0x10] sm:$0xff] %vm3022_vm4, %v4248_v27 }
 0xffd   : > { %v3854_v21 = vpop.permute.xlu0 %3853 }
 0xffe   : > { %v4054_v30 = vpop.permute.xlu1 %4053 }
 0xfff   : > { %4066 = vst.msk [vmem:[#allocation3 + $0x20] sm:$0xff] %vm2820_vm1, %v4054_v30 }
0x1000   : > { %4138 = vst.msk [vmem:[#allocation3 + $0x20] sm:$0xff] %vm2894_vm2, %v4126_v13 }
0x1001   : > { %4203 = vst.msk [vmem:[#allocation3 + $0x20] sm:$0xff] %vm2961_vm3, %v4191_v37  ;;  %v3951_v26 = vpop.permute.xlu0 %3950  ;;  %v4843_v37 = vcombine.high %v8435_v34, %v8435_v34 }
0x1002   : > { %v4193_v56 = vpop.permute.xlu1 %4192  ;;  %v4297_v4 = vld [vmem:[#allocation3 + $0x10] sm:$0xff] }
0x1003   : > { %4408 = vmatmul.mubr.f32.gmra.mrb[34].mxu0 %v4297_v4 }
0x1004   : > { %6034 = vmatprep.mubr.msk.f32.mxu0 %vm1476_vm15, %v4300_v50 }
0x1005   : > { %v3756_v10 = vpop.permute.xlu0 %3755 }
0x1006   : > { %3767 = vst.msk [vmem:[#allocation3 + $0x30] sm:$0xff] %vm2514_vm10, %v3756_v10  ;;  %v4250_v36 = vpop.permute.xlu1 %4249  ;;  %v4856_v10 = vrot.slane %v4854_v59, 2 }
0x1007   : > { %3863 = vst.msk [vmem:[#allocation3 + $0x30] sm:$0xff] %vm2612_vm12, %v3852_v39 }
0x1008   : > { %4262 = vst.msk [vmem:[#allocation3 + $0x20] sm:$0xff] %vm3022_vm4, %v4250_v36  ;;  %v4857_v36 = vrot.slane %v4843_v37, 7 }
0x1009   : > { %3960 = vst.msk [vmem:[#allocation3 + $0x30] sm:$0xff] %vm9014_vm8, %v3949_v35  ;;  %v3758_v32 = vpop.permute.xlu0 %3757  ;;  %vm9018_vm8 = vcmask 128000   ;;  %v6439_v35 = vpack.c.bf16 %v5542_v1, %v5541_v49  ;;  %v5543_v1 = vld [vmem:[%s8986_s9 + $0x10] sm:$0xff] }
0x100a   : > { %3768 = vst.msk [vmem:[#allocation3 + $0x40] sm:$0xf] %vm9015_vm6, %v3758_v32  ;;  %v4058_v20 = vpop.permute.xlu1 %4057  ;;  %v4858_v9 = vsel %vm7300_vm7, %v4856_v10, %v4857_v36  ;;  %vm9019_vm6 = vmmov %vm9018_vm8 }
0x100b   : > { %3864 = vst.msk [vmem:[#allocation3 + $0x40] sm:$0xf] %vm2617_vm0, %v3854_v21  ;;  %v6039_v21 = vrot.slane %v8427_v6, 9  ;;  %6440 = vmatpush1.bf16.msra.mxu1 %v6439_v35 }
0x100c   : > { %3961 = vst.msk [vmem:[#allocation3 + $0x40] sm:$0xf] %vm2716_vm9, %v3951_v26  ;;  %6441 = vmatprep.subr.bf16.mxu1 %v6570_v5 }
0x100d   : > { %4068 = vst.msk [vmem:[#allocation3 + $0x40] sm:$0xf] %vm9016_vm11, %v4058_v20  ;;  %v4056_v45 = vpop.permute.xlu0 %4055  ;;  %vm9017_vm11 = vcmask 1044352  }
0x100e   : > { %4067 = vst.msk [vmem:[#allocation3 + $0x30] sm:$0xff] %vm2820_vm1, %v4056_v45  ;;  %v4252_v62 = vpop.permute.xlu1 %4251 }
0x100f   : > { %v4299_v41 = vld [vmem:[#allocation3 + $0x20] sm:$0xff]  ;;  %4139 = vst.msk [vmem:[#allocation3 + $0x30] sm:$0xff] %vm2894_vm2, %v4128_v54 }
0x1010   : > { %4413 = vmatmul.mubr.f32.gmra.mrb[36].mxu0 %v4299_v41  ;;  %4204 = vst.msk [vmem:[#allocation3 + $0x30] sm:$0xff] %vm2961_vm3, %v4193_v56 }
0x1011   : > { %6035 = vmatprep.mubr.msk.f32.mxu0 %vm1476_vm15, %v4302_v46  ;;  %4263 = vst.msk [vmem:[#allocation3 + $0x30] sm:$0xff] %vm3022_vm4, %v4252_v62  ;;  %v4130_v44 = vpop.permute.xlu0 %4129 }
0x1012   : > { %4140 = vst.msk [vmem:[#allocation3 + $0x40] sm:$0xf] %vm2899_vm5, %v4130_v44  ;;  %v4195_v25 = vpop.permute.xlu1 %4194 }
0x1013   : > { %4205 = vst.msk [vmem:[#allocation3 + $0x40] sm:$0xf] %vm2966_vm14, %v4195_v25 }
0x1015   : > { %v4254_v33 = vpop.permute.xlu0 %4253 }
0x1016   : > { %4264 = vst.msk [vmem:[#allocation3 + $0x40] sm:$0xf] %vm9017_vm11, %v4254_v33  ;;  %vm9020_vm11 = vmmov %vm9019_vm6 }
0x1018   : > { %v4301_v12 = vld [vmem:[#allocation3 + $0x30] sm:$0xff] }
0x1019   : > { %4418 = vmatmul.mubr.f32.gmra.mrb[38].mxu0 %v4301_v12 }
0x101a   : > { %6036 = vmatprep.mubr.msk.f32.mxu0 %vm1476_vm15, %v8367_v24 }
0x101d   : > { %v4303_v53 = vld [vmem:[#allocation3 + $0x40] sm:$0xf] }
0x101e   : > { %4423 = vmatmul.mubr.f32.gmra.mrb[40].mxu0 %v4303_v53 }
0x10c6   : > { %v4404_v52 = vpop.f32.mrb[32].mxu0 }
0x10c7   : > { %v4433_v58 = vmul.f32 %v8414_v38, %v4404_v52  ;;  %v4406_v60 = vpop.f32.mrb[33].mxu0 }
0x10c9   : > { %v4443_v47 = vadd.f32 %v8419_v48, %v4433_v58 }
0x10cb   : > { %v4448_v16 = vmax.f32 %v4443_v47, 0.0 }
0x10cd   : > { %v4453_v63 = vadd.f32 %v4448_v16, %v7864_v57  ;;  %v4676_v57 = vcombine.high %v8427_v6, %v8427_v6 }
0x10cf   : > { %v4463_v24 = vcombine.high %v4453_v63, %v4453_v63  ;;  %v4470_v23 = vrot.slane %v4453_v63, %v7261_v14  ;;  %v4851_v13 = vrot.slane %v4676_v57, 7  ;;  %v5005_v27 = vcombine.low %v4676_v57, %v8435_v34 }
0x10d0   : > { %v4757_v63 = vcombine.low %v8427_v6, %v4676_v57 }
0x10d1   : > { %v4477_v28 = vrot.slane %v4463_v24, %v7261_v14  ;;  %v4478_v40 = vcombine.high %v4470_v23, %v4470_v23  ;;  %v4853_v30 = vrot.slane %v4851_v13, 2  ;;  %v5013_v41 = vrot.slane %v5005_v27, %v7261_v14 }
0x10d2   : > { %v4852_v44 = vsel %vm7300_vm7, %v6039_v21, %v4851_v13 }
0x10d3   : > { %v4539_v11 = vcombine.low %v4470_v23, %v4478_v40  ;;  %v4553_v42 = vrot.slane %v4477_v28, %v7261_v14  ;;  %v4479_v26 = vcombine.high %v4477_v28, %v4477_v28  ;;  %v4855_v25 = vsel %vm7300_vm7, %v4853_v30, %v4854_v59 }
0x10d4   : > { %v4909_v28 = vcombine.low %v4852_v44, %v4855_v25 }
0x10d5   : > { %v4546_v29 = vrot.slane %v4539_v11, %v7261_v14 }
0x10d6   : > { %v4409_v0 = vpop.f32.mrb[34].mxu0 }
0x10d7   : > { %v4554_v18 = vcombine.low %v4546_v29, %v4553_v42  ;;  %v4434_v31 = vmul.f32 %v8414_v38, %v4409_v0  ;;  %v4411_v22 = vpop.f32.mrb[35].mxu0 }
0x10d8   : > { %v4765_v22 = vrot.slane %v4757_v63, %v7261_v14 }
0x10d9   : > { %4641 = vst.msk [vmem:[#allocation2 + $0x9] sm:$0x3f] %vm9018_vm8, %v4554_v18  ;;  %v4444_v39 = vadd.f32 %v8419_v48, %v4434_v31  ;;  %vm9021_vm8 = vmmov %vm9019_vm6 }
0x10db   : > { %v4449_v19 = vmax.f32 %v4444_v39, 0.0 }
0x10dd   : > { %v4454_v54 = vadd.f32 %v4449_v19, %v7879_v17  ;;  %v4917_v19 = vrot.slane %v4909_v28, %v7261_v14 }
0x10df   : > { %v4480_v56 = vcombine.high %v4454_v54, %v4454_v54  ;;  %v4487_v4 = vrot.slane %v4454_v54, %v7261_v14 }
0x10e0   : > { %v4648_v50 = vld [vmem:[#allocation2 + $0x8] sm:$0xff] }
0x10e1   : > { %v4494_v32 = vrot.slane %v4480_v56, %v7261_v14  ;;  %v4495_v20 = vcombine.high %v4487_v4, %v4487_v4  ;;  %v4555_v17 = vcombine.low %v4479_v26, %v4487_v4  ;;  %v4684_v45 = vrot.slane %v4648_v50, %v7261_v14 }
0x10e2   : > { %v4677_v46 = vcombine.high %v4648_v50, %v4648_v50 }
0x10e3   : > { %v4414_v62 = vpop.f32.mrb[36].mxu0  ;;  %v4496_v33 = vcombine.high %v4494_v32, %v4494_v32  ;;  %v4562_v12 = vrot.slane %v4555_v17, %v7261_v14  ;;  %v4569_v53 = vrot.slane %v4495_v20, %v7261_v14  ;;  %v6045_v60 = vcombine.high %v8435_v34, %v4684_v45 }
0x10e4   : > { %v4435_v52 = vmul.f32 %v8414_v38, %v4414_v62  ;;  %v4416_v58 = vpop.f32.mrb[37].mxu0  ;;  %v8465_v47 = vrot.slane %v4677_v46, %v7261_v14  ;;  %v4692_v16 = vcombine.high %v4684_v45, %v4684_v45  ;;  %v6040_v11 = vrot.slane %v4684_v45, 9 }
0x10e5   : > { %v4570_v24 = vcombine.low %v4562_v12, %v4569_v53  ;;  %v5020_v40 = vrot.slane %v6045_v60, %v7261_v14  ;;  %v4758_v29 = vcombine.low %v8435_v34, %v4684_v45  ;;  %v4571_v42 = vcombine.low %v4494_v32, %v4496_v33 }
0x10e6   : > { %v4445_v23 = vadd.f32 %v8419_v48, %v4435_v52  ;;  %v4861_v2 = vrot.slane %v4692_v16, 7  ;;  %v4844_v6 = vcombine.high %v8465_v47, %v8465_v47  ;;  %v4864_v31 = vrot.slane %v8465_v47, 7 }
0x10e7   : > { %4642 = vst.msk [vmem:[#allocation2 + $0x11] sm:$0x3f] %vm9019_vm6, %v4570_v24  ;;  %v5021_v57 = vcombine.low %v5013_v41, %v5020_v40  ;;  %v4774_v34 = vcombine.low %v4692_v16, %v8465_v47  ;;  %v5118_v37 = vcombine.low %v4684_v45, %v4692_v16  ;;  %v4772_v54 = vrot.slane %v4758_v29, %v7261_v14 }
0x10e8   : > { %v4450_v0 = vmax.f32 %v4445_v23, 0.0  ;;  %v8478_v18 = vsel %vm7300_vm7, %v6040_v11, %v4861_v2  ;;  %v5022_v59 = vcombine.low %v8465_v47, %v4844_v6  ;;  %v4863_v49 = vrot.slane %v4861_v2, 2 }
0x10e9   : > { %v4910_v13 = vcombine.low %v4858_v9, %v8478_v18  ;;  %5081 = vrot.lane.b32.xlu0 %v5021_v57, %s6577_s29  ;;  %v4578_v21 = vrot.slane %v4571_v42, %v7261_v14  ;;  %v4867_v30 = vrot.slane %v4844_v6, 7  ;;  %v4866_v4 = vrot.slane %v4864_v31, 2 }
0x10ea   : > { %v4455_v39 = vadd.f32 %v4450_v0, %v7924_v51  ;;  %v5544_v51 = vld [vmem:[%s8986_s9 + $0x18] sm:$0xff]  ;;  %v4773_v10 = vcombine.low %v4765_v22, %v4772_v54  ;;  %v8502_v41 = vrot.slane %v4774_v34, %v7261_v14  ;;  %v5126_v46 = vrot.slane %v5118_v37, %v7261_v14 }
0x10eb   : > { %v4924_v56 = vrot.slane %v4910_v13, %v7261_v14  ;;  %v6442_v50 = vpack.c.bf16 %v5544_v51, %v5543_v1  ;;  %v8506_v44 = vrot.slane %v5022_v59, %v7261_v14  ;;  %v8510_v25 = vsel %vm7300_vm7, %v4863_v49, %v4864_v31 }
0x10ec   : > { %v4497_v35 = vcombine.high %v4455_v39, %v4455_v39  ;;  %v4504_v27 = vrot.slane %v4455_v39, %v7261_v14  ;;  %v4419_v26 = vpop.f32.mrb[38].mxu0  ;;  %4838 = vst.msk [vmem:[#allocation3] sm:$0xff] %vm1476_vm15, %v4773_v10  ;;  %v8518_v63 = vsel %vm7300_vm7, %v4866_v4, %v4867_v30  ;;  %v5209_v40 = vcombine.low %v8478_v18, %v8510_v25 }
0x10ed   : > { %v4436_v17 = vmul.f32 %v8414_v38, %v4419_v26  ;;  %v4421_v45 = vpop.f32.mrb[39].mxu0  ;;  %6443 = vmatpush1.bf16.msra.mxu1 %v6442_v50  ;;  %v4925_v16 = vcombine.low %v4917_v19, %v4924_v56  ;;  %v4926_v26 = vcombine.low %v8510_v25, %v8518_v63 }
0x10ee   : > { %v4511_v36 = vrot.slane %v4497_v35, %v7261_v14  ;;  %v4512_v32 = vcombine.high %v4504_v27, %v4504_v27  ;;  %v4585_v20 = vrot.slane %v4504_v27, %v7261_v14  ;;  %v4649_v62 = vld [vmem:[#allocation2 + $0x10] sm:$0xff]  ;;  %6444 = vmatprep.subr.bf16.mxu1 %v6570_v5  ;;  %v5217_v50 = vrot.slane %v5209_v40, %v7261_v14 }
0x10ef   : > { %v4446_v52 = vadd.f32 %v8419_v48, %v4436_v17  ;;  %v4700_v58 = vrot.slane %v4649_v62, %v7261_v14  ;;  %v4693_v60 = vcombine.high %v4649_v62, %v4649_v62 }
0x10f0   : > { %v4513_v33 = vcombine.high %v4511_v36, %v4511_v36  ;;  %v4586_v12 = vcombine.low %v4578_v21, %v4585_v20  ;;  %v4587_v53 = vcombine.low %v4512_v32, %v4511_v36 }
0x10f1   : > { %v4451_v9 = vmax.f32 %v4446_v52, 0.0  ;;  %v4424_v28 = vpop.f32.mrb[40].mxu0  ;;  %v6049_v2 = vcombine.high %v8465_v47, %v4700_v58  ;;  %v8528_v29 = vrot.slane %v4693_v60, %v7261_v14  ;;  %v5119_v42 = vcombine.low %v8465_v47, %v4700_v58 }
0x10f2   : > { %v4594_v24 = vrot.slane %v4587_v53, %v7261_v14  ;;  %v4601_v23 = vrot.slane %v4513_v33, %v7261_v14  ;;  %4643 = vst.msk [vmem:[#allocation2 + $0x19] sm:$0x3f] %vm9020_vm11, %v4586_v12  ;;  %v4437_v11 = vmul.f32 %v8414_v38, %v4424_v28  ;;  %v4426_v0 = vpop.f32.mrb[41].mxu0  ;;  %v4708_v31 = vcombine.high %v4700_v58, %v4700_v58  ;;  %vm9022_vm11 = vmmov %vm9019_vm6 }
0x10f3   : > { %v4456_v57 = vadd.f32 %v4451_v9, %v7953_v43  ;;  %v6041_v22 = vrot.slane %v4700_v58, 9  ;;  %v5312_v34 = vrot.slane %v6049_v2, %v7261_v14  ;;  %v5133_v18 = vrot.slane %v5119_v42, %v7261_v14 }
0x10f4   : > { %v4602_v6 = vcombine.low %v4594_v24, %v4601_v23  ;;  %v4447_v39 = vadd.f32 %v8419_v48, %v4437_v11  ;;  %v8537_v38 = vcombine.high %v8528_v29, %v8528_v29  ;;  %v5023_v19 = vcombine.low %v4708_v31, %v8528_v29 }
0x10f5   : > { %v4514_v13 = vcombine.high %v4456_v57, %v4456_v57  ;;  %v4521_v47 = vrot.slane %v4456_v57, %v7261_v14  ;;  %v4775_v43 = vcombine.low %v4700_v58, %v4708_v31  ;;  %v5313_v59 = vcombine.low %v8502_v41, %v5312_v34 }
0x10f6   : > { %4644 = vst.msk [vmem:[#allocation2 + $0x21] sm:$0x3f] %vm9021_vm8, %v4602_v6  ;;  %v4452_v37 = vmax.f32 %v4447_v39, 0.0  ;;  %v5134_v48 = vcombine.low %v5126_v46, %v5133_v18  ;;  %v4871_v49 = vrot.slane %v4708_v31, 7  ;;  %v8545_v54 = vrot.slane %v5023_v19, %v7261_v14 }
0x10f7   : > { %v4528_v1 = vrot.slane %v4514_v13, %v7261_v14  ;;  %v4529_v51 = vcombine.high %v4521_v47, %v4521_v47  ;;  %v4789_v35 = vrot.slane %v4775_v43, %v7261_v14  ;;  %5357 = vrot.lane.b32.xlu0 %v5313_v59, %s6579_s0  ;;  %v5314_v10 = vcombine.low %v8528_v29, %v8537_v38 }
0x10f8   : > { %v4457_v27 = vadd.f32 %v4452_v37, %v7975_v7  ;;  %5178 = vrot.lane.b32.xlu1 %v5134_v48, %s6578_s18  ;;  %v8553_v30 = vsel %vm7300_vm7, %v6041_v22, %v4871_v49  ;;  %v5038_v62 = vcombine.low %v8506_v44, %v8545_v54  ;;  %v4873_v24 = vrot.slane %v4871_v49, 2 }
0x10f9   : > { %v4650_v21 = vld [vmem:[#allocation2 + $0x18] sm:$0xff]  ;;  %v4603_v56 = vcombine.low %v4521_v47, %v4529_v51  ;;  %v4530_v4 = vcombine.high %v4528_v1, %v4528_v1  ;;  %v4790_v20 = vcombine.low %v8502_v41, %v4789_v35  ;;  %v4617_v45 = vrot.slane %v4528_v1, %v7261_v14 }
0x10fa   : > { %v4537_v7 = vrot.slane %v4457_v27, %v7261_v14  ;;  %v4709_v36 = vcombine.high %v4650_v21, %v4650_v21  ;;  %v8562_v32 = vrot.slane %v4650_v21, %v7261_v14  ;;  %v5210_v46 = vcombine.low %v8518_v63, %v8553_v30 }
0x10fb   : > { %v4610_v17 = vrot.slane %v4603_v56, %v7261_v14  ;;  %4839 = vst.msk [vmem:[#allocation3 + $0x10] sm:$0xff] %vm1476_vm15, %v4790_v20  ;;  %v4877_v13 = vrot.slane %v8537_v38, 7  ;;  %v5321_v47 = vrot.slane %v5314_v10, %v7261_v14  ;;  %v4874_v43 = vrot.slane %v8528_v29, 7 }
0x10fc   : > { %v4538_v33 = vcombine.high %v4537_v7, %v4537_v7  ;;  %v4619_v12 = vcombine.low %v4530_v4, %v4537_v7  ;;  %4985 = vrot.lane.b32.xlu1 %v4925_v16, %s6581_s19  ;;  %v6046_v53 = vcombine.high %v8528_v29, %v8562_v32  ;;  %v4791_v41 = vcombine.low %v8528_v29, %v8562_v32 }
0x10fd   : > { %v4618_v52 = vcombine.low %v4610_v17, %v4617_v45  ;;  %v8578_v58 = vrot.slane %v4709_v36, %v7261_v14  ;;  %v8582_v44 = vcombine.high %v8562_v32, %v8562_v32  ;;  %v4651_v60 = vld [vmem:[#allocation2 + $0x20] sm:$0xff]  ;;  %v5224_v2 = vrot.slane %v5210_v46, %v7261_v14 }
0x10fe   : > { %v4626_v16 = vrot.slane %v4619_v12, %v7261_v14  ;;  %v4633_v23 = vrot.slane %v4538_v33, %v7261_v14  ;;  %v5047_v9 = vrot.slane %v6046_v53, %v7261_v14  ;;  %v4799_v28 = vrot.slane %v4791_v41, %v7261_v14 }
0x10ff   : > { %4645 = vst.msk [vmem:[#allocation2 + $0x29] sm:$0x3f] %vm9019_vm6, %v4618_v52  ;;  %v4792_v40 = vcombine.low %v8582_v44, %v8578_v58  ;;  %v5135_v11 = vcombine.low %v8562_v32, %v8582_v44  ;;  %v8596_v42 = vcombine.high %v8578_v58, %v8578_v58  ;;  %v4725_v31 = vcombine.high %v4651_v60, %v4651_v60 }
0x1100   : > { %v4634_v0 = vcombine.low %v4626_v16, %v4633_v23  ;;  %5083 = vrot.lane.b32.xlu1 %v5038_v62, %s6577_s29  ;;  %v5501_v6 = vcombine.low %v8545_v54, %v5047_v9  ;;  %v5394_v57 = vcombine.low %v4789_v35, %v4799_v28  ;;  %v8607_v18 = vrot.slane %v4651_v60, %v7261_v14 }
0x1101   : > { %v8601_v22 = vrot.slane %v4792_v40, %v7261_v14  ;;  %v5142_v39 = vrot.slane %v5135_v11, %v7261_v14  ;;  %v5040_v34 = vcombine.low %v8578_v58, %v8596_v42  ;;  %v8615_v19 = vrot.slane %v4725_v31, %v7261_v14 }
0x1102   : > { %4646 = vst.msk [vmem:[#allocation2 + $0x31] sm:$0x3f] %vm9022_vm11, %v4634_v0  ;;  %5422 = vrot.lane.b32.xlu0 %v5394_v57, %s6580_s21  ;;  %v5225_v48 = vcombine.low %v5217_v50, %v5224_v2  ;;  %v6042_v49 = vrot.slane %v8562_v32, 9  ;;  %v8624_v51 = vcombine.high %v8607_v18, %v8607_v18  ;;  %v8628_v38 = vsel %vm7300_vm7, %v4873_v24, %v4874_v43 }
0x1103   : > { %5526 = vst.msk [vmem:[#allocation3 + $0x8] sm:$0xff] %vm1476_vm15, %v5501_v6  ;;  %v4807_v37 = vcombine.low %v4799_v28, %v8601_v22  ;;  %v5143_v59 = vcombine.low %v8545_v54, %v5142_v39  ;;  %v5054_v1 = vrot.slane %v5040_v34, %v7261_v14  ;;  %v4876_v35 = vrot.slane %v4874_v43, 2 }
0x1104   : > { %v5322_v29 = vcombine.low %v5321_v47, %v8601_v22  ;;  %v4927_v54 = vcombine.low %v8553_v30, %v8628_v38  ;;  %v5144_v27 = vcombine.low %v8578_v58, %v8607_v18  ;;  %v4881_v21 = vrot.slane %v8582_v44, 7 }
0x1105   : > { %4840 = vst.msk [vmem:[#allocation3 + $0x20] sm:$0xff] %vm1476_vm15, %v4807_v37  ;;  %5180 = vrot.lane.b32.xlu1 %v5143_v59, %s6578_s18  ;;  %v5056_v56 = vcombine.low %v8624_v51, %v8615_v19  ;;  %v4808_v4 = vcombine.low %v8607_v18, %v8624_v51  ;;  %v4878_v50 = vsel %vm7300_vm7, %v4876_v35, %v4877_v13  ;;  %v4887_v53 = vrot.slane %v8596_v42, 7 }
0x1106   : > { %5285 = vrot.lane.b32.xlu0 %v5225_v48, %s6582_s20  ;;  %v4652_v10 = vld [vmem:[#allocation2 + $0x28] sm:$0xff]  ;;  %v8647_v30 = vcombine.high %v8615_v19, %v8615_v19  ;;  %v4941_v7 = vrot.slane %v4927_v54, %v7261_v14  ;;  %v4882_v36 = vsel %vm7300_vm7, %v6042_v49, %v4881_v21  ;;  %v5055_v17 = vcombine.low %v5047_v9, %v5054_v1 }
0x1107   : > { %v8653_v32 = vrot.slane %v4652_v10, %v7261_v14  ;;  %v4741_v20 = vcombine.high %v4652_v10, %v4652_v10  ;;  %v5064_v45 = vrot.slane %v5056_v56, %v7261_v14  ;;  %v4934_v62 = vrot.slane %v4926_v26, %v7261_v14 }
0x1108   : > { %v4943_v46 = vcombine.low %v4878_v50, %v4882_v36  ;;  %v5151_v12 = vrot.slane %v5144_v27, %v7261_v14  ;;  %v4816_v44 = vrot.slane %v4808_v4, %v7261_v14  ;;  %v5324_v26 = vcombine.low %v8615_v19, %v8647_v30 }
0x1109   : > { %5359 = vrot.lane.b32.xlu1 %v5322_v29, %s6579_s0  ;;  %v5502_v41 = vcombine.low %v5054_v1, %v5064_v45  ;;  %v4942_v52 = vcombine.low %v4934_v62, %v4941_v7  ;;  %v6047_v25 = vcombine.high %v8615_v19, %v8653_v32  ;;  %v8669_v63 = vrot.slane %v4741_v20, %v7261_v14  ;;  %v4653_v24 = vld [vmem:[#allocation2 + $0x30] sm:$0xff] }
0x110a   : > { %v5532_v33 = vld [vmem:[#allocation3 + $0x8] sm:$0xff]  ;;  %5085 = vrot.lane.b32.xlu0 %v5055_v17, %s6577_s29  ;;  %v5152_v60 = vcombine.low %v5151_v12, %v5064_v45  ;;  %v4951_v16 = vrot.slane %v4943_v46, %v7261_v14  ;;  %v4883_v23 = vrot.slane %v4881_v21, 2  ;;  %v4884_v9 = vrot.slane %v8578_v58, 7 }
0x110b   : > { %6054 = vmatprep.mubr.msk.f32.mxu1 %vm1476_vm15, %v5532_v33  ;;  %5527 = vst.msk [vmem:[#allocation3 + $0x18] sm:$0xff] %vm1476_vm15, %v5502_v41  ;;  %v8678_v28 = vcombine.high %v8653_v32, %v8653_v32  ;;  %v6050_v40 = vcombine.high %v8578_v58, %v8607_v18  ;;  %v8685_v11 = vrot.slane %v8330_v15, %v7261_v14  ;;  %v4897_v29 = vrot.slane %v8647_v30, 7 }
0x110c   : > { %v5395_v2 = vcombine.low %v8601_v22, %v4816_v44  ;;  %v4885_v42 = vsel %vm7300_vm7, %v4883_v23, %v4884_v9  ;;  %v4886_v0 = vrot.slane %v4884_v9, 2  ;;  %v8692_v6 = vrot.slane %v4653_v24, %v7261_v14 }
0x110d   : > { %4987 = vrot.lane.b32.xlu1 %v4942_v52, %s6581_s19  ;;  %v5071_v57 = vrot.slane %v6047_v25, %v7261_v14  ;;  %v5338_v31 = vrot.slane %v5324_v26, %v7261_v14  ;;  %v5227_v58 = vcombine.low %v4882_v36, %v4885_v42  ;;  %v4809_v15 = vcombine.low %v8615_v19, %v8653_v32 }
0x110e   : > { %5182 = vrot.lane.b32.xlu0 %v5152_v60, %s6578_s18  ;;  %v5453_v39 = vcombine.low %v4941_v7, %v4951_v16  ;;  %v5226_v34 = vcombine.low %v8628_v38, %v4878_v50  ;;  %v8701_v22 = vsel %vm7300_vm7, %v4886_v0, %v4887_v53  ;;  %v4825_v13 = vcombine.low %v8678_v28, %v8669_v63  ;;  %v5545_v0 = vld [vmem:[%s8986_s9 + $0x20] sm:$0xff] }
0x110f   : > { %v4944_v47 = vcombine.low %v4885_v42, %v8701_v22  ;;  %v5153_v43 = vcombine.low %v8653_v32, %v8678_v28  ;;  %v5102_v37 = vcombine.high %v4653_v24, %v4653_v24  ;;  %v4823_v59 = vrot.slane %v4809_v15, %v7261_v14 }
0x1110   : > { %v5331_v48 = vrot.slane %v6050_v40, %v7261_v14  ;;  %v5154_v49 = vcombine.low %v8669_v63, %v8692_v6  ;;  %v4832_v1 = vrot.slane %v4825_v13, %v7261_v14  ;;  %v8717_v38 = vcombine.high %v8669_v63, %v8669_v63 }
0x1111   : > { %5424 = vrot.lane.b32.xlu1 %v5395_v2, %s6580_s21  ;;  %v5072_v35 = vcombine.low %v5064_v45, %v5071_v57  ;;  %v5241_v54 = vrot.slane %v5227_v58, %v7261_v14  ;;  %v4824_v27 = vcombine.low %v4816_v44, %v4823_v59  ;;  %v5234_v56 = vrot.slane %v5226_v34, %v7261_v14  ;;  %v5548_v34 = vld [vmem:[%s8986_s9 + $0x38] sm:$0xff] }
0x1112   : > { %5481 = vrot.lane.b32.xlu0 %v5453_v39, %s6583_s22  ;;  %v5339_v21 = vcombine.low %v5331_v48, %v5338_v31  ;;  %v8723_v4 = vrot.slane %v4944_v47, %v7261_v14  ;;  %vm9023_vm8 = vcmask 125952   ;;  %v5073_v50 = vcombine.low %v8669_v63, %v8717_v38  ;;  %v5547_v39 = vld [vmem:[%s8986_s9 + $0x30] sm:$0xff] }
0x1113   : > { %4842 = vst.msk [vmem:[#allocation3 + $0x40] sm:$0xf] %vm9023_vm8, %v4832_v1  ;;  %v5161_v10 = vrot.slane %v5153_v43, %v7261_v14  ;;  %v4891_v30 = vrot.slane %v8624_v51, 7  ;;  %v4894_v7 = vrot.slane %v8615_v19, 7  ;;  %v8734_v36 = vrot.slane %v5102_v37, %v7261_v14 }
0x1114   : > { %4841 = vst.msk [vmem:[#allocation3 + $0x30] sm:$0xff] %vm1476_vm15, %v4824_v27  ;;  %v5168_v20 = vrot.slane %v5154_v49, %v7261_v14  ;;  %v6051_v17 = vcombine.high %v8669_v63, %v8692_v6  ;;  %v5080_v45 = vrot.slane %v5073_v50, %v7261_v14  ;;  %v8743_v62 = vcombine.high %v8692_v6, %v8692_v6 }
0x1115   : > { %5087 = vrot.lane.b32.xlu1 %v5072_v35, %s6577_s29  ;;  %v5242_v46 = vcombine.low %v5234_v56, %v5241_v54  ;;  %v6043_v51 = vrot.slane %v8607_v18, 9  ;;  %v4893_v19 = vrot.slane %v4891_v30, 2  ;;  %v6053_v33 = vcombine.high %v8734_v36, %v8685_v11 }
0x1116   : > { %5361 = vrot.lane.b32.xlu0 %v5339_v21, %s6579_s0  ;;  %v4959_v12 = vcombine.low %v4951_v16, %v8723_v4  ;;  %v5503_v53 = vcombine.low %v5071_v57, %v5080_v45  ;;  %v5170_v41 = vcombine.low %v8743_v62, %v8734_v36  ;;  %v4896_v52 = vrot.slane %v4894_v7, 2  ;;  %v5546_v57 = vld [vmem:[%s8986_s9 + $0x28] sm:$0xff] }
0x1117   : > { %v4895_v44 = vsel %vm7300_vm7, %v4893_v19, %v4894_v7  ;;  %v5511_v60 = vrot.slane %v6053_v33, %v7261_v14  ;;  %v4892_v18 = vsel %vm7300_vm7, %v6043_v51, %v4891_v30  ;;  %v5169_v26 = vcombine.low %v5161_v10, %v5168_v20 }
0x1118   : > { %5528 = vst.msk [vmem:[#allocation3 + $0x28] sm:$0xff] %vm1476_vm15, %v5503_v53  ;;  %v5177_v25 = vrot.slane %v5170_v41, %v7261_v14  ;;  %v5347_v24 = vrot.slane %v6051_v17, %v7261_v14  ;;  %v4960_v16 = vcombine.low %v4892_v18, %v4895_v44  ;;  %v5396_v23 = vcombine.low %v4823_v59, %v4832_v1 }
0x1119   : > { %5287 = vrot.lane.b32.xlu1 %v5242_v46, %s6582_s20  ;;  %v8763_v40 = vsel %vm7300_vm7, %v4896_v52, %v4897_v29  ;;  %v4901_v2 = vrot.slane %v8678_v28, 7  ;;  %v4904_v42 = vrot.slane %v8669_v63, 7  ;;  %v5397_v31 = vcombine.low %v8692_v6, %v8743_v62 }
0x111a   : > { %4989 = vrot.lane.b32.xlu0 %v4959_v12, %s6581_s19  ;;  %v5512_v9 = vcombine.low %v5177_v25, %v5511_v60  ;;  %v5398_v28 = vcombine.low %v8734_v36, %v8685_v11  ;;  %v5348_v58 = vcombine.low %v4832_v1, %v5347_v24  ;;  %v8781_v63 = vrot.slane %v4960_v16, %v7261_v14  ;;  %v5553_v24 = vld [vmem:[%s8986_s9 + $0x60] sm:$0xff]  ;;  %v5554_v16 = vld [vmem:[%s8986_s9 + $0x68] sm:$0xff] }
0x111b   : > { %v5244_v15 = vcombine.low %v4895_v44, %v8763_v40  ;;  %v8792_v13 = vcombine.high %v8685_v11, %v8685_v11  ;;  %v6445_v47 = vpack.c.bf16 %v5546_v57, %v5545_v0  ;;  %v4907_v43 = vrot.slane %v8717_v38, 7  ;;  %v5549_v38 = vld [vmem:[%s8986_s9 + $0x40] sm:$0xff] }
0x111c   : > { %5529 = vst.msk [vmem:[#allocation3 + $0x38] sm:$0xff] %vm1476_vm15, %v5512_v9  ;;  %v5243_v37 = vcombine.low %v8701_v22, %v4892_v18  ;;  %v4903_v59 = vrot.slane %v4901_v2, 2  ;;  %v4906_v48 = vrot.slane %v4904_v42, 2  ;;  %v5405_v49 = vrot.slane %v5397_v31, %v7261_v14 }
0x111d   : > { %5184 = vrot.lane.b32.xlu1 %v5169_v26, %s6578_s18  ;;  %v5412_v1 = vrot.slane %v5398_v28, %v7261_v14  ;;  %v6044_v35 = vrot.slane %v8653_v32, 9  ;;  %6446 = vmatpush1.bf16.msra.mxu1 %v6445_v47  ;;  %v6448_v29 = vpack.c.bf16 %v5548_v34, %v5547_v39  ;;  %v5454_v54 = vcombine.low %v8723_v4, %v8781_v63  ;;  %v5550_v32 = vld [vmem:[%s8986_s9 + $0x48] sm:$0xff]  ;;  %v5555_v47 = vld [vmem:[%s8986_s9 + $0x70] sm:$0xff] }
0x111e   : > { %5426 = vrot.lane.b32.xlu0 %v5396_v23, %s6580_s21  ;;  %v5258_v27 = vrot.slane %v5244_v15, %v7261_v14  ;;  %v5198_v22 = vcombine.high %v8734_v36, %v8734_v36  ;;  %6447 = vmatprep.subr.bf16.mxu1 %v6570_v5  ;;  %v5201_v56 = vrot.slane %v8743_v62, 7  ;;  %v5204_v4 = vrot.slane %v8734_v36, 7 }
0x111f   : > { %v4902_v21 = vsel %vm7300_vm7, %v6044_v35, %v4901_v2  ;;  %v5251_v50 = vrot.slane %v5243_v37, %v7261_v14  ;;  %v4905_v10 = vsel %vm7300_vm7, %v4903_v59, %v4904_v42  ;;  %v4908_v30 = vsel %vm7300_vm7, %v4906_v48, %v4907_v43  ;;  %v5556_v43 = vld [vmem:[%s8986_s9 + $0x78] sm:$0xff] }
0x1120   : > { %v6052_v7 = vrot.slane %v8685_v11, 9  ;;  %v5413_v20 = vcombine.low %v5405_v49, %v5412_v1  ;;  %v6048_v17 = vrot.slane %v8692_v6, 9  ;;  %v6451_v62 = vpack.c.bf16 %v5550_v32, %v5549_v38  ;;  %v5551_v11 = vld [vmem:[%s8986_s9 + $0x50] sm:$0xff]  ;;  %v5552_v6 = vld [vmem:[%s8986_s9 + $0x58] sm:$0xff] }
0x1121   : > { %5363 = vrot.lane.b32.xlu1 %v5348_v58, %s6579_s0  ;;  %6449 = vmatpush1.bf16.msra.mxu1 %v6448_v29  ;;  %v5259_v46 = vcombine.low %v5251_v50, %v5258_v27  ;;  %v5349_v51 = vcombine.low %v8734_v36, %v5198_v22  ;;  %v5207_v19 = vrot.slane %v5198_v22, 7  ;;  %v4961_v33 = vcombine.low %v8763_v40, %v4902_v21 }
0x1122   : > { %5089 = vrot.lane.b32.xlu0 %v5080_v45, %s6577_s29  ;;  %v5445_v45 = vrot.slane %v8792_v13, 7  ;;  %6450 = vmatprep.subr.bf16.mxu1 %v6570_v5  ;;  %v4977_v12 = vcombine.low %v4905_v10, %v4908_v30  ;;  %v5202_v53 = vsel %vm7300_vm7, %v6048_v17, %v5201_v56  ;;  %v5203_v41 = vrot.slane %v5201_v56, 2  ;;  %s6069_s29 = sshll.u32 %s9035_s25, 5 }
0x1123   : > { %v5206_v52 = vrot.slane %v5204_v4, 2  ;;  %v5260_v36 = vcombine.low %v4902_v21, %v4905_v10  ;;  %v5448_v44 = vrot.slane %v8347_v3, 7  ;;  %v6454_v60 = vpack.c.bf16 %v5552_v6, %v5551_v11 }
0x1124   : > { %v5356_v18 = vrot.slane %v5349_v51, %v7261_v14  ;;  %v5261_v26 = vcombine.low %v4908_v30, %v5202_v53  ;;  %v4984_v23 = vrot.slane %v4977_v12, %v7261_v14  ;;  %v5205_v9 = vsel %vm7300_vm7, %v5203_v41, %v5204_v4  ;;  %v5534_v12 = vld [vmem:[#allocation3 + $0x18] sm:$0xff] }
0x1125   : > { %5483 = vrot.lane.b32.xlu1 %v5454_v54, %s6583_s22  ;;  %6452 = vmatpush1.bf16.msra.mxu1 %v6451_v62  ;;  %v5208_v40 = vsel %vm7300_vm7, %v5206_v52, %v5207_v19  ;;  %v5446_v2 = vsel %vm7300_vm7, %v6052_v7, %v5445_v45  ;;  %v5447_v42 = vrot.slane %v5445_v45, 2  ;;  %v5268_v0 = vrot.slane %v5260_v36, %v7261_v14 }
0x1126   : > { %5186 = vrot.lane.b32.xlu0 %v5177_v25, %s6578_s18  ;;  %v4975_v25 = vrot.slane %v4961_v33, %v7261_v14  ;;  %6453 = vmatprep.subr.bf16.mxu1 %v6570_v5  ;;  %v5450_v57 = vrot.slane %v5448_v44, 2  ;;  %v5451_v31 = vrot.slane %v8353_v61, 7  ;;  %v6457_v28 = vpack.c.bf16 %v5554_v16, %v5553_v24  ;;  %v5536_v16 = vld [vmem:[#allocation3 + $0x28] sm:$0xff] }
0x1127   : > { %v5275_v15 = vrot.slane %v5261_v26, %v7261_v14  ;;  %v5456_v39 = vcombine.low %v5202_v53, %v5205_v9  ;;  %v5457_v34 = vcombine.low %v5208_v40, %v5446_v2  ;;  %v5277_v61 = vcombine.low %v5205_v9, %v5208_v40 }
0x1128   : > { %v4976_v58 = vcombine.low %v8781_v63, %v4975_v25  ;;  %v5455_v37 = vcombine.low %v4975_v25, %v4984_v23  ;;  %v5414_v63 = vcombine.low %v8792_v13, %v8347_v3  ;;  %v5449_v59 = vsel %vm7300_vm7, %v5447_v42, %v5448_v44  ;;  %v5557_v3 = vld [vmem:[%s8986_s9 + $0x80] sm:$0xff]  ;;  %v5558_v13 = vld [vmem:[%s8986_s9 + $0x88] sm:$0xff] }
0x1129   : > { %5428 = vrot.lane.b32.xlu1 %v5413_v20, %s6580_s21  ;;  %6455 = vmatpush1.bf16.msra.mxu1 %v6454_v60  ;;  %v5452_v48 = vsel %vm7300_vm7, %v5450_v57, %v5451_v31  ;;  %v6460_v49 = vpack.c.bf16 %v5556_v43, %v5555_v47  ;;  %v5276_v1 = vcombine.low %v5268_v0, %v5275_v15  ;;  %vm9024_vm7 = vcmask 523648   ;;  %v5540_v15 = vld [vmem:[#allocation3 + $0x48] sm:$0xf]  ;;  %v5755_v47 = vld [vmem:[%s8991_s14] sm:$0xff] }
0x112a   : > { %5289 = vrot.lane.b32.xlu0 %v5259_v46, %s6582_s20  ;;  %6456 = vmatprep.subr.bf16.mxu1 %v6570_v5  ;;  %v5464_v35 = vrot.slane %v5456_v39, %v7261_v14  ;;  %v5471_v29 = vrot.slane %v5457_v34, %v7261_v14  ;;  %v5284_v8 = vrot.slane %v5277_v61, %v7261_v14  ;;  %vm9025_vm6 = vmmov %vm9024_vm7  ;;  %vm9027_vm8 = vcmask 257152   ;;  %v6059_v61 = vld [vmem:[%s8987_s10] ss:$0 sm:$0xff] }
0x112b   : > { %v5473_v54 = vcombine.low %v5449_v59, %v5452_v48  ;;  %v5421_v27 = vrot.slane %v5414_v63, %v7261_v14  ;;  %v6463_v22 = vpack.c.bf16 %v5558_v13, %v5557_v3  ;;  %vm9026_vm11 = vmmov %vm9025_vm6  ;;  %v6060_v59 = vld [vmem:[%s8987_s10 + $0x1] ss:$0 sm:$0xff] }
0x112c   : > { %v5472_v38 = vcombine.low %v5464_v35, %v5471_v29 }
0x112d   : > { %5365 = vrot.lane.b32.xlu1 %v5356_v18, %s6579_s0  ;;  %6458 = vmatpush1.bf16.msra.mxu1 %v6457_v28  ;;  %v5480_v32 = vrot.slane %v5473_v54, %v7261_v14  ;;  %v5538_v28 = vld [vmem:[#allocation3 + $0x38] sm:$0xff] }
0x112e   : > { %4993 = vrot.lane.b32.xlu0 %v4984_v23, %s6581_s19  ;;  %6459 = vmatprep.subr.bf16.mxu1 %v6570_v5 }
0x1131   : > { %4991 = vrot.lane.b32.xlu1 %v4976_v58, %s6581_s19  ;;  %6461 = vmatpush1.bf16.msra.mxu1 %v6460_v49 }
0x1132   : > { %5485 = vrot.lane.b32.xlu0 %v5455_v37, %s6583_s22  ;;  %6462 = vmatprep.subr.bf16.mxu1 %v6570_v5 }
0x1135   : > { %5291 = vrot.lane.b32.xlu1 %v5276_v1, %s6582_s20  ;;  %6464 = vmatpush1.bf16.msra.mxu1 %v6463_v22 }
0x1136   : > { %5293 = vrot.lane.b32.xlu0 %v5284_v8, %s6582_s20 }
0x1139   : > { %5487 = vrot.lane.b32.xlu1 %v5472_v38, %s6583_s22 }
0x113a   : > { %5430 = vrot.lane.b32.xlu0 %v5421_v27, %s6580_s21 }
0x113d   : > { %5489 = vrot.lane.b32.xlu1 %v5480_v32, %s6583_s22  ;;  %s588_s22 = scalar_lea.vmem %s8994_s17, %s6069_s29 }
0x115b   : > { %v5082_v56 = vpop.permute.xlu0 %5081 }
0x1169   : > { %v5358_v50 = vpop.permute.xlu0 %5357 }
0x116a   : > { %v5179_v21 = vpop.permute.xlu1 %5178 }
0x116e   : > { %v4986_v4 = vpop.permute.xlu1 %4985 }
0x116f   : > { %5000 = vst.msk [vmem:[#allocation3] sm:$0xff] %vm2514_vm10, %v4986_v4 }
0x1170   : > { %5096 = vst.msk [vmem:[#allocation3] sm:$0xff] %vm2612_vm12, %v5082_v56 }
0x1171   : > { %5193 = vst.msk [vmem:[#allocation3] sm:$0xff] %vm9024_vm7, %v5179_v21  ;;  %vm9028_vm7 = vmmov %vm9025_vm6 }
0x1172   : > { %v5084_v5 = vpop.permute.xlu1 %5083 }
0x1174   : > { %v5423_v10 = vpop.permute.xlu0 %5422 }
0x1177   : > { %v5181_v30 = vpop.permute.xlu1 %5180 }
0x1178   : > { %v5286_v7 = vpop.permute.xlu0 %5285 }
0x1179   : > { %5300 = vst.msk [vmem:[#allocation3] sm:$0xff] %vm2820_vm1, %v5286_v7 }
0x117a   : > { %5372 = vst.msk [vmem:[#allocation3] sm:$0xff] %vm2894_vm2, %v5358_v50 }
0x117b   : > { %5437 = vst.msk [vmem:[#allocation3] sm:$0xff] %vm2961_vm3, %v5423_v10  ;;  %v5360_v14 = vpop.permute.xlu1 %5359 }
0x117c   : > { %v5086_v20 = vpop.permute.xlu0 %5085 }
0x117f   : > { %v4988_v17 = vpop.permute.xlu1 %4987 }
0x1180   : > { %5001 = vst.msk [vmem:[#allocation3 + $0x10] sm:$0xff] %vm2514_vm10, %v4988_v17  ;;  %v5183_v45 = vpop.permute.xlu0 %5182 }
0x1181   : > { %5097 = vst.msk [vmem:[#allocation3 + $0x10] sm:$0xff] %vm2612_vm12, %v5084_v5 }
0x1182   : > { %5194 = vst.msk [vmem:[#allocation3 + $0x10] sm:$0xff] %vm9025_vm6, %v5181_v30  ;;  %vm9029_vm6 = vcmask 650752  }
0x1183   : > { %v5425_v62 = vpop.permute.xlu1 %5424 }
0x1184   : > { %v5482_v46 = vpop.permute.xlu0 %5481 }
0x1185   : > { %5496 = vst.msk [vmem:[#allocation3] sm:$0xff] %vm3022_vm4, %v5482_v46 }
0x1187   : > { %v5088_v51 = vpop.permute.xlu1 %5087 }
0x1188   : > { %v5362_v19 = vpop.permute.xlu0 %5361 }
0x118b   : > { %v5288_v33 = vpop.permute.xlu1 %5287 }
0x118c   : > { %5301 = vst.msk [vmem:[#allocation3 + $0x10] sm:$0xff] %vm2820_vm1, %v5288_v33  ;;  %v4990_v11 = vpop.permute.xlu0 %4989  ;;  %v5531_v6 = vld [vmem:[#allocation3] sm:$0xff] }
0x118d   : > { %5373 = vst.msk [vmem:[#allocation3 + $0x10] sm:$0xff] %vm2894_vm2, %v5360_v14  ;;  %5639 = vmatmul.mubr.f32.vlgmr.msra.gmra.mrb[40].mxu1 %v5531_v6 }
0x118e   : > { %5002 = vst.msk [vmem:[#allocation3 + $0x20] sm:$0xff] %vm2514_vm10, %v4990_v11  ;;  %6055 = vmatprep.mubr.msk.f32.mxu1 %vm1476_vm15, %v5534_v12 }
0x118f   : > { %5438 = vst.msk [vmem:[#allocation3 + $0x10] sm:$0xff] %vm2961_vm3, %v5425_v62  ;;  %v5185_v53 = vpop.permute.xlu1 %5184 }
0x1190   : > { %5098 = vst.msk [vmem:[#allocation3 + $0x20] sm:$0xff] %vm2612_vm12, %v5086_v20  ;;  %v5427_v41 = vpop.permute.xlu0 %5426 }
0x1191   : > { %5195 = vst.msk [vmem:[#allocation3 + $0x20] sm:$0xff] %vm9026_vm11, %v5183_v45 }
0x1193   : > { %v5364_v52 = vpop.permute.xlu1 %5363 }
0x1194   : > { %v5090_v36 = vpop.permute.xlu0 %5089 }
0x1197   : > { %v5484_v44 = vpop.permute.xlu1 %5483 }
0x1198   : > { %5497 = vst.msk [vmem:[#allocation3 + $0x10] sm:$0xff] %vm3022_vm4, %v5484_v44  ;;  %v5187_v60 = vpop.permute.xlu0 %5186 }
0x119b   : > { %v5429_v18 = vpop.permute.xlu1 %5428 }
0x119c   : > { %v5290_v25 = vpop.permute.xlu0 %5289 }
0x119d   : > { %5302 = vst.msk [vmem:[#allocation3 + $0x20] sm:$0xff] %vm2820_vm1, %v5290_v25 }
0x119e   : > { %5374 = vst.msk [vmem:[#allocation3 + $0x20] sm:$0xff] %vm2894_vm2, %v5362_v19 }
0x119f   : > { %5439 = vst.msk [vmem:[#allocation3 + $0x20] sm:$0xff] %vm2961_vm3, %v5427_v41  ;;  %v5366_v26 = vpop.permute.xlu1 %5365  ;;  %v5533_v24 = vld [vmem:[#allocation3 + $0x10] sm:$0xff] }
0x11a0   : > { %5644 = vmatmul.mubr.f32.gmra.mrb[42].mxu1 %v5533_v24  ;;  %v4994_v23 = vpop.permute.xlu0 %4993 }
0x11a1   : > { %6056 = vmatprep.mubr.msk.f32.mxu1 %vm1476_vm15, %v5536_v16  ;;  %5004 = vst.msk [vmem:[#allocation3 + $0x40] sm:$0xf] %vm9027_vm8, %v4994_v23 }
0x11a2   : > { %5100 = vst.msk [vmem:[#allocation3 + $0x40] sm:$0xf] %vm2617_vm0, %v5090_v36  ;;  %vm5759_vm0 = vcmask 72704  }
0x11a3   : > { %5197 = vst.msk [vmem:[#allocation3 + $0x40] sm:$0xf] %vm2716_vm9, %v5187_v60  ;;  %v4992_v9 = vpop.permute.xlu1 %4991  ;;  %vm9030_vm9 = vcmask 1044352   ;;  %6309 = vmatprep.mubr.msk.f32.mxu0 %vm5759_vm0, %v5755_v47  ;;  %v5756_v47 = vld [vmem:[%s8991_s14 + $0x8] sm:$0xff] }
0x11a4   : > { %5003 = vst.msk [vmem:[#allocation3 + $0x30] sm:$0xff] %vm2514_vm10, %v4992_v9  ;;  %v5486_v40 = vpop.permute.xlu0 %5485  ;;  %vm5691_vm10 = vcmask 1041408  }
0x11a5   : > { %5099 = vst.msk [vmem:[#allocation3 + $0x30] sm:$0xff] %vm2612_vm12, %v5088_v51  ;;  %vm9031_vm12 = vcmask 1040384  }
0x11a6   : > { %5498 = vst.msk [vmem:[#allocation3 + $0x20] sm:$0xff] %vm3022_vm4, %v5486_v40 }
0x11a7   : > { %5196 = vst.msk [vmem:[#allocation3 + $0x30] sm:$0xff] %vm9028_vm7, %v5185_v53  ;;  %v5292_v2 = vpop.permute.xlu1 %5291 }
0x11a8   : > { %5303 = vst.msk [vmem:[#allocation3 + $0x30] sm:$0xff] %vm2820_vm1, %v5292_v2  ;;  %v5294_v42 = vpop.permute.xlu0 %5293  ;;  %vm5749_vm1 = vcmask 1044480  }
0x11a9   : > { %5375 = vst.msk [vmem:[#allocation3 + $0x30] sm:$0xff] %vm2894_vm2, %v5364_v52  ;;  %vm9032_vm2 = vcmask 1043456  }
0x11aa   : > { %5304 = vst.msk [vmem:[#allocation3 + $0x40] sm:$0xf] %vm9029_vm6, %v5294_v42 }
0x11ab   : > { %5440 = vst.msk [vmem:[#allocation3 + $0x30] sm:$0xff] %vm2961_vm3, %v5429_v18  ;;  %v5488_v0 = vpop.permute.xlu1 %5487  ;;  %vm5751_vm3 = vcmask 1045504  }
0x11ac   : > { %5376 = vst.msk [vmem:[#allocation3 + $0x40] sm:$0xf] %vm2899_vm5, %v5366_v26  ;;  %v5431_v31 = vpop.permute.xlu0 %5430 }
0x11ad   : > { %5499 = vst.msk [vmem:[#allocation3 + $0x30] sm:$0xff] %vm3022_vm4, %v5488_v0  ;;  %v5535_v57 = vld [vmem:[#allocation3 + $0x20] sm:$0xff]  ;;  %vm5753_vm4 = vcmask 1046528  }
0x11ae   : > { %5649 = vmatmul.mubr.f32.gmra.mrb[44].mxu1 %v5535_v57  ;;  %5441 = vst.msk [vmem:[#allocation3 + $0x40] sm:$0xf] %vm2966_vm14, %v5431_v31  ;;  %vm5746_vm14 = vcmask 1042432  }
0x11af   : > { %6057 = vmatprep.mubr.msk.f32.mxu1 %vm1476_vm15, %v5538_v28  ;;  %v5490_v58 = vpop.permute.xlu1 %5489 }
0x11b0   : > { %5500 = vst.msk [vmem:[#allocation3 + $0x40] sm:$0xf] %vm9030_vm9, %v5490_v58 }
0x11b4   : > { %v5537_v39 = vld [vmem:[#allocation3 + $0x30] sm:$0xff] }
0x11b5   : > { %5654 = vmatmul.mubr.f32.gmra.mrb[46].mxu1 %v5537_v39 }
0x11b6   : > { %6058 = vmatprep.mubr.msk.f32.mxu1 %vm1476_vm15, %v5540_v15 }
0x11b7   : > { %v5539_v34 = vld [vmem:[#allocation3 + $0x40] sm:$0xf] }
0x11b9   : > { %5659 = vmatmul.mubr.f32.gmra.mrb[48].mxu1 %v5539_v34 }
0x1260   : > { %v5640_v43 = vpop.f32.mrb[40].mxu1 }
0x1261   : > { %v5642_v37 = vpop.f32.mrb[41].mxu1  ;;  %v5669_v63 = vmul.f32 %v6059_v61, %v5640_v43  ;;  %v5757_v43 = vld [vmem:[%s8991_s14 + $0x10] sm:$0xff] }
0x1262   : > { %v5758_v37 = vld [vmem:[%s8991_s14 + $0x18] sm:$0x1] }
0x1263   : > { %v5679_v48 = vadd.f32 %v6060_v59, %v5669_v63 }
0x1265   : > { %v5684_v29 = vmax.f32 %v5679_v48, 0.0 }
0x1267   : > { %v5692_v8 = vrot.slane %v5684_v29, 6 }
0x1273   : > { %v5645_v49 = vpop.f32.mrb[42].mxu1 }
0x1274   : > { %v5670_v1 = vmul.f32 %v6059_v61, %v5645_v49  ;;  %v5647_v35 = vpop.f32.mrb[43].mxu1 }
0x1276   : > { %v5680_v3 = vadd.f32 %v6060_v59, %v5670_v1 }
0x1278   : > { %v5685_v13 = vmax.f32 %v5680_v3, 0.0 }
0x127a   : > { %v5693_v54 = vrot.slane %v5685_v13, 6 }
0x127c   : > { %v5694_v27 = vsel %vm5691_vm10, %v5692_v8, %v5693_v54 }
0x127d   : > { %v5696_v22 = vmax.f32 %v5684_v29, %v5694_v27 }
0x127f   : > { %v5698_v32 = vrot.slane %v5696_v22, 1 }
0x1281   : > { %v5650_v38 = vpop.f32.mrb[44].mxu1  ;;  %v5700_v50 = vmax.f32 %v5696_v22, %v5698_v32 }
0x1282   : > { %v5671_v21 = vmul.f32 %v6059_v61, %v5650_v38  ;;  %v5652_v56 = vpop.f32.mrb[45].mxu1 }
0x1283   : > { %v5726_v20 = vrot.slane %v5700_v50, 1  ;;  %v5728_v33 = vrot.slane %v5700_v50, 2 }
0x1284   : > { %v5681_v4 = vadd.f32 %v6060_v59, %v5671_v21 }
0x1285   : > { %v5744_v12 = vsel %vm9031_vm12, %v5700_v50, %v5726_v20 }
0x1286   : > { %v5686_v5 = vmax.f32 %v5681_v4, 0.0  ;;  %v5745_v18 = vsel %vm5691_vm10, %v5744_v12, %v5728_v33 }
0x1288   : > { %v5702_v10 = vrot.slane %v5686_v5, 6  ;;  %v5655_v30 = vpop.f32.mrb[46].mxu1 }
0x1289   : > { %v5672_v7 = vmul.f32 %v6059_v61, %v5655_v30  ;;  %v5657_v14 = vpop.f32.mrb[47].mxu1 }
0x128a   : > { %v5704_v17 = vmax.f32 %v5685_v13, %v5702_v10  ;;  %v5705_v45 = vmax.f32 %v5686_v5, %v5702_v10 }
0x128b   : > { %v5682_v62 = vadd.f32 %v6060_v59, %v5672_v7 }
0x128c   : > { %v5707_v46 = vrot.slane %v5704_v17, 1  ;;  %v5711_v51 = vrot.slane %v5705_v45, 1  ;;  %v5660_v19 = vpop.f32.mrb[48].mxu1 }
0x128d   : > { %v5673_v11 = vmul.f32 %v6059_v61, %v5660_v19  ;;  %v5662_v6 = vpop.f32.mrb[49].mxu1  ;;  %v5687_v52 = vmax.f32 %v5682_v62, 0.0 }
0x128e   : > { %v5709_v53 = vmax.f32 %v5704_v17, %v5707_v46  ;;  %v5713_v41 = vmax.f32 %v5705_v45, %v5711_v51 }
0x128f   : > { %v5683_v36 = vadd.f32 %v6060_v59, %v5673_v11  ;;  %v5716_v23 = vrot.slane %v5687_v52, 6 }
0x1290   : > { %v5731_v44 = vrot.slane %v5709_v53, 1  ;;  %v5733_v60 = vrot.slane %v5709_v53, 2  ;;  %v5736_v26 = vrot.slane %v5713_v41, 3 }
0x1291   : > { %v5688_v25 = vmax.f32 %v5683_v36, 0.0 }
0x1292   : > { %v5747_v24 = vsel %vm5746_vm14, %v5745_v18, %v5731_v44 }
0x1293   : > { %v5748_v16 = vsel %vm9032_vm2, %v5747_v24, %v5733_v60  ;;  %v5717_v9 = vrot.slane %v5688_v25, 6 }
0x1294   : > { %v5750_v40 = vsel %vm5749_vm1, %v5748_v16, %v5736_v26 }
0x1295   : > { %v5718_v2 = vsel %vm5691_vm10, %v5716_v23, %v5717_v9 }
0x1296   : > { %v5720_v42 = vmax.f32 %v5687_v52, %v5718_v2 }
0x1298   : > { %v5722_v0 = vrot.slane %v5720_v42, 1 }
0x129a   : > { %v5724_v57 = vmax.f32 %v5720_v42, %v5722_v0 }
0x129c   : > { %v5739_v31 = vrot.slane %v5724_v57, 2  ;;  %v5741_v28 = vrot.slane %v5724_v57, 3  ;;  %v5743_v58 = vrot.slane %v5724_v57, 4 }
0x129e   : > { %v5752_v15 = vsel %vm5751_vm3, %v5750_v40, %v5739_v31 }
0x129f   : > { %v5754_v39 = vsel %vm5753_vm4, %v5752_v15, %v5741_v28 }
0x12a0   : > { %v6465_v34 = vpack.c.bf16 %v5743_v58, %v5754_v39 }
0x12a2   : > { %6467 = vmatprep.subr.msk.bf16.mxu0 %vm6973_vm13, %v6465_v34 }
0x12a3   : > { %6470 = vmatpush3.bf16.msk.msra.mxu0 %vm6973_vm13, %v6465_v34  ;;  %vm9033_vm13 = vcmask 122880  }
0x12a6   : > { %6310 = vmatmul.mubr.msk.f32.vlgmr.msra.gmra.mrb[42].mxu0 %vm5759_vm0, %v5756_v47 }
0x12a7   : > { %6312 = vmatprep.mubr.msk.f32.mxu0 %vm5759_vm0, %v5757_v43 }
0x12aa   : > { %6313 = vmatmul.mubr.msk.f32.gmra.mrb[44].mxu0 %vm5759_vm0, %v5758_v37 }
0x1379   : > { %v6311_v55 = vpop.f32.mrb[42].mxu0 }
0x137a   : > { %5860 = vst.msk [vmem:[%s588_s22 + $0x8] sm:$0xff] %vm1476_vm15, %v6311_v55  ;;  %v5840_v61 = vpop.f32.mrb[43].mxu0 }
0x137b   : > { %5859 = vst.msk [vmem:[%s588_s22] sm:$0xff] %vm1476_vm15, %v5840_v61 }
0x137d   : > { %v6314_v63 = vpop.f32.mrb[44].mxu0 }
0x137e   : > { %5862 = vst.msk [vmem:[%s588_s22 + $0x18] sm:$0x1] %vm9033_vm13, %v6314_v63  ;;  %v5850_v59 = vpop.f32.mrb[45].mxu0 }
0x137f   : > { %5861 = vst.msk [vmem:[%s588_s22 + $0x10] sm:$0xff] %vm1476_vm15, %v5850_v59 }
0x1380 PF: > { %s27_s24 = sadd.s32 1, %s6567_s24  }
0x1381   : > { %p24_p4 = scmp.ge.s32.totalorder %s27_s24, 4  }
0x1383   :  { %26 = sbr.rel (!%p24_p4) target bundleno = 3 (0x3), region = 125 }

</bundles_post_ra>
